<compile_context>
chip_gen: v5e
topology: v5e:2x2
jax: 0.10.0
libtpu: 0.0.40
codegen_flags: <defaults>
</compile_context>

<pallas_src>
import functools
import math

import jax
import jax.numpy as jnp
from jax.experimental import pallas as pl
from jax.experimental.pallas import tpu as pltpu

_VMEM_LIMIT = 48 * 1024 * 1024


def _round_up(x, m):
    return ((x + m - 1) // m) * m


# ----------------------------------------------------------------------------
# Pallas kernels
# ----------------------------------------------------------------------------
def _conv_tap_kernel(x_ref, w_ref, b_ref, o_ref, *stats_refs,
                     taps, ho, wo, row_block, leaky, want_stats):
    """4x4 conv for one image as a few large 2-D GEMMs.

    x_ref : (n_dj, R_in, K) bf16 -- one plane per column offset dj of the 4x4
            kernel, spatially flattened to rows of length wo, so the window of
            tap (t, di, dj) is the contiguous row range
            [(r0+di)*wo, (r0+di+rb)*wo) of plane dj (pure 2-D ref slice).
    w_ref : (T, K, Cp) bf16      (Cp = Cout padded to 128 lanes)
    b_ref : (1, Cp)   f32        (zeros when the conv has no bias)
    o_ref : (ho*wo, Cp)          bf16 (intermediate) or f32 (final layer)
    stats_refs[0] (optional): (2, Cp) f32 -- per-image sum / sum-of-squares of
            the pre-activation conv output (for training-mode BatchNorm).
    """
    cp = o_ref.shape[-1]
    bias = b_ref[...]                                    # (1, Cp) f32, hoisted
    s1 = jnp.zeros((1, cp), jnp.float32)
    s2 = jnp.zeros((1, cp), jnp.float32)

    r0 = 0
    while r0 < ho:                                       # static row-block loop
        rb = min(row_block, ho - r0)
        m = rb * wo                                      # M of every dot below
        acc = jnp.zeros((m, cp), jnp.float32)
        for t, di, dj in taps:                           # 1 / 4 / 16 taps
            xs = x_ref[dj, (r0 + di) * wo:(r0 + di + rb) * wo, :]   # (m, K)
            acc = acc + jnp.dot(xs, w_ref[t],
                                preferred_element_type=jnp.float32)
        acc = acc + bias
        if leaky:
            acc = jnp.where(acc >= 0, acc, 0.2 * acc)
        if want_stats:
            s1 = s1 + jnp.sum(acc, axis=0, keepdims=True)
            s2 = s2 + jnp.sum(acc * acc, axis=0, keepdims=True)
        o_ref[r0 * wo:(r0 + rb) * wo, :] = acc.astype(o_ref.dtype)
        r0 += rb

    if want_stats:
        stats_refs[0][0:1, :] = s1
        stats_refs[0][1:2, :] = s2


def _bn_apply_kernel(x_ref, sc_ref, sh_ref, o_ref):
    """y = LeakyReLU_0.2(x * scale + shift); bf16 in/out, f32 compute."""
    y = x_ref[...].astype(jnp.float32) * sc_ref[...] + sh_ref[...]
    o_ref[...] = jnp.where(y >= 0, y, 0.2 * y).astype(o_ref.dtype)


# ----------------------------------------------------------------------------
# Shared pallas_call wrapper for all convs
# ----------------------------------------------------------------------------
def _conv_call(x_planes, w_packed, bias, *, taps, ho, wo, leaky, want_stats,
               out_dtype):
    """x_planes: (N, n_dj, R_in, K) bf16; w_packed: (T, K, Cp) bf16;
    bias: (1, Cp) f32.  Returns (N, ho, wo, Cp) [+ (N, 2, Cp) stats]."""
    n, n_dj, r_in, k = x_planes.shape
    t, _, cp = w_packed.shape

    # Row block so that M = row_block*wo ~ 256 and the f32 acc stays <~128 KiB.
    m_target = max(64, 32768 // cp)
    row_block = max(1, min(ho, m_target // max(wo, 1)))

    kernel = functools.partial(_conv_tap_kernel, taps=taps, ho=ho, wo=wo,
                               row_block=row_block, leaky=leaky,
                               want_stats=want_stats)

    out_shape = [jax.ShapeDtypeStruct((n, ho * wo, cp), out_dtype)]
    out_specs = [pl.BlockSpec((None, ho * wo, cp), lambda i: (i, 0, 0))]
    if want_stats:
        out_shape.append(jax.ShapeDtypeStruct((n, 2, cp), jnp.float32))
        out_specs.append(pl.BlockSpec((None, 2, cp), lambda i: (i, 0, 0)))

    outs = pl.pallas_call(
        kernel,
        out_shape=out_shape,
        grid=(n,),
        in_specs=[
            pl.BlockSpec((None, n_dj, r_in, k), lambda i: (i, 0, 0, 0)),
            pl.BlockSpec((t, k, cp), lambda i: (0, 0, 0)),
            pl.BlockSpec((1, cp), lambda i: (0, 0)),
        ],
        out_specs=out_specs,
        compiler_params=pltpu.CompilerParams(
            dimension_semantics=("parallel",),
            vmem_limit_bytes=_VMEM_LIMIT),
    )(x_planes, w_packed, bias)

    y = outs[0].reshape(n, ho, wo, cp)
    if want_stats:
        return y, outs[1]
    return y


# ----------------------------------------------------------------------------
# Per-layer layout preparation (plain-XLA glue, byte-count preserving-ish)
# ----------------------------------------------------------------------------
def conv_layer0_pallas(x, w_pt, b):
    """Conv2d(Cin_img, Cout, 4, stride=2, pad=1) + bias + LeakyReLU(0.2).
    All 16 taps x Cin K-packed into the contraction dim (K = 16*Cin)."""
    n, h, w_sp, cin = x.shape
    cout = w_pt.shape[0]
    ho, wo = h // 2, w_sp // 2
    cp = _round_up(cout, 128)

    xp = jnp.pad(x, ((0, 0), (1, 1), (1, 1), (0, 0)))
    cols = [xp[:, i:i + 2 * ho:2, j:j + 2 * wo:2, :]
            for i in range(4) for j in range(4)]
    patches = jnp.concatenate(cols, axis=-1)                 # (N, ho, wo, 16*Cin)
    patches = patches.reshape(n, 1, ho * wo, 16 * cin).astype(jnp.bfloat16)

    wk = jnp.transpose(w_pt, (2, 3, 1, 0)).reshape(16 * cin, cout)
    wk = jnp.pad(wk, ((0, 0), (0, cp - cout)))[None].astype(jnp.bfloat16)
    bias = jnp.pad(b.astype(jnp.float32), (0, cp - cout)).reshape(1, cp)

    return _conv_call(patches, wk, bias, taps=[(0, 0, 0)], ho=ho, wo=wo,
                      leaky=True, want_stats=False, out_dtype=jnp.bfloat16)


def conv_stride2_pallas(x, w_pt, *, want_stats=True):
    """4x4 stride-2 conv (bias-free, BN follows).  x: (N, H, W, C) bf16 with
    C a multiple of 128.  Phase-packs the 4 spatial parities into the channel
    dim so each (di, dj) slab is one K = 4*C matmul."""
    n, h, w_sp, c = x.shape
    assert h % 2 == 0 and w_sp % 2 == 0
    cout, cin_w = w_pt.shape[0], w_pt.shape[1]
    ho, wo = h // 2, w_sp // 2
    hq, wq = ho + 1, wo + 1
    cp = _round_up(cout, 128)

    xp = jnp.pad(x, ((0, 0), (1, 1), (1, 1), (0, 0)))
    xq = xp.reshape(n, hq, 2, wq, 2, c).transpose(0, 1, 3, 2, 4, 5)
    xq = xq.reshape(n, hq, wq, 4 * c)                        # channel = (a,b,cin)
    planes = jnp.stack([xq[:, :, dj:dj + wo, :] for dj in range(2)], axis=1)
    planes = planes.reshape(n, 2, hq * wo, 4 * c)            # dj-compacted

    w4 = jnp.transpose(w_pt, (2, 3, 1, 0))                   # (4, 4, cin_w, cout)
    w4 = jnp.pad(w4, ((0, 0), (0, 0), (0, c - cin_w), (0, cp - cout)))
    slabs = []
    for di in range(2):
        for dj in range(2):
            slabs.append(jnp.concatenate(
                [w4[2 * di + a, 2 * dj + b] for a in range(2) for b in range(2)],
                axis=0))                                     # (4*C, Cp)
    wk = jnp.stack(slabs).astype(jnp.bfloat16)               # (4, 4*C, Cp)
    bias = jnp.zeros((1, cp), jnp.float32)

    taps = [(2 * di + dj, di, dj) for di in range(2) for dj in range(2)]
    return _conv_call(planes, wk, bias, taps=taps, ho=ho, wo=wo,
                      leaky=False, want_stats=want_stats, out_dtype=jnp.bfloat16)


def conv_stride1_pallas(x, w_pt, b, *, leaky, want_stats, out_dtype):
    """4x4 stride-1 conv (pad=1).  x: (N, H, W, C) bf16, C multiple of 128."""
    n, h, w_sp, c = x.shape
    cout, cin_w = w_pt.shape[0], w_pt.shape[1]
    ho, wo = h - 1, w_sp - 1
    cp = _round_up(cout, 128)

    xp = jnp.pad(x, ((0, 0), (1, 1), (1, 1), (0, 0)))        # (N, H+2, W+2, C)
    planes = jnp.stack([xp[:, :, dj:dj + wo, :] for dj in range(4)], axis=1)
    planes = planes.reshape(n, 4, (h + 2) * wo, c)           # dj-compacted

    w16 = jnp.transpose(w_pt, (2, 3, 1, 0)).reshape(16, cin_w, cout)
    w16 = jnp.pad(w16, ((0, 0), (0, c - cin_w), (0, cp - cout))).astype(jnp.bfloat16)
    if b is None:
        bias = jnp.zeros((1, cp), jnp.float32)
    else:
        bias = jnp.pad(b.astype(jnp.float32), (0, cp - cout)).reshape(1, cp)

    taps = [(4 * i + j, i, j) for i in range(4) for j in range(4)]
    return _conv_call(planes, w16, bias, taps=taps, ho=ho, wo=wo,
                      leaky=leaky, want_stats=want_stats, out_dtype=out_dtype)


# ----------------------------------------------------------------------------
# BatchNorm (training-mode batch stats) + LeakyReLU, tiled over rows
# ----------------------------------------------------------------------------
def bn_leaky_pallas(y, stats, gamma, beta, eps=1e-5):
    """y: (N, Ho, Wo, Cp) bf16 conv output; stats: (N, 2, Cp) f32 sum/sumsq.
    Padded channels (gamma = beta = stats = 0) stay exactly zero."""
    n, ho, wo, cp = y.shape
    m = n * ho * wo
    cout = gamma.shape[0]

    # Tiny (2, Cp) cross-batch combine in plain XLA.
    s = jnp.sum(stats, axis=0)
    mean = s[0] / m
    # NOTE: E[x^2] - mean^2 in f32 (clamped); acceptable drift for BN stats.
    var = jnp.maximum(s[1] / m - mean * mean, 0.0)
    g = jnp.pad(gamma.astype(jnp.float32), (0, cp - cout))
    bt = jnp.pad(beta.astype(jnp.float32), (0, cp - cout))
    scale = g * jax.lax.rsqrt(var + eps)
    shift = bt - mean * scale

    x2 = y.reshape(m, cp)
    tm = min(m, 2048)
    mp = _round_up(m, tm)
    if mp != m:
        x2 = jnp.pad(x2, ((0, mp - m), (0, 0)))

    out = pl.pallas_call(
        _bn_apply_kernel,
        out_shape=jax.ShapeDtypeStruct((mp, cp), y.dtype),
        grid=(mp // tm,),
        in_specs=[pl.BlockSpec((tm, cp), lambda i: (i, 0)),
                  pl.BlockSpec((1, cp), lambda i: (0, 0)),
                  pl.BlockSpec((1, cp), lambda i: (0, 0))],
        out_specs=pl.BlockSpec((tm, cp), lambda i: (i, 0)),
        compiler_params=pltpu.CompilerParams(
            dimension_semantics=("parallel",),
            vmem_limit_bytes=_VMEM_LIMIT),
    )(x2, scale.reshape(1, cp), shift.reshape(1, cp))
    return out[:m].reshape(n, ho, wo, cp)


# ----------------------------------------------------------------------------
# Discriminator parameters + forward
# ----------------------------------------------------------------------------
def init_discriminator_params(key, img_channels, num_filters_last=64, n_layers=3):
    """Deterministic synthetic init (PyTorch-default-style uniform bounds)."""
    params = {}

    def conv_init(key, cout, cin, k, with_bias):
        fan_in = cin * k * k
        bound = 1.0 / math.sqrt(fan_in)
        wkey, bkey = jax.random.split(key)
        w = jax.random.uniform(wkey, (cout, cin, k, k), jnp.float32, -bound, bound)
        b = (jax.random.uniform(bkey, (cout,), jnp.float32, -bound, bound)
             if with_bias else None)
        return w, b

    keys = jax.random.split(key, n_layers + 2)

    # layer 0: Conv2d(img_channels, nf, 4, 2, 1) + LeakyReLU
    params["w0"], params["b0"] = conv_init(keys[0], num_filters_last,
                                           img_channels, 4, True)

    mult = 1
    channels = [num_filters_last]
    for i in range(1, n_layers + 1):
        mult_last, mult = mult, min(2 ** i, 8)
        cin = num_filters_last * mult_last
        cout = num_filters_last * mult
        params[f"w{i}"], _ = conv_init(keys[i], cout, cin, 4, False)   # bias=False
        params[f"g{i}"] = jnp.ones((cout,), jnp.float32)               # BN gamma
        params[f"beta{i}"] = jnp.zeros((cout,), jnp.float32)           # BN beta
        channels.append(cout)

    # final: Conv2d(nf*mult, 1, 4, 1, 1) with bias
    params["w_out"], params["b_out"] = conv_init(keys[-1], 1, channels[-1], 4, True)
    return params


@functools.partial(jax.jit, static_argnames=("n_layers",))
def discriminator_forward(x_nchw, params, *, n_layers):
    x = jnp.transpose(x_nchw, (0, 2, 3, 1)).astype(jnp.float32)   # NCHW -> NHWC

    # layer 0: Conv(stride 2) + bias + LeakyReLU, K-packed GEMM (bf16 out).
    x = conv_layer0_pallas(x, params["w0"], params["b0"])

    # Conv(bias=False) + BatchNorm(batch stats) + LeakyReLU.
    for i in range(1, n_layers + 1):
        w = params[f"w{i}"]
        if i < n_layers:
            y, stats = conv_stride2_pallas(x, w, want_stats=True)
        else:
            y, stats = conv_stride1_pallas(x, w, None, leaky=False,
                                           want_stats=True,
                                           out_dtype=jnp.bfloat16)
        x = bn_leaky_pallas(y, stats, params[f"g{i}"], params[f"beta{i}"])

    # Final Conv (Cout=1, with bias, no activation); padded lanes sliced off.
    out = conv_stride1_pallas(x, params["w_out"], params["b_out"],
                              leaky=False, want_stats=False,
                              out_dtype=jnp.float32)
    out = out[..., :1]
    return jnp.transpose(out, (0, 3, 1, 2))                        # NHWC -> NCHW


# ----------------------------------------------------------------------------
if __name__ == "__main__":
    key = jax.random.PRNGKey(0)
    pkey, xkey = jax.random.split(key)

    # Small config: batch=2, img_channels=4, 32x32 images, num_filters_last=8.
    # (32 is the smallest spatial size for which the 5-conv PatchGAN stack is valid.)
    img_channels, nf, n_layers = 4, 8, 3
    params = init_discriminator_params(pkey, img_channels, nf, n_layers)

    x = jax.random.normal(xkey, (2, img_channels, 32, 32), jnp.float32)  # NCHW

    out = discriminator_forward(x, params, n_layers=n_layers)
    out = jax.block_until_ready(out)

    assert out.shape == (2, 1, 2, 2), out.shape
    assert out.dtype == jnp.float32
    assert bool(jnp.all(jnp.isfinite(out)))
    print("KERNEL_OK")
</pallas_src>

<mosaic_0001>
module attributes {stable_mosaic.version = 11 : i64} {
  func.func @_conv_tap_kernel(%arg0: i32, %arg1: memref<1x1x256x64xbf16, #tpu.memory_space<vmem>>, %arg2: memref<1x64x128xbf16, #tpu.memory_space<vmem>>, %arg3: memref<1x128xf32, #tpu.memory_space<vmem>>, %arg4: memref<1x256x128xbf16, #tpu.memory_space<vmem>>) attributes {dimension_semantics = [#tpu.dimension_semantics<parallel>], iteration_bounds = array<i64: 2>, scalar_prefetch = 0 : i64, scratch_operands = 0 : i64, tpu.core_type = #tpu.core_type<tc>, window_params = [{transform_indices = @transform_0, window_bounds = array<i64: 1, 1, 256, 64>}, {pipeline_mode = #tpu.pipeline_mode<synchronous>, transform_indices = @transform_1, window_bounds = array<i64: 1, 64, 128>}, {pipeline_mode = #tpu.pipeline_mode<synchronous>, transform_indices = @transform_2, window_bounds = array<i64: 1, 128>}, {transform_indices = @transform_3, window_bounds = array<i64: 1, 256, 128>}]} {
    %c0 = arith.constant 0 : index
    %c0_0 = arith.constant 0 : index
    %0 = vector.load %arg3[%c0, %c0_0] : memref<1x128xf32, #tpu.memory_space<vmem>>, vector<1x128xf32>
    %cst = arith.constant 0.000000e+00 : f32
    %1 = vector.broadcast %cst : f32 to vector<256x128xf32>
    %c0_1 = arith.constant 0 : index
    %c0_2 = arith.constant 0 : index
    %c0_3 = arith.constant 0 : index
    %c0_4 = arith.constant 0 : index
    %2 = vector.load %arg1[%c0_1, %c0_2, %c0_3, %c0_4] : memref<1x1x256x64xbf16, #tpu.memory_space<vmem>>, vector<1x1x256x64xbf16>
    %3 = vector.shape_cast %2 : vector<1x1x256x64xbf16> to vector<256x64xbf16>
    %c0_5 = arith.constant 0 : index
    %c0_6 = arith.constant 0 : index
    %c0_7 = arith.constant 0 : index
    %4 = vector.load %arg2[%c0_5, %c0_6, %c0_7] : memref<1x64x128xbf16, #tpu.memory_space<vmem>>, vector<1x64x128xbf16>
    %5 = vector.shape_cast %4 : vector<1x64x128xbf16> to vector<64x128xbf16>
    %cst_8 = arith.constant dense<0.000000e+00> : vector<256x128xf32>
    %6 = tpu.matmul %3, %5, %cst_8 {dimension_numbers = #tpu.dot_dimension_numbers<[1], [0], [0], [1], [0, 0, 1, 1], [], []>} : vector<256x64xbf16>, vector<64x128xbf16>, vector<256x128xf32> -> vector<256x128xf32>
    %7 = arith.addf %1, %6 : vector<256x128xf32>
    %8 = vector.broadcast %0 : vector<1x128xf32> to vector<256x128xf32>
    %9 = arith.addf %7, %8 : vector<256x128xf32>
    %cst_9 = arith.constant 0.000000e+00 : f32
    %10 = vector.broadcast %cst_9 : f32 to vector<256x128xf32>
    %11 = arith.cmpf oge, %9, %10 : vector<256x128xf32>
    %cst_10 = arith.constant 2.000000e-01 : f32
    %12 = vector.broadcast %cst_10 : f32 to vector<256x128xf32>
    %13 = arith.mulf %12, %9 : vector<256x128xf32>
    %14 = arith.select %11, %9, %13 : vector<256x128xi1>, vector<256x128xf32>
    %15 = arith.truncf %14 : vector<256x128xf32> to vector<256x128xbf16>
    %c0_11 = arith.constant 0 : index
    %c0_12 = arith.constant 0 : index
    %c0_13 = arith.constant 0 : index
    %16 = vector.load %arg4[%c0_11, %c0_12, %c0_13] : memref<1x256x128xbf16, #tpu.memory_space<vmem>>, vector<1x256x128xbf16>
    %17 = vector.shape_cast %16 : vector<1x256x128xbf16> to vector<256x128xbf16>
    %18 = vector.shape_cast %15 : vector<256x128xbf16> to vector<1x256x128xbf16>
    tpu.vector_store %arg4[%c0_11, %c0_12, %c0_13], %18 {strides = array<i32>} : memref<1x256x128xbf16, #tpu.memory_space<vmem>>, vector<1x256x128xbf16>,
    return
  }
  func.func @transform_0(%arg0: i32) -> (i32, i32, i32, i32) {
    %c0_i32 = arith.constant 0 : i32
    %c0_i32_0 = arith.constant 0 : i32
    %c0_i32_1 = arith.constant 0 : i32
    %c0_i32_2 = arith.constant 0 : i32
    return %arg0, %c0_i32, %c0_i32_0, %c0_i32_1 : i32, i32, i32, i32
  }
  func.func @transform_1(%arg0: i32) -> (i32, i32, i32) {
    %c0_i32 = arith.constant 0 : i32
    %c0_i32_0 = arith.constant 0 : i32
    %c0_i32_1 = arith.constant 0 : i32
    %c0_i32_2 = arith.constant 0 : i32
    return %c0_i32, %c0_i32_0, %c0_i32_1 : i32, i32, i32
  }
  func.func @transform_2(%arg0: i32) -> (i32, i32) {
    %c0_i32 = arith.constant 0 : i32
    %c0_i32_0 = arith.constant 0 : i32
    %c0_i32_1 = arith.constant 0 : i32
    return %c0_i32, %c0_i32_0 : i32, i32
  }
  func.func @transform_3(%arg0: i32) -> (i32, i32, i32) {
    %c0_i32 = arith.constant 0 : i32
    %c0_i32_0 = arith.constant 0 : i32
    %c0_i32_1 = arith.constant 0 : i32
    return %arg0, %c0_i32, %c0_i32_0 : i32, i32, i32
  }
}

module attributes {stable_mosaic.version = 11 : i64} {
  func.func @_conv_tap_kernel(%arg0: i32, %arg1: memref<1x2x72x512xbf16, #tpu.memory_space<vmem>>, %arg2: memref<4x512x128xbf16, #tpu.memory_space<vmem>>, %arg3: memref<1x128xf32, #tpu.memory_space<vmem>>, %arg4: memref<1x64x128xbf16, #tpu.memory_space<vmem>>, %arg5: memref<1x2x128xf32, #tpu.memory_space<vmem>>) attributes {dimension_semantics = [#tpu.dimension_semantics<parallel>], iteration_bounds = array<i64: 2>, scalar_prefetch = 0 : i64, scratch_operands = 0 : i64, tpu.core_type = #tpu.core_type<tc>, window_params = [{transform_indices = @transform_0, window_bounds = array<i64: 1, 2, 72, 512>}, {pipeline_mode = #tpu.pipeline_mode<synchronous>, transform_indices = @transform_1, window_bounds = array<i64: 4, 512, 128>}, {pipeline_mode = #tpu.pipeline_mode<synchronous>, transform_indices = @transform_2, window_bounds = array<i64: 1, 128>}, {transform_indices = @transform_3, window_bounds = array<i64: 1, 64, 128>}, {transform_indices = @transform_4, window_bounds = array<i64: 1, 2, 128>}]} {
    %c0 = arith.constant 0 : index
    %c0_0 = arith.constant 0 : index
    %0 = vector.load %arg3[%c0, %c0_0] : memref<1x128xf32, #tpu.memory_space<vmem>>, vector<1x128xf32>
    %cst = arith.constant 0.000000e+00 : f32
    %1 = vector.broadcast %cst : f32 to vector<1x128xf32>
    %cst_1 = arith.constant 0.000000e+00 : f32
    %2 = vector.broadcast %cst_1 : f32 to vector<1x128xf32>
    %cst_2 = arith.constant 0.000000e+00 : f32
    %3 = vector.broadcast %cst_2 : f32 to vector<64x128xf32>
    %c0_3 = arith.constant 0 : index
    %c0_4 = arith.constant 0 : index
    %c0_5 = arith.constant 0 : index
    %c0_6 = arith.constant 0 : index
    %4 = vector.load %arg1[%c0_3, %c0_4, %c0_5, %c0_6] : memref<1x2x72x512xbf16, #tpu.memory_space<vmem>>, vector<1x1x64x512xbf16>
    %5 = vector.shape_cast %4 : vector<1x1x64x512xbf16> to vector<64x512xbf16>
    %c0_7 = arith.constant 0 : index
    %c0_8 = arith.constant 0 : index
    %c0_9 = arith.constant 0 : index
    %6 = vector.load %arg2[%c0_7, %c0_8, %c0_9] : memref<4x512x128xbf16, #tpu.memory_space<vmem>>, vector<1x512x128xbf16>
    %7 = vector.shape_cast %6 : vector<1x512x128xbf16> to vector<512x128xbf16>
    %cst_10 = arith.constant dense<0.000000e+00> : vector<64x128xf32>
    %8 = tpu.matmul %5, %7, %cst_10 {dimension_numbers = #tpu.dot_dimension_numbers<[1], [0], [0], [1], [0, 0, 1, 1], [], []>} : vector<64x512xbf16>, vector<512x128xbf16>, vector<64x128xf32> -> vector<64x128xf32>
    %9 = arith.addf %3, %8 : vector<64x128xf32>
    %c0_11 = arith.constant 0 : index
    %c1 = arith.constant 1 : index
    %c0_12 = arith.constant 0 : index
    %c0_13 = arith.constant 0 : index
    %10 = vector.load %arg1[%c0_11, %c1, %c0_12, %c0_13] : memref<1x2x72x512xbf16, #tpu.memory_space<vmem>>, vector<1x1x64x512xbf16>
    %11 = vector.shape_cast %10 : vector<1x1x64x512xbf16> to vector<64x512xbf16>
    %c1_14 = arith.constant 1 : index
    %c0_15 = arith.constant 0 : index
    %c0_16 = arith.constant 0 : index
    %12 = vector.load %arg2[%c1_14, %c0_15, %c0_16] : memref<4x512x128xbf16, #tpu.memory_space<vmem>>, vector<1x512x128xbf16>
    %13 = vector.shape_cast %12 : vector<1x512x128xbf16> to vector<512x128xbf16>
    %cst_17 = arith.constant dense<0.000000e+00> : vector<64x128xf32>
    %14 = tpu.matmul %11, %13, %cst_17 {dimension_numbers = #tpu.dot_dimension_numbers<[1], [0], [0], [1], [0, 0, 1, 1], [], []>} : vector<64x512xbf16>, vector<512x128xbf16>, vector<64x128xf32> -> vector<64x128xf32>
    %15 = arith.addf %9, %14 : vector<64x128xf32>
    %c0_18 = arith.constant 0 : index
    %c0_19 = arith.constant 0 : index
    %c8 = arith.constant 8 : index
    %c0_20 = arith.constant 0 : index
    %16 = vector.load %arg1[%c0_18, %c0_19, %c8, %c0_20] : memref<1x2x72x512xbf16, #tpu.memory_space<vmem>>, vector<1x1x64x512xbf16>
    %17 = vector.shape_cast %16 : vector<1x1x64x512xbf16> to vector<64x512xbf16>
    %c2 = arith.constant 2 : index
    %c0_21 = arith.constant 0 : index
    %c0_22 = arith.constant 0 : index
    %18 = vector.load %arg2[%c2, %c0_21, %c0_22] : memref<4x512x128xbf16, #tpu.memory_space<vmem>>, vector<1x512x128xbf16>
    %19 = vector.shape_cast %18 : vector<1x512x128xbf16> to vector<512x128xbf16>
    %cst_23 = arith.constant dense<0.000000e+00> : vector<64x128xf32>
    %20 = tpu.matmul %17, %19, %cst_23 {dimension_numbers = #tpu.dot_dimension_numbers<[1], [0], [0], [1], [0, 0, 1, 1], [], []>} : vector<64x512xbf16>, vector<512x128xbf16>, vector<64x128xf32> -> vector<64x128xf32>
    %21 = arith.addf %15, %20 : vector<64x128xf32>
    %c0_24 = arith.constant 0 : index
    %c1_25 = arith.constant 1 : index
    %c8_26 = arith.constant 8 : index
    %c0_27 = arith.constant 0 : index
    %22 = vector.load %arg1[%c0_24, %c1_25, %c8_26, %c0_27] : memref<1x2x72x512xbf16, #tpu.memory_space<vmem>>, vector<1x1x64x512xbf16>
    %23 = vector.shape_cast %22 : vector<1x1x64x512xbf16> to vector<64x512xbf16>
    %c3 = arith.constant 3 : index
    %c0_28 = arith.constant 0 : index
    %c0_29 = arith.constant 0 : index
    %24 = vector.load %arg2[%c3, %c0_28, %c0_29] : memref<4x512x128xbf16, #tpu.memory_space<vmem>>, vector<1x512x128xbf16>
    %25 = vector.shape_cast %24 : vector<1x512x128xbf16> to vector<512x128xbf16>
    %cst_30 = arith.constant dense<0.000000e+00> : vector<64x128xf32>
    %26 = tpu.matmul %23, %25, %cst_30 {dimension_numbers = #tpu.dot_dimension_numbers<[1], [0], [0], [1], [0, 0, 1, 1], [], []>} : vector<64x512xbf16>, vector<512x128xbf16>, vector<64x128xf32> -> vector<64x128xf32>
    %27 = arith.addf %21, %26 : vector<64x128xf32>
    %28 = vector.broadcast %0 : vector<1x128xf32> to vector<64x128xf32>
    %29 = arith.addf %27, %28 : vector<64x128xf32>
    %cst_31 = arith.constant dense<0.000000e+00> : vector<128xf32>
    %30 = vector.multi_reduction <add>, %29, %cst_31 [0] : vector<64x128xf32> to vector<128xf32>
    %31 = vector.shape_cast %30 : vector<128xf32> to vector<1x128xf32>
    %32 = arith.addf %1, %31 : vector<1x128xf32>
    %33 = arith.mulf %29, %29 : vector<64x128xf32>
    %cst_32 = arith.constant dense<0.000000e+00> : vector<128xf32>
    %34 = vector.multi_reduction <add>, %33, %cst_32 [0] : vector<64x128xf32> to vector<128xf32>
    %35 = vector.shape_cast %34 : vector<128xf32> to vector<1x128xf32>
    %36 = arith.addf %2, %35 : vector<1x128xf32>
    %37 = arith.truncf %29 : vector<64x128xf32> to vector<64x128xbf16>
    %c0_33 = arith.constant 0 : index
    %c0_34 = arith.constant 0 : index
    %c0_35 = arith.constant 0 : index
    %38 = vector.load %arg4[%c0_33, %c0_34, %c0_35] : memref<1x64x128xbf16, #tpu.memory_space<vmem>>, vector<1x64x128xbf16>
    %39 = vector.shape_cast %38 : vector<1x64x128xbf16> to vector<64x128xbf16>
    %40 = vector.shape_cast %37 : vector<64x128xbf16> to vector<1x64x128xbf16>
    tpu.vector_store %arg4[%c0_33, %c0_34, %c0_35], %40 {strides = array<i32>} : memref<1x64x128xbf16, #tpu.memory_space<vmem>>, vector<1x64x128xbf16>,
    %c0_36 = arith.constant 0 : index
    %c0_37 = arith.constant 0 : index
    %c0_38 = arith.constant 0 : index
    %41 = vector.load %arg5[%c0_36, %c0_37, %c0_38] : memref<1x2x128xf32, #tpu.memory_space<vmem>>, vector<1x1x128xf32>
    %42 = vector.shape_cast %41 : vector<1x1x128xf32> to vector<1x128xf32>
    %43 = vector.shape_cast %32 : vector<1x128xf32> to vector<1x1x128xf32>
    tpu.vector_store %arg5[%c0_36, %c0_37, %c0_38], %43 {strides = array<i32>} : memref<1x2x128xf32, #tpu.memory_space<vmem>>, vector<1x1x128xf32>,
    %c0_39 = arith.constant 0 : index
    %c1_40 = arith.constant 1 : index
    %c0_41 = arith.constant 0 : index
    %44 = vector.load %arg5[%c0_39, %c1_40, %c0_41] : memref<1x2x128xf32, #tpu.memory_space<vmem>>, vector<1x1x128xf32>
    %45 = vector.shape_cast %44 : vector<1x1x128xf32> to vector<1x128xf32>
    %46 = vector.shape_cast %36 : vector<1x128xf32> to vector<1x1x128xf32>
    tpu.vector_store %arg5[%c0_39, %c1_40, %c0_41], %46 {strides = array<i32>} : memref<1x2x128xf32, #tpu.memory_space<vmem>>, vector<1x1x128xf32>,
    return
  }
  func.func @transform_0(%arg0: i32) -> (i32, i32, i32, i32) {
    %c0_i32 = arith.constant 0 : i32
    %c0_i32_0 = arith.constant 0 : i32
    %c0_i32_1 = arith.constant 0 : i32
    %c0_i32_2 = arith.constant 0 : i32
    return %arg0, %c0_i32, %c0_i32_0, %c0_i32_1 : i32, i32, i32, i32
  }
  func.func @transform_1(%arg0: i32) -> (i32, i32, i32) {
    %c0_i32 = arith.constant 0 : i32
    %c0_i32_0 = arith.constant 0 : i32
    %c0_i32_1 = arith.constant 0 : i32
    %c0_i32_2 = arith.constant 0 : i32
    return %c0_i32, %c0_i32_0, %c0_i32_1 : i32, i32, i32
  }
  func.func @transform_2(%arg0: i32) -> (i32, i32) {
    %c0_i32 = arith.constant 0 : i32
    %c0_i32_0 = arith.constant 0 : i32
    %c0_i32_1 = arith.constant 0 : i32
    return %c0_i32, %c0_i32_0 : i32, i32
  }
  func.func @transform_3(%arg0: i32) -> (i32, i32, i32) {
    %c0_i32 = arith.constant 0 : i32
    %c0_i32_0 = arith.constant 0 : i32
    %c0_i32_1 = arith.constant 0 : i32
    return %arg0, %c0_i32, %c0_i32_0 : i32, i32, i32
  }
  func.func @transform_4(%arg0: i32) -> (i32, i32, i32) {
    %c0_i32 = arith.constant 0 : i32
    %c0_i32_0 = arith.constant 0 : i32
    %c0_i32_1 = arith.constant 0 : i32
    return %arg0, %c0_i32, %c0_i32_0 : i32, i32, i32
  }
}

module attributes {stable_mosaic.version = 11 : i64} {
  func.func @_bn_apply_kernel(%arg0: i32, %arg1: memref<128x128xbf16, #tpu.memory_space<vmem>>, %arg2: memref<1x128xf32, #tpu.memory_space<vmem>>, %arg3: memref<1x128xf32, #tpu.memory_space<vmem>>, %arg4: memref<128x128xbf16, #tpu.memory_space<vmem>>) attributes {dimension_semantics = [#tpu.dimension_semantics<parallel>], iteration_bounds = array<i64: 1>, scalar_prefetch = 0 : i64, scratch_operands = 0 : i64, tpu.core_type = #tpu.core_type<tc>, window_params = [{transform_indices = @transform_0, window_bounds = array<i64: 128, 128>}, {pipeline_mode = #tpu.pipeline_mode<synchronous>, transform_indices = @transform_1, window_bounds = array<i64: 1, 128>}, {pipeline_mode = #tpu.pipeline_mode<synchronous>, transform_indices = @transform_2, window_bounds = array<i64: 1, 128>}, {transform_indices = @transform_3, window_bounds = array<i64: 128, 128>}]} {
    %c0 = arith.constant 0 : index
    %c0_0 = arith.constant 0 : index
    %0 = vector.load %arg1[%c0, %c0_0] : memref<128x128xbf16, #tpu.memory_space<vmem>>, vector<128x128xbf16>
    %1 = arith.extf %0 : vector<128x128xbf16> to vector<128x128xf32>
    %c0_1 = arith.constant 0 : index
    %c0_2 = arith.constant 0 : index
    %2 = vector.load %arg2[%c0_1, %c0_2] : memref<1x128xf32, #tpu.memory_space<vmem>>, vector<1x128xf32>
    %3 = vector.broadcast %2 : vector<1x128xf32> to vector<128x128xf32>
    %4 = arith.mulf %1, %3 : vector<128x128xf32>
    %c0_3 = arith.constant 0 : index
    %c0_4 = arith.constant 0 : index
    %5 = vector.load %arg3[%c0_3, %c0_4] : memref<1x128xf32, #tpu.memory_space<vmem>>, vector<1x128xf32>
    %6 = vector.broadcast %5 : vector<1x128xf32> to vector<128x128xf32>
    %7 = arith.addf %4, %6 : vector<128x128xf32>
    %cst = arith.constant 0.000000e+00 : f32
    %8 = vector.broadcast %cst : f32 to vector<128x128xf32>
    %9 = arith.cmpf oge, %7, %8 : vector<128x128xf32>
    %cst_5 = arith.constant 2.000000e-01 : f32
    %10 = vector.broadcast %cst_5 : f32 to vector<128x128xf32>
    %11 = arith.mulf %10, %7 : vector<128x128xf32>
    %12 = arith.select %9, %7, %11 : vector<128x128xi1>, vector<128x128xf32>
    %13 = arith.truncf %12 : vector<128x128xf32> to vector<128x128xbf16>
    %c0_6 = arith.constant 0 : index
    %c0_7 = arith.constant 0 : index
    %14 = vector.load %arg4[%c0_6, %c0_7] : memref<128x128xbf16, #tpu.memory_space<vmem>>, vector<128x128xbf16>
    tpu.vector_store %arg4[%c0_6, %c0_7], %13 {strides = array<i32>} : memref<128x128xbf16, #tpu.memory_space<vmem>>, vector<128x128xbf16>,
    return
  }
  func.func @transform_0(%arg0: i32) -> (i32, i32) {
    %c0_i32 = arith.constant 0 : i32
    %c0_i32_0 = arith.constant 0 : i32
    return %arg0, %c0_i32 : i32, i32
  }
  func.func @transform_1(%arg0: i32) -> (i32, i32) {
    %c0_i32 = arith.constant 0 : i32
    %c0_i32_0 = arith.constant 0 : i32
    %c0_i32_1 = arith.constant 0 : i32
    return %c0_i32, %c0_i32_0 : i32, i32
  }
  func.func @transform_2(%arg0: i32) -> (i32, i32) {
    %c0_i32 = arith.constant 0 : i32
    %c0_i32_0 = arith.constant 0 : i32
    %c0_i32_1 = arith.constant 0 : i32
    return %c0_i32, %c0_i32_0 : i32, i32
  }
  func.func @transform_3(%arg0: i32) -> (i32, i32) {
    %c0_i32 = arith.constant 0 : i32
    %c0_i32_0 = arith.constant 0 : i32
    return %arg0, %c0_i32 : i32, i32
  }
}

module attributes {stable_mosaic.version = 11 : i64} {
  func.func @_conv_tap_kernel(%arg0: i32, %arg1: memref<1x2x20x512xbf16, #tpu.memory_space<vmem>>, %arg2: memref<4x512x128xbf16, #tpu.memory_space<vmem>>, %arg3: memref<1x128xf32, #tpu.memory_space<vmem>>, %arg4: memref<1x16x128xbf16, #tpu.memory_space<vmem>>, %arg5: memref<1x2x128xf32, #tpu.memory_space<vmem>>) attributes {dimension_semantics = [#tpu.dimension_semantics<parallel>], iteration_bounds = array<i64: 2>, scalar_prefetch = 0 : i64, scratch_operands = 0 : i64, tpu.core_type = #tpu.core_type<tc>, window_params = [{transform_indices = @transform_0, window_bounds = array<i64: 1, 2, 20, 512>}, {pipeline_mode = #tpu.pipeline_mode<synchronous>, transform_indices = @transform_1, window_bounds = array<i64: 4, 512, 128>}, {pipeline_mode = #tpu.pipeline_mode<synchronous>, transform_indices = @transform_2, window_bounds = array<i64: 1, 128>}, {transform_indices = @transform_3, window_bounds = array<i64: 1, 16, 128>}, {transform_indices = @transform_4, window_bounds = array<i64: 1, 2, 128>}]} {
    %c0 = arith.constant 0 : index
    %c0_0 = arith.constant 0 : index
    %0 = vector.load %arg3[%c0, %c0_0] : memref<1x128xf32, #tpu.memory_space<vmem>>, vector<1x128xf32>
    %cst = arith.constant 0.000000e+00 : f32
    %1 = vector.broadcast %cst : f32 to vector<1x128xf32>
    %cst_1 = arith.constant 0.000000e+00 : f32
    %2 = vector.broadcast %cst_1 : f32 to vector<1x128xf32>
    %cst_2 = arith.constant 0.000000e+00 : f32
    %3 = vector.broadcast %cst_2 : f32 to vector<16x128xf32>
    %c0_3 = arith.constant 0 : index
    %c0_4 = arith.constant 0 : index
    %c0_5 = arith.constant 0 : index
    %c0_6 = arith.constant 0 : index
    %4 = vector.load %arg1[%c0_3, %c0_4, %c0_5, %c0_6] : memref<1x2x20x512xbf16, #tpu.memory_space<vmem>>, vector<1x1x16x512xbf16>
    %5 = vector.shape_cast %4 : vector<1x1x16x512xbf16> to vector<16x512xbf16>
    %c0_7 = arith.constant 0 : index
    %c0_8 = arith.constant 0 : index
    %c0_9 = arith.constant 0 : index
    %6 = vector.load %arg2[%c0_7, %c0_8, %c0_9] : memref<4x512x128xbf16, #tpu.memory_space<vmem>>, vector<1x512x128xbf16>
    %7 = vector.shape_cast %6 : vector<1x512x128xbf16> to vector<512x128xbf16>
    %cst_10 = arith.constant dense<0.000000e+00> : vector<16x128xf32>
    %8 = tpu.matmul %5, %7, %cst_10 {dimension_numbers = #tpu.dot_dimension_numbers<[1], [0], [0], [1], [0, 0, 1, 1], [], []>} : vector<16x512xbf16>, vector<512x128xbf16>, vector<16x128xf32> -> vector<16x128xf32>
    %9 = arith.addf %3, %8 : vector<16x128xf32>
    %c0_11 = arith.constant 0 : index
    %c1 = arith.constant 1 : index
    %c0_12 = arith.constant 0 : index
    %c0_13 = arith.constant 0 : index
    %10 = vector.load %arg1[%c0_11, %c1, %c0_12, %c0_13] : memref<1x2x20x512xbf16, #tpu.memory_space<vmem>>, vector<1x1x16x512xbf16>
    %11 = vector.shape_cast %10 : vector<1x1x16x512xbf16> to vector<16x512xbf16>
    %c1_14 = arith.constant 1 : index
    %c0_15 = arith.constant 0 : index
    %c0_16 = arith.constant 0 : index
    %12 = vector.load %arg2[%c1_14, %c0_15, %c0_16] : memref<4x512x128xbf16, #tpu.memory_space<vmem>>, vector<1x512x128xbf16>
    %13 = vector.shape_cast %12 : vector<1x512x128xbf16> to vector<512x128xbf16>
    %cst_17 = arith.constant dense<0.000000e+00> : vector<16x128xf32>
    %14 = tpu.matmul %11, %13, %cst_17 {dimension_numbers = #tpu.dot_dimension_numbers<[1], [0], [0], [1], [0, 0, 1, 1], [], []>} : vector<16x512xbf16>, vector<512x128xbf16>, vector<16x128xf32> -> vector<16x128xf32>
    %15 = arith.addf %9, %14 : vector<16x128xf32>
    %c0_18 = arith.constant 0 : index
    %c0_19 = arith.constant 0 : index
    %c4 = arith.constant 4 : index
    %c0_20 = arith.constant 0 : index
    %16 = vector.load %arg1[%c0_18, %c0_19, %c4, %c0_20] : memref<1x2x20x512xbf16, #tpu.memory_space<vmem>>, vector<1x1x16x512xbf16>
    %17 = vector.shape_cast %16 : vector<1x1x16x512xbf16> to vector<16x512xbf16>
    %c2 = arith.constant 2 : index
    %c0_21 = arith.constant 0 : index
    %c0_22 = arith.constant 0 : index
    %18 = vector.load %arg2[%c2, %c0_21, %c0_22] : memref<4x512x128xbf16, #tpu.memory_space<vmem>>, vector<1x512x128xbf16>
    %19 = vector.shape_cast %18 : vector<1x512x128xbf16> to vector<512x128xbf16>
    %cst_23 = arith.constant dense<0.000000e+00> : vector<16x128xf32>
    %20 = tpu.matmul %17, %19, %cst_23 {dimension_numbers = #tpu.dot_dimension_numbers<[1], [0], [0], [1], [0, 0, 1, 1], [], []>} : vector<16x512xbf16>, vector<512x128xbf16>, vector<16x128xf32> -> vector<16x128xf32>
    %21 = arith.addf %15, %20 : vector<16x128xf32>
    %c0_24 = arith.constant 0 : index
    %c1_25 = arith.constant 1 : index
    %c4_26 = arith.constant 4 : index
    %c0_27 = arith.constant 0 : index
    %22 = vector.load %arg1[%c0_24, %c1_25, %c4_26, %c0_27] : memref<1x2x20x512xbf16, #tpu.memory_space<vmem>>, vector<1x1x16x512xbf16>
    %23 = vector.shape_cast %22 : vector<1x1x16x512xbf16> to vector<16x512xbf16>
    %c3 = arith.constant 3 : index
    %c0_28 = arith.constant 0 : index
    %c0_29 = arith.constant 0 : index
    %24 = vector.load %arg2[%c3, %c0_28, %c0_29] : memref<4x512x128xbf16, #tpu.memory_space<vmem>>, vector<1x512x128xbf16>
    %25 = vector.shape_cast %24 : vector<1x512x128xbf16> to vector<512x128xbf16>
    %cst_30 = arith.constant dense<0.000000e+00> : vector<16x128xf32>
    %26 = tpu.matmul %23, %25, %cst_30 {dimension_numbers = #tpu.dot_dimension_numbers<[1], [0], [0], [1], [0, 0, 1, 1], [], []>} : vector<16x512xbf16>, vector<512x128xbf16>, vector<16x128xf32> -> vector<16x128xf32>
    %27 = arith.addf %21, %26 : vector<16x128xf32>
    %28 = vector.broadcast %0 : vector<1x128xf32> to vector<16x128xf32>
    %29 = arith.addf %27, %28 : vector<16x128xf32>
    %cst_31 = arith.constant dense<0.000000e+00> : vector<128xf32>
    %30 = vector.multi_reduction <add>, %29, %cst_31 [0] : vector<16x128xf32> to vector<128xf32>
    %31 = vector.shape_cast %30 : vector<128xf32> to vector<1x128xf32>
    %32 = arith.addf %1, %31 : vector<1x128xf32>
    %33 = arith.mulf %29, %29 : vector<16x128xf32>
    %cst_32 = arith.constant dense<0.000000e+00> : vector<128xf32>
    %34 = vector.multi_reduction <add>, %33, %cst_32 [0] : vector<16x128xf32> to vector<128xf32>
    %35 = vector.shape_cast %34 : vector<128xf32> to vector<1x128xf32>
    %36 = arith.addf %2, %35 : vector<1x128xf32>
    %37 = arith.truncf %29 : vector<16x128xf32> to vector<16x128xbf16>
    %c0_33 = arith.constant 0 : index
    %c0_34 = arith.constant 0 : index
    %c0_35 = arith.constant 0 : index
    %38 = vector.load %arg4[%c0_33, %c0_34, %c0_35] : memref<1x16x128xbf16, #tpu.memory_space<vmem>>, vector<1x16x128xbf16>
    %39 = vector.shape_cast %38 : vector<1x16x128xbf16> to vector<16x128xbf16>
    %40 = vector.shape_cast %37 : vector<16x128xbf16> to vector<1x16x128xbf16>
    tpu.vector_store %arg4[%c0_33, %c0_34, %c0_35], %40 {strides = array<i32>} : memref<1x16x128xbf16, #tpu.memory_space<vmem>>, vector<1x16x128xbf16>,
    %c0_36 = arith.constant 0 : index
    %c0_37 = arith.constant 0 : index
    %c0_38 = arith.constant 0 : index
    %41 = vector.load %arg5[%c0_36, %c0_37, %c0_38] : memref<1x2x128xf32, #tpu.memory_space<vmem>>, vector<1x1x128xf32>
    %42 = vector.shape_cast %41 : vector<1x1x128xf32> to vector<1x128xf32>
    %43 = vector.shape_cast %32 : vector<1x128xf32> to vector<1x1x128xf32>
    tpu.vector_store %arg5[%c0_36, %c0_37, %c0_38], %43 {strides = array<i32>} : memref<1x2x128xf32, #tpu.memory_space<vmem>>, vector<1x1x128xf32>,
    %c0_39 = arith.constant 0 : index
    %c1_40 = arith.constant 1 : index
    %c0_41 = arith.constant 0 : index
    %44 = vector.load %arg5[%c0_39, %c1_40, %c0_41] : memref<1x2x128xf32, #tpu.memory_space<vmem>>, vector<1x1x128xf32>
    %45 = vector.shape_cast %44 : vector<1x1x128xf32> to vector<1x128xf32>
    %46 = vector.shape_cast %36 : vector<1x128xf32> to vector<1x1x128xf32>
    tpu.vector_store %arg5[%c0_39, %c1_40, %c0_41], %46 {strides = array<i32>} : memref<1x2x128xf32, #tpu.memory_space<vmem>>, vector<1x1x128xf32>,
    return
  }
  func.func @transform_0(%arg0: i32) -> (i32, i32, i32, i32) {
    %c0_i32 = arith.constant 0 : i32
    %c0_i32_0 = arith.constant 0 : i32
    %c0_i32_1 = arith.constant 0 : i32
    %c0_i32_2 = arith.constant 0 : i32
    return %arg0, %c0_i32, %c0_i32_0, %c0_i32_1 : i32, i32, i32, i32
  }
  func.func @transform_1(%arg0: i32) -> (i32, i32, i32) {
    %c0_i32 = arith.constant 0 : i32
    %c0_i32_0 = arith.constant 0 : i32
    %c0_i32_1 = arith.constant 0 : i32
    %c0_i32_2 = arith.constant 0 : i32
    return %c0_i32, %c0_i32_0, %c0_i32_1 : i32, i32, i32
  }
  func.func @transform_2(%arg0: i32) -> (i32, i32) {
    %c0_i32 = arith.constant 0 : i32
    %c0_i32_0 = arith.constant 0 : i32
    %c0_i32_1 = arith.constant 0 : i32
    return %c0_i32, %c0_i32_0 : i32, i32
  }
  func.func @transform_3(%arg0: i32) -> (i32, i32, i32) {
    %c0_i32 = arith.constant 0 : i32
    %c0_i32_0 = arith.constant 0 : i32
    %c0_i32_1 = arith.constant 0 : i32
    return %arg0, %c0_i32, %c0_i32_0 : i32, i32, i32
  }
  func.func @transform_4(%arg0: i32) -> (i32, i32, i32) {
    %c0_i32 = arith.constant 0 : i32
    %c0_i32_0 = arith.constant 0 : i32
    %c0_i32_1 = arith.constant 0 : i32
    return %arg0, %c0_i32, %c0_i32_0 : i32, i32, i32
  }
}

module attributes {stable_mosaic.version = 11 : i64} {
  func.func @_bn_apply_kernel(%arg0: i32, %arg1: memref<32x128xbf16, #tpu.memory_space<vmem>>, %arg2: memref<1x128xf32, #tpu.memory_space<vmem>>, %arg3: memref<1x128xf32, #tpu.memory_space<vmem>>, %arg4: memref<32x128xbf16, #tpu.memory_space<vmem>>) attributes {dimension_semantics = [#tpu.dimension_semantics<parallel>], iteration_bounds = array<i64: 1>, scalar_prefetch = 0 : i64, scratch_operands = 0 : i64, tpu.core_type = #tpu.core_type<tc>, window_params = [{transform_indices = @transform_0, window_bounds = array<i64: 32, 128>}, {pipeline_mode = #tpu.pipeline_mode<synchronous>, transform_indices = @transform_1, window_bounds = array<i64: 1, 128>}, {pipeline_mode = #tpu.pipeline_mode<synchronous>, transform_indices = @transform_2, window_bounds = array<i64: 1, 128>}, {transform_indices = @transform_3, window_bounds = array<i64: 32, 128>}]} {
    %c0 = arith.constant 0 : index
    %c0_0 = arith.constant 0 : index
    %0 = vector.load %arg1[%c0, %c0_0] : memref<32x128xbf16, #tpu.memory_space<vmem>>, vector<32x128xbf16>
    %1 = arith.extf %0 : vector<32x128xbf16> to vector<32x128xf32>
    %c0_1 = arith.constant 0 : index
    %c0_2 = arith.constant 0 : index
    %2 = vector.load %arg2[%c0_1, %c0_2] : memref<1x128xf32, #tpu.memory_space<vmem>>, vector<1x128xf32>
    %3 = vector.broadcast %2 : vector<1x128xf32> to vector<32x128xf32>
    %4 = arith.mulf %1, %3 : vector<32x128xf32>
    %c0_3 = arith.constant 0 : index
    %c0_4 = arith.constant 0 : index
    %5 = vector.load %arg3[%c0_3, %c0_4] : memref<1x128xf32, #tpu.memory_space<vmem>>, vector<1x128xf32>
    %6 = vector.broadcast %5 : vector<1x128xf32> to vector<32x128xf32>
    %7 = arith.addf %4, %6 : vector<32x128xf32>
    %cst = arith.constant 0.000000e+00 : f32
    %8 = vector.broadcast %cst : f32 to vector<32x128xf32>
    %9 = arith.cmpf oge, %7, %8 : vector<32x128xf32>
    %cst_5 = arith.constant 2.000000e-01 : f32
    %10 = vector.broadcast %cst_5 : f32 to vector<32x128xf32>
    %11 = arith.mulf %10, %7 : vector<32x128xf32>
    %12 = arith.select %9, %7, %11 : vector<32x128xi1>, vector<32x128xf32>
    %13 = arith.truncf %12 : vector<32x128xf32> to vector<32x128xbf16>
    %c0_6 = arith.constant 0 : index
    %c0_7 = arith.constant 0 : index
    %14 = vector.load %arg4[%c0_6, %c0_7] : memref<32x128xbf16, #tpu.memory_space<vmem>>, vector<32x128xbf16>
    tpu.vector_store %arg4[%c0_6, %c0_7], %13 {strides = array<i32>} : memref<32x128xbf16, #tpu.memory_space<vmem>>, vector<32x128xbf16>,
    return
  }
  func.func @transform_0(%arg0: i32) -> (i32, i32) {
    %c0_i32 = arith.constant 0 : i32
    %c0_i32_0 = arith.constant 0 : i32
    return %arg0, %c0_i32 : i32, i32
  }
  func.func @transform_1(%arg0: i32) -> (i32, i32) {
    %c0_i32 = arith.constant 0 : i32
    %c0_i32_0 = arith.constant 0 : i32
    %c0_i32_1 = arith.constant 0 : i32
    return %c0_i32, %c0_i32_0 : i32, i32
  }
  func.func @transform_2(%arg0: i32) -> (i32, i32) {
    %c0_i32 = arith.constant 0 : i32
    %c0_i32_0 = arith.constant 0 : i32
    %c0_i32_1 = arith.constant 0 : i32
    return %c0_i32, %c0_i32_0 : i32, i32
  }
  func.func @transform_3(%arg0: i32) -> (i32, i32) {
    %c0_i32 = arith.constant 0 : i32
    %c0_i32_0 = arith.constant 0 : i32
    return %arg0, %c0_i32 : i32, i32
  }
}

module attributes {stable_mosaic.version = 11 : i64} {
  func.func @_bn_apply_kernel(%arg0: i32, %arg1: memref<18x128xbf16, #tpu.memory_space<vmem>>, %arg2: memref<1x128xf32, #tpu.memory_space<vmem>>, %arg3: memref<1x128xf32, #tpu.memory_space<vmem>>, %arg4: memref<18x128xbf16, #tpu.memory_space<vmem>>) attributes {dimension_semantics = [#tpu.dimension_semantics<parallel>], iteration_bounds = array<i64: 1>, scalar_prefetch = 0 : i64, scratch_operands = 0 : i64, tpu.core_type = #tpu.core_type<tc>, window_params = [{transform_indices = @transform_0, window_bounds = array<i64: 18, 128>}, {pipeline_mode = #tpu.pipeline_mode<synchronous>, transform_indices = @transform_1, window_bounds = array<i64: 1, 128>}, {pipeline_mode = #tpu.pipeline_mode<synchronous>, transform_indices = @transform_2, window_bounds = array<i64: 1, 128>}, {transform_indices = @transform_3, window_bounds = array<i64: 18, 128>}]} {
    %c0 = arith.constant 0 : index
    %c0_0 = arith.constant 0 : index
    %0 = vector.load %arg1[%c0, %c0_0] : memref<18x128xbf16, #tpu.memory_space<vmem>>, vector<18x128xbf16>
    %1 = arith.extf %0 : vector<18x128xbf16> to vector<18x128xf32>
    %c0_1 = arith.constant 0 : index
    %c0_2 = arith.constant 0 : index
    %2 = vector.load %arg2[%c0_1, %c0_2] : memref<1x128xf32, #tpu.memory_space<vmem>>, vector<1x128xf32>
    %3 = vector.broadcast %2 : vector<1x128xf32> to vector<18x128xf32>
    %4 = arith.mulf %1, %3 : vector<18x128xf32>
    %c0_3 = arith.constant 0 : index
    %c0_4 = arith.constant 0 : index
    %5 = vector.load %arg3[%c0_3, %c0_4] : memref<1x128xf32, #tpu.memory_space<vmem>>, vector<1x128xf32>
    %6 = vector.broadcast %5 : vector<1x128xf32> to vector<18x128xf32>
    %7 = arith.addf %4, %6 : vector<18x128xf32>
    %cst = arith.constant 0.000000e+00 : f32
    %8 = vector.broadcast %cst : f32 to vector<18x128xf32>
    %9 = arith.cmpf oge, %7, %8 : vector<18x128xf32>
    %cst_5 = arith.constant 2.000000e-01 : f32
    %10 = vector.broadcast %cst_5 : f32 to vector<18x128xf32>
    %11 = arith.mulf %10, %7 : vector<18x128xf32>
    %12 = arith.select %9, %7, %11 : vector<18x128xi1>, vector<18x128xf32>
    %13 = arith.truncf %12 : vector<18x128xf32> to vector<18x128xbf16>
    %c0_6 = arith.constant 0 : index
    %c0_7 = arith.constant 0 : index
    %14 = vector.load %arg4[%c0_6, %c0_7] : memref<18x128xbf16, #tpu.memory_space<vmem>>, vector<18x128xbf16>
    tpu.vector_store %arg4[%c0_6, %c0_7], %13 {strides = array<i32>} : memref<18x128xbf16, #tpu.memory_space<vmem>>, vector<18x128xbf16>,
    return
  }
  func.func @transform_0(%arg0: i32) -> (i32, i32) {
    %c0_i32 = arith.constant 0 : i32
    %c0_i32_0 = arith.constant 0 : i32
    return %arg0, %c0_i32 : i32, i32
  }
  func.func @transform_1(%arg0: i32) -> (i32, i32) {
    %c0_i32 = arith.constant 0 : i32
    %c0_i32_0 = arith.constant 0 : i32
    %c0_i32_1 = arith.constant 0 : i32
    return %c0_i32, %c0_i32_0 : i32, i32
  }
  func.func @transform_2(%arg0: i32) -> (i32, i32) {
    %c0_i32 = arith.constant 0 : i32
    %c0_i32_0 = arith.constant 0 : i32
    %c0_i32_1 = arith.constant 0 : i32
    return %c0_i32, %c0_i32_0 : i32, i32
  }
  func.func @transform_3(%arg0: i32) -> (i32, i32) {
    %c0_i32 = arith.constant 0 : i32
    %c0_i32_0 = arith.constant 0 : i32
    return %arg0, %c0_i32 : i32, i32
  }
}

module attributes {stable_mosaic.version = 11 : i64} {
  func.func @_conv_tap_kernel(%arg0: i32, %arg1: memref<1x4x18x128xbf16, #tpu.memory_space<vmem>>, %arg2: memref<16x128x128xbf16, #tpu.memory_space<vmem>>, %arg3: memref<1x128xf32, #tpu.memory_space<vmem>>, %arg4: memref<1x9x128xbf16, #tpu.memory_space<vmem>>, %arg5: memref<1x2x128xf32, #tpu.memory_space<vmem>>) attributes {dimension_semantics = [#tpu.dimension_semantics<parallel>], iteration_bounds = array<i64: 2>, scalar_prefetch = 0 : i64, scratch_operands = 0 : i64, tpu.core_type = #tpu.core_type<tc>, window_params = [{transform_indices = @transform_0, window_bounds = array<i64: 1, 4, 18, 128>}, {pipeline_mode = #tpu.pipeline_mode<synchronous>, transform_indices = @transform_1, window_bounds = array<i64: 16, 128, 128>}, {pipeline_mode = #tpu.pipeline_mode<synchronous>, transform_indices = @transform_2, window_bounds = array<i64: 1, 128>}, {transform_indices = @transform_3, window_bounds = array<i64: 1, 9, 128>}, {transform_indices = @transform_4, window_bounds = array<i64: 1, 2, 128>}]} {
    %c0 = arith.constant 0 : index
    %c0_0 = arith.constant 0 : index
    %0 = vector.load %arg3[%c0, %c0_0] : memref<1x128xf32, #tpu.memory_space<vmem>>, vector<1x128xf32>
    %cst = arith.constant 0.000000e+00 : f32
    %1 = vector.broadcast %cst : f32 to vector<1x128xf32>
    %cst_1 = arith.constant 0.000000e+00 : f32
    %2 = vector.broadcast %cst_1 : f32 to vector<1x128xf32>
    %cst_2 = arith.constant 0.000000e+00 : f32
    %3 = vector.broadcast %cst_2 : f32 to vector<9x128xf32>
    %c0_3 = arith.constant 0 : index
    %c0_4 = arith.constant 0 : index
    %c0_5 = arith.constant 0 : index
    %c0_6 = arith.constant 0 : index
    %4 = vector.load %arg1[%c0_3, %c0_4, %c0_5, %c0_6] : memref<1x4x18x128xbf16, #tpu.memory_space<vmem>>, vector<1x1x9x128xbf16>
    %5 = vector.shape_cast %4 : vector<1x1x9x128xbf16> to vector<9x128xbf16>
    %c0_7 = arith.constant 0 : index
    %c0_8 = arith.constant 0 : index
    %c0_9 = arith.constant 0 : index
    %6 = vector.load %arg2[%c0_7, %c0_8, %c0_9] : memref<16x128x128xbf16, #tpu.memory_space<vmem>>, vector<1x128x128xbf16>
    %7 = vector.shape_cast %6 : vector<1x128x128xbf16> to vector<128x128xbf16>
    %cst_10 = arith.constant dense<0.000000e+00> : vector<9x128xf32>
    %8 = tpu.matmul %5, %7, %cst_10 {dimension_numbers = #tpu.dot_dimension_numbers<[1], [0], [0], [1], [0, 0, 1, 1], [], []>} : vector<9x128xbf16>, vector<128x128xbf16>, vector<9x128xf32> -> vector<9x128xf32>
    %9 = arith.addf %3, %8 : vector<9x128xf32>
    %c0_11 = arith.constant 0 : index
    %c1 = arith.constant 1 : index
    %c0_12 = arith.constant 0 : index
    %c0_13 = arith.constant 0 : index
    %10 = vector.load %arg1[%c0_11, %c1, %c0_12, %c0_13] : memref<1x4x18x128xbf16, #tpu.memory_space<vmem>>, vector<1x1x9x128xbf16>
    %11 = vector.shape_cast %10 : vector<1x1x9x128xbf16> to vector<9x128xbf16>
    %c1_14 = arith.constant 1 : index
    %c0_15 = arith.constant 0 : index
    %c0_16 = arith.constant 0 : index
    %12 = vector.load %arg2[%c1_14, %c0_15, %c0_16] : memref<16x128x128xbf16, #tpu.memory_space<vmem>>, vector<1x128x128xbf16>
    %13 = vector.shape_cast %12 : vector<1x128x128xbf16> to vector<128x128xbf16>
    %cst_17 = arith.constant dense<0.000000e+00> : vector<9x128xf32>
    %14 = tpu.matmul %11, %13, %cst_17 {dimension_numbers = #tpu.dot_dimension_numbers<[1], [0], [0], [1], [0, 0, 1, 1], [], []>} : vector<9x128xbf16>, vector<128x128xbf16>, vector<9x128xf32> -> vector<9x128xf32>
    %15 = arith.addf %9, %14 : vector<9x128xf32>
    %c0_18 = arith.constant 0 : index
    %c2 = arith.constant 2 : index
    %c0_19 = arith.constant 0 : index
    %c0_20 = arith.constant 0 : index
    %16 = vector.load %arg1[%c0_18, %c2, %c0_19, %c0_20] : memref<1x4x18x128xbf16, #tpu.memory_space<vmem>>, vector<1x1x9x128xbf16>
    %17 = vector.shape_cast %16 : vector<1x1x9x128xbf16> to vector<9x128xbf16>
    %c2_21 = arith.constant 2 : index
    %c0_22 = arith.constant 0 : index
    %c0_23 = arith.constant 0 : index
    %18 = vector.load %arg2[%c2_21, %c0_22, %c0_23] : memref<16x128x128xbf16, #tpu.memory_space<vmem>>, vector<1x128x128xbf16>
    %19 = vector.shape_cast %18 : vector<1x128x128xbf16> to vector<128x128xbf16>
    %cst_24 = arith.constant dense<0.000000e+00> : vector<9x128xf32>
    %20 = tpu.matmul %17, %19, %cst_24 {dimension_numbers = #tpu.dot_dimension_numbers<[1], [0], [0], [1], [0, 0, 1, 1], [], []>} : vector<9x128xbf16>, vector<128x128xbf16>, vector<9x128xf32> -> vector<9x128xf32>
    %21 = arith.addf %15, %20 : vector<9x128xf32>
    %c0_25 = arith.constant 0 : index
    %c3 = arith.constant 3 : index
    %c0_26 = arith.constant 0 : index
    %c0_27 = arith.constant 0 : index
    %22 = vector.load %arg1[%c0_25, %c3, %c0_26, %c0_27] : memref<1x4x18x128xbf16, #tpu.memory_space<vmem>>, vector<1x1x9x128xbf16>
    %23 = vector.shape_cast %22 : vector<1x1x9x128xbf16> to vector<9x128xbf16>
    %c3_28 = arith.constant 3 : index
    %c0_29 = arith.constant 0 : index
    %c0_30 = arith.constant 0 : index
    %24 = vector.load %arg2[%c3_28, %c0_29, %c0_30] : memref<16x128x128xbf16, #tpu.memory_space<vmem>>, vector<1x128x128xbf16>
    %25 = vector.shape_cast %24 : vector<1x128x128xbf16> to vector<128x128xbf16>
    %cst_31 = arith.constant dense<0.000000e+00> : vector<9x128xf32>
    %26 = tpu.matmul %23, %25, %cst_31 {dimension_numbers = #tpu.dot_dimension_numbers<[1], [0], [0], [1], [0, 0, 1, 1], [], []>} : vector<9x128xbf16>, vector<128x128xbf16>, vector<9x128xf32> -> vector<9x128xf32>
    %27 = arith.addf %21, %26 : vector<9x128xf32>
    %c0_32 = arith.constant 0 : index
    %c0_33 = arith.constant 0 : index
    %c3_34 = arith.constant 3 : index
    %c0_35 = arith.constant 0 : index
    %28 = vector.load %arg1[%c0_32, %c0_33, %c3_34, %c0_35] : memref<1x4x18x128xbf16, #tpu.memory_space<vmem>>, vector<1x1x9x128xbf16>
    %29 = vector.shape_cast %28 : vector<1x1x9x128xbf16> to vector<9x128xbf16>
    %c4 = arith.constant 4 : index
    %c0_36 = arith.constant 0 : index
    %c0_37 = arith.constant 0 : index
    %30 = vector.load %arg2[%c4, %c0_36, %c0_37] : memref<16x128x128xbf16, #tpu.memory_space<vmem>>, vector<1x128x128xbf16>
    %31 = vector.shape_cast %30 : vector<1x128x128xbf16> to vector<128x128xbf16>
    %cst_38 = arith.constant dense<0.000000e+00> : vector<9x128xf32>
    %32 = tpu.matmul %29, %31, %cst_38 {dimension_numbers = #tpu.dot_dimension_numbers<[1], [0], [0], [1], [0, 0, 1, 1], [], []>} : vector<9x128xbf16>, vector<128x128xbf16>, vector<9x128xf32> -> vector<9x128xf32>
    %33 = arith.addf %27, %32 : vector<9x128xf32>
    %c0_39 = arith.constant 0 : index
    %c1_40 = arith.constant 1 : index
    %c3_41 = arith.constant 3 : index
    %c0_42 = arith.constant 0 : index
    %34 = vector.load %arg1[%c0_39, %c1_40, %c3_41, %c0_42] : memref<1x4x18x128xbf16, #tpu.memory_space<vmem>>, vector<1x1x9x128xbf16>
    %35 = vector.shape_cast %34 : vector<1x1x9x128xbf16> to vector<9x128xbf16>
    %c5 = arith.constant 5 : index
    %c0_43 = arith.constant 0 : index
    %c0_44 = arith.constant 0 : index
    %36 = vector.load %arg2[%c5, %c0_43, %c0_44] : memref<16x128x128xbf16, #tpu.memory_space<vmem>>, vector<1x128x128xbf16>
    %37 = vector.shape_cast %36 : vector<1x128x128xbf16> to vector<128x128xbf16>
    %cst_45 = arith.constant dense<0.000000e+00> : vector<9x128xf32>
    %38 = tpu.matmul %35, %37, %cst_45 {dimension_numbers = #tpu.dot_dimension_numbers<[1], [0], [0], [1], [0, 0, 1, 1], [], []>} : vector<9x128xbf16>, vector<128x128xbf16>, vector<9x128xf32> -> vector<9x128xf32>
    %39 = arith.addf %33, %38 : vector<9x128xf32>
    %c0_46 = arith.constant 0 : index
    %c2_47 = arith.constant 2 : index
    %c3_48 = arith.constant 3 : index
    %c0_49 = arith.constant 0 : index
    %40 = vector.load %arg1[%c0_46, %c2_47, %c3_48, %c0_49] : memref<1x4x18x128xbf16, #tpu.memory_space<vmem>>, vector<1x1x9x128xbf16>
    %41 = vector.shape_cast %40 : vector<1x1x9x128xbf16> to vector<9x128xbf16>
    %c6 = arith.constant 6 : index
    %c0_50 = arith.constant 0 : index
    %c0_51 = arith.constant 0 : index
    %42 = vector.load %arg2[%c6, %c0_50, %c0_51] : memref<16x128x128xbf16, #tpu.memory_space<vmem>>, vector<1x128x128xbf16>
    %43 = vector.shape_cast %42 : vector<1x128x128xbf16> to vector<128x128xbf16>
    %cst_52 = arith.constant dense<0.000000e+00> : vector<9x128xf32>
    %44 = tpu.matmul %41, %43, %cst_52 {dimension_numbers = #tpu.dot_dimension_numbers<[1], [0], [0], [1], [0, 0, 1, 1], [], []>} : vector<9x128xbf16>, vector<128x128xbf16>, vector<9x128xf32> -> vector<9x128xf32>
    %45 = arith.addf %39, %44 : vector<9x128xf32>
    %c0_53 = arith.constant 0 : index
    %c3_54 = arith.constant 3 : index
    %c3_55 = arith.constant 3 : index
    %c0_56 = arith.constant 0 : index
    %46 = vector.load %arg1[%c0_53, %c3_54, %c3_55, %c0_56] : memref<1x4x18x128xbf16, #tpu.memory_space<vmem>>, vector<1x1x9x128xbf16>
    %47 = vector.shape_cast %46 : vector<1x1x9x128xbf16> to vector<9x128xbf16>
    %c7 = arith.constant 7 : index
    %c0_57 = arith.constant 0 : index
    %c0_58 = arith.constant 0 : index
    %48 = vector.load %arg2[%c7, %c0_57, %c0_58] : memref<16x128x128xbf16, #tpu.memory_space<vmem>>, vector<1x128x128xbf16>
    %49 = vector.shape_cast %48 : vector<1x128x128xbf16> to vector<128x128xbf16>
    %cst_59 = arith.constant dense<0.000000e+00> : vector<9x128xf32>
    %50 = tpu.matmul %47, %49, %cst_59 {dimension_numbers = #tpu.dot_dimension_numbers<[1], [0], [0], [1], [0, 0, 1, 1], [], []>} : vector<9x128xbf16>, vector<128x128xbf16>, vector<9x128xf32> -> vector<9x128xf32>
    %51 = arith.addf %45, %50 : vector<9x128xf32>
    %c0_60 = arith.constant 0 : index
    %c0_61 = arith.constant 0 : index
    %c6_62 = arith.constant 6 : index
    %c0_63 = arith.constant 0 : index
    %52 = vector.load %arg1[%c0_60, %c0_61, %c6_62, %c0_63] : memref<1x4x18x128xbf16, #tpu.memory_space<vmem>>, vector<1x1x9x128xbf16>
    %53 = vector.shape_cast %52 : vector<1x1x9x128xbf16> to vector<9x128xbf16>
    %c8 = arith.constant 8 : index
    %c0_64 = arith.constant 0 : index
    %c0_65 = arith.constant 0 : index
    %54 = vector.load %arg2[%c8, %c0_64, %c0_65] : memref<16x128x128xbf16, #tpu.memory_space<vmem>>, vector<1x128x128xbf16>
    %55 = vector.shape_cast %54 : vector<1x128x128xbf16> to vector<128x128xbf16>
    %cst_66 = arith.constant dense<0.000000e+00> : vector<9x128xf32>
    %56 = tpu.matmul %53, %55, %cst_66 {dimension_numbers = #tpu.dot_dimension_numbers<[1], [0], [0], [1], [0, 0, 1, 1], [], []>} : vector<9x128xbf16>, vector<128x128xbf16>, vector<9x128xf32> -> vector<9x128xf32>
    %57 = arith.addf %51, %56 : vector<9x128xf32>
    %c0_67 = arith.constant 0 : index
    %c1_68 = arith.constant 1 : index
    %c6_69 = arith.constant 6 : index
    %c0_70 = arith.constant 0 : index
    %58 = vector.load %arg1[%c0_67, %c1_68, %c6_69, %c0_70] : memref<1x4x18x128xbf16, #tpu.memory_space<vmem>>, vector<1x1x9x128xbf16>
    %59 = vector.shape_cast %58 : vector<1x1x9x128xbf16> to vector<9x128xbf16>
    %c9 = arith.constant 9 : index
    %c0_71 = arith.constant 0 : index
    %c0_72 = arith.constant 0 : index
    %60 = vector.load %arg2[%c9, %c0_71, %c0_72] : memref<16x128x128xbf16, #tpu.memory_space<vmem>>, vector<1x128x128xbf16>
    %61 = vector.shape_cast %60 : vector<1x128x128xbf16> to vector<128x128xbf16>
    %cst_73 = arith.constant dense<0.000000e+00> : vector<9x128xf32>
    %62 = tpu.matmul %59, %61, %cst_73 {dimension_numbers = #tpu.dot_dimension_numbers<[1], [0], [0], [1], [0, 0, 1, 1], [], []>} : vector<9x128xbf16>, vector<128x128xbf16>, vector<9x128xf32> -> vector<9x128xf32>
    %63 = arith.addf %57, %62 : vector<9x128xf32>
    %c0_74 = arith.constant 0 : index
    %c2_75 = arith.constant 2 : index
    %c6_76 = arith.constant 6 : index
    %c0_77 = arith.constant 0 : index
    %64 = vector.load %arg1[%c0_74, %c2_75, %c6_76, %c0_77] : memref<1x4x18x128xbf16, #tpu.memory_space<vmem>>, vector<1x1x9x128xbf16>
    %65 = vector.shape_cast %64 : vector<1x1x9x128xbf16> to vector<9x128xbf16>
    %c10 = arith.constant 10 : index
    %c0_78 = arith.constant 0 : index
    %c0_79 = arith.constant 0 : index
    %66 = vector.load %arg2[%c10, %c0_78, %c0_79] : memref<16x128x128xbf16, #tpu.memory_space<vmem>>, vector<1x128x128xbf16>
    %67 = vector.shape_cast %66 : vector<1x128x128xbf16> to vector<128x128xbf16>
    %cst_80 = arith.constant dense<0.000000e+00> : vector<9x128xf32>
    %68 = tpu.matmul %65, %67, %cst_80 {dimension_numbers = #tpu.dot_dimension_numbers<[1], [0], [0], [1], [0, 0, 1, 1], [], []>} : vector<9x128xbf16>, vector<128x128xbf16>, vector<9x128xf32> -> vector<9x128xf32>
    %69 = arith.addf %63, %68 : vector<9x128xf32>
    %c0_81 = arith.constant 0 : index
    %c3_82 = arith.constant 3 : index
    %c6_83 = arith.constant 6 : index
    %c0_84 = arith.constant 0 : index
    %70 = vector.load %arg1[%c0_81, %c3_82, %c6_83, %c0_84] : memref<1x4x18x128xbf16, #tpu.memory_space<vmem>>, vector<1x1x9x128xbf16>
    %71 = vector.shape_cast %70 : vector<1x1x9x128xbf16> to vector<9x128xbf16>
    %c11 = arith.constant 11 : index
    %c0_85 = arith.constant 0 : index
    %c0_86 = arith.constant 0 : index
    %72 = vector.load %arg2[%c11, %c0_85, %c0_86] : memref<16x128x128xbf16, #tpu.memory_space<vmem>>, vector<1x128x128xbf16>
    %73 = vector.shape_cast %72 : vector<1x128x128xbf16> to vector<128x128xbf16>
    %cst_87 = arith.constant dense<0.000000e+00> : vector<9x128xf32>
    %74 = tpu.matmul %71, %73, %cst_87 {dimension_numbers = #tpu.dot_dimension_numbers<[1], [0], [0], [1], [0, 0, 1, 1], [], []>} : vector<9x128xbf16>, vector<128x128xbf16>, vector<9x128xf32> -> vector<9x128xf32>
    %75 = arith.addf %69, %74 : vector<9x128xf32>
    %c0_88 = arith.constant 0 : index
    %c0_89 = arith.constant 0 : index
    %c9_90 = arith.constant 9 : index
    %c0_91 = arith.constant 0 : index
    %76 = vector.load %arg1[%c0_88, %c0_89, %c9_90, %c0_91] : memref<1x4x18x128xbf16, #tpu.memory_space<vmem>>, vector<1x1x9x128xbf16>
    %77 = vector.shape_cast %76 : vector<1x1x9x128xbf16> to vector<9x128xbf16>
    %c12 = arith.constant 12 : index
    %c0_92 = arith.constant 0 : index
    %c0_93 = arith.constant 0 : index
    %78 = vector.load %arg2[%c12, %c0_92, %c0_93] : memref<16x128x128xbf16, #tpu.memory_space<vmem>>, vector<1x128x128xbf16>
    %79 = vector.shape_cast %78 : vector<1x128x128xbf16> to vector<128x128xbf16>
    %cst_94 = arith.constant dense<0.000000e+00> : vector<9x128xf32>
    %80 = tpu.matmul %77, %79, %cst_94 {dimension_numbers = #tpu.dot_dimension_numbers<[1], [0], [0], [1], [0, 0, 1, 1], [], []>} : vector<9x128xbf16>, vector<128x128xbf16>, vector<9x128xf32> -> vector<9x128xf32>
    %81 = arith.addf %75, %80 : vector<9x128xf32>
    %c0_95 = arith.constant 0 : index
    %c1_96 = arith.constant 1 : index
    %c9_97 = arith.constant 9 : index
    %c0_98 = arith.constant 0 : index
    %82 = vector.load %arg1[%c0_95, %c1_96, %c9_97, %c0_98] : memref<1x4x18x128xbf16, #tpu.memory_space<vmem>>, vector<1x1x9x128xbf16>
    %83 = vector.shape_cast %82 : vector<1x1x9x128xbf16> to vector<9x128xbf16>
    %c13 = arith.constant 13 : index
    %c0_99 = arith.constant 0 : index
    %c0_100 = arith.constant 0 : index
    %84 = vector.load %arg2[%c13, %c0_99, %c0_100] : memref<16x128x128xbf16, #tpu.memory_space<vmem>>, vector<1x128x128xbf16>
    %85 = vector.shape_cast %84 : vector<1x128x128xbf16> to vector<128x128xbf16>
    %cst_101 = arith.constant dense<0.000000e+00> : vector<9x128xf32>
    %86 = tpu.matmul %83, %85, %cst_101 {dimension_numbers = #tpu.dot_dimension_numbers<[1], [0], [0], [1], [0, 0, 1, 1], [], []>} : vector<9x128xbf16>, vector<128x128xbf16>, vector<9x128xf32> -> vector<9x128xf32>
    %87 = arith.addf %81, %86 : vector<9x128xf32>
    %c0_102 = arith.constant 0 : index
    %c2_103 = arith.constant 2 : index
    %c9_104 = arith.constant 9 : index
    %c0_105 = arith.constant 0 : index
    %88 = vector.load %arg1[%c0_102, %c2_103, %c9_104, %c0_105] : memref<1x4x18x128xbf16, #tpu.memory_space<vmem>>, vector<1x1x9x128xbf16>
    %89 = vector.shape_cast %88 : vector<1x1x9x128xbf16> to vector<9x128xbf16>
    %c14 = arith.constant 14 : index
    %c0_106 = arith.constant 0 : index
    %c0_107 = arith.constant 0 : index
    %90 = vector.load %arg2[%c14, %c0_106, %c0_107] : memref<16x128x128xbf16, #tpu.memory_space<vmem>>, vector<1x128x128xbf16>
    %91 = vector.shape_cast %90 : vector<1x128x128xbf16> to vector<128x128xbf16>
    %cst_108 = arith.constant dense<0.000000e+00> : vector<9x128xf32>
    %92 = tpu.matmul %89, %91, %cst_108 {dimension_numbers = #tpu.dot_dimension_numbers<[1], [0], [0], [1], [0, 0, 1, 1], [], []>} : vector<9x128xbf16>, vector<128x128xbf16>, vector<9x128xf32> -> vector<9x128xf32>
    %93 = arith.addf %87, %92 : vector<9x128xf32>
    %c0_109 = arith.constant 0 : index
    %c3_110 = arith.constant 3 : index
    %c9_111 = arith.constant 9 : index
    %c0_112 = arith.constant 0 : index
    %94 = vector.load %arg1[%c0_109, %c3_110, %c9_111, %c0_112] : memref<1x4x18x128xbf16, #tpu.memory_space<vmem>>, vector<1x1x9x128xbf16>
    %95 = vector.shape_cast %94 : vector<1x1x9x128xbf16> to vector<9x128xbf16>
    %c15 = arith.constant 15 : index
    %c0_113 = arith.constant 0 : index
    %c0_114 = arith.constant 0 : index
    %96 = vector.load %arg2[%c15, %c0_113, %c0_114] : memref<16x128x128xbf16, #tpu.memory_space<vmem>>, vector<1x128x128xbf16>
    %97 = vector.shape_cast %96 : vector<1x128x128xbf16> to vector<128x128xbf16>
    %cst_115 = arith.constant dense<0.000000e+00> : vector<9x128xf32>
    %98 = tpu.matmul %95, %97, %cst_115 {dimension_numbers = #tpu.dot_dimension_numbers<[1], [0], [0], [1], [0, 0, 1, 1], [], []>} : vector<9x128xbf16>, vector<128x128xbf16>, vector<9x128xf32> -> vector<9x128xf32>
    %99 = arith.addf %93, %98 : vector<9x128xf32>
    %100 = vector.broadcast %0 : vector<1x128xf32> to vector<9x128xf32>
    %101 = arith.addf %99, %100 : vector<9x128xf32>
    %cst_116 = arith.constant dense<0.000000e+00> : vector<128xf32>
    %102 = vector.multi_reduction <add>, %101, %cst_116 [0] : vector<9x128xf32> to vector<128xf32>
    %103 = vector.shape_cast %102 : vector<128xf32> to vector<1x128xf32>
    %104 = arith.addf %1, %103 : vector<1x128xf32>
    %105 = arith.mulf %101, %101 : vector<9x128xf32>
    %cst_117 = arith.constant dense<0.000000e+00> : vector<128xf32>
    %106 = vector.multi_reduction <add>, %105, %cst_117 [0] : vector<9x128xf32> to vector<128xf32>
    %107 = vector.shape_cast %106 : vector<128xf32> to vector<1x128xf32>
    %108 = arith.addf %2, %107 : vector<1x128xf32>
    %109 = arith.truncf %101 : vector<9x128xf32> to vector<9x128xbf16>
    %c0_118 = arith.constant 0 : index
    %c0_119 = arith.constant 0 : index
    %c0_120 = arith.constant 0 : index
    %110 = vector.load %arg4[%c0_118, %c0_119, %c0_120] : memref<1x9x128xbf16, #tpu.memory_space<vmem>>, vector<1x9x128xbf16>
    %111 = vector.shape_cast %110 : vector<1x9x128xbf16> to vector<9x128xbf16>
    %112 = vector.shape_cast %109 : vector<9x128xbf16> to vector<1x9x128xbf16>
    tpu.vector_store %arg4[%c0_118, %c0_119, %c0_120], %112 {strides = array<i32>} : memref<1x9x128xbf16, #tpu.memory_space<vmem>>, vector<1x9x128xbf16>,
    %c0_121 = arith.constant 0 : index
    %c0_122 = arith.constant 0 : index
    %c0_123 = arith.constant 0 : index
    %113 = vector.load %arg5[%c0_121, %c0_122, %c0_123] : memref<1x2x128xf32, #tpu.memory_space<vmem>>, vector<1x1x128xf32>
    %114 = vector.shape_cast %113 : vector<1x1x128xf32> to vector<1x128xf32>
    %115 = vector.shape_cast %104 : vector<1x128xf32> to vector<1x1x128xf32>
    tpu.vector_store %arg5[%c0_121, %c0_122, %c0_123], %115 {strides = array<i32>} : memref<1x2x128xf32, #tpu.memory_space<vmem>>, vector<1x1x128xf32>,
    %c0_124 = arith.constant 0 : index
    %c1_125 = arith.constant 1 : index
    %c0_126 = arith.constant 0 : index
    %116 = vector.load %arg5[%c0_124, %c1_125, %c0_126] : memref<1x2x128xf32, #tpu.memory_space<vmem>>, vector<1x1x128xf32>
    %117 = vector.shape_cast %116 : vector<1x1x128xf32> to vector<1x128xf32>
    %118 = vector.shape_cast %108 : vector<1x128xf32> to vector<1x1x128xf32>
    tpu.vector_store %arg5[%c0_124, %c1_125, %c0_126], %118 {strides = array<i32>} : memref<1x2x128xf32, #tpu.memory_space<vmem>>, vector<1x1x128xf32>,
    return
  }
  func.func @transform_0(%arg0: i32) -> (i32, i32, i32, i32) {
    %c0_i32 = arith.constant 0 : i32
    %c0_i32_0 = arith.constant 0 : i32
    %c0_i32_1 = arith.constant 0 : i32
    %c0_i32_2 = arith.constant 0 : i32
    return %arg0, %c0_i32, %c0_i32_0, %c0_i32_1 : i32, i32, i32, i32
  }
  func.func @transform_1(%arg0: i32) -> (i32, i32, i32) {
    %c0_i32 = arith.constant 0 : i32
    %c0_i32_0 = arith.constant 0 : i32
    %c0_i32_1 = arith.constant 0 : i32
    %c0_i32_2 = arith.constant 0 : i32
    return %c0_i32, %c0_i32_0, %c0_i32_1 : i32, i32, i32
  }
  func.func @transform_2(%arg0: i32) -> (i32, i32) {
    %c0_i32 = arith.constant 0 : i32
    %c0_i32_0 = arith.constant 0 : i32
    %c0_i32_1 = arith.constant 0 : i32
    return %c0_i32, %c0_i32_0 : i32, i32
  }
  func.func @transform_3(%arg0: i32) -> (i32, i32, i32) {
    %c0_i32 = arith.constant 0 : i32
    %c0_i32_0 = arith.constant 0 : i32
    %c0_i32_1 = arith.constant 0 : i32
    return %arg0, %c0_i32, %c0_i32_0 : i32, i32, i32
  }
  func.func @transform_4(%arg0: i32) -> (i32, i32, i32) {
    %c0_i32 = arith.constant 0 : i32
    %c0_i32_0 = arith.constant 0 : i32
    %c0_i32_1 = arith.constant 0 : i32
    return %arg0, %c0_i32, %c0_i32_0 : i32, i32, i32
  }
}

module attributes {stable_mosaic.version = 11 : i64} {
  func.func @_conv_tap_kernel(%arg0: i32, %arg1: memref<1x4x10x128xbf16, #tpu.memory_space<vmem>>, %arg2: memref<16x128x128xbf16, #tpu.memory_space<vmem>>, %arg3: memref<1x128xf32, #tpu.memory_space<vmem>>, %arg4: memref<1x4x128xf32, #tpu.memory_space<vmem>>) attributes {dimension_semantics = [#tpu.dimension_semantics<parallel>], iteration_bounds = array<i64: 2>, scalar_prefetch = 0 : i64, scratch_operands = 0 : i64, tpu.core_type = #tpu.core_type<tc>, window_params = [{transform_indices = @transform_0, window_bounds = array<i64: 1, 4, 10, 128>}, {pipeline_mode = #tpu.pipeline_mode<synchronous>, transform_indices = @transform_1, window_bounds = array<i64: 16, 128, 128>}, {pipeline_mode = #tpu.pipeline_mode<synchronous>, transform_indices = @transform_2, window_bounds = array<i64: 1, 128>}, {transform_indices = @transform_3, window_bounds = array<i64: 1, 4, 128>}]} {
    %c0 = arith.constant 0 : index
    %c0_0 = arith.constant 0 : index
    %0 = vector.load %arg3[%c0, %c0_0] : memref<1x128xf32, #tpu.memory_space<vmem>>, vector<1x128xf32>
    %cst = arith.constant 0.000000e+00 : f32
    %1 = vector.broadcast %cst : f32 to vector<4x128xf32>
    %c0_1 = arith.constant 0 : index
    %c0_2 = arith.constant 0 : index
    %c0_3 = arith.constant 0 : index
    %c0_4 = arith.constant 0 : index
    %2 = vector.load %arg1[%c0_1, %c0_2, %c0_3, %c0_4] : memref<1x4x10x128xbf16, #tpu.memory_space<vmem>>, vector<1x1x4x128xbf16>
    %3 = vector.shape_cast %2 : vector<1x1x4x128xbf16> to vector<4x128xbf16>
    %c0_5 = arith.constant 0 : index
    %c0_6 = arith.constant 0 : index
    %c0_7 = arith.constant 0 : index
    %4 = vector.load %arg2[%c0_5, %c0_6, %c0_7] : memref<16x128x128xbf16, #tpu.memory_space<vmem>>, vector<1x128x128xbf16>
    %5 = vector.shape_cast %4 : vector<1x128x128xbf16> to vector<128x128xbf16>
    %cst_8 = arith.constant dense<0.000000e+00> : vector<4x128xf32>
    %6 = tpu.matmul %3, %5, %cst_8 {dimension_numbers = #tpu.dot_dimension_numbers<[1], [0], [0], [1], [0, 0, 1, 1], [], []>} : vector<4x128xbf16>, vector<128x128xbf16>, vector<4x128xf32> -> vector<4x128xf32>
    %7 = arith.addf %1, %6 : vector<4x128xf32>
    %c0_9 = arith.constant 0 : index
    %c1 = arith.constant 1 : index
    %c0_10 = arith.constant 0 : index
    %c0_11 = arith.constant 0 : index
    %8 = vector.load %arg1[%c0_9, %c1, %c0_10, %c0_11] : memref<1x4x10x128xbf16, #tpu.memory_space<vmem>>, vector<1x1x4x128xbf16>
    %9 = vector.shape_cast %8 : vector<1x1x4x128xbf16> to vector<4x128xbf16>
    %c1_12 = arith.constant 1 : index
    %c0_13 = arith.constant 0 : index
    %c0_14 = arith.constant 0 : index
    %10 = vector.load %arg2[%c1_12, %c0_13, %c0_14] : memref<16x128x128xbf16, #tpu.memory_space<vmem>>, vector<1x128x128xbf16>
    %11 = vector.shape_cast %10 : vector<1x128x128xbf16> to vector<128x128xbf16>
    %cst_15 = arith.constant dense<0.000000e+00> : vector<4x128xf32>
    %12 = tpu.matmul %9, %11, %cst_15 {dimension_numbers = #tpu.dot_dimension_numbers<[1], [0], [0], [1], [0, 0, 1, 1], [], []>} : vector<4x128xbf16>, vector<128x128xbf16>, vector<4x128xf32> -> vector<4x128xf32>
    %13 = arith.addf %7, %12 : vector<4x128xf32>
    %c0_16 = arith.constant 0 : index
    %c2 = arith.constant 2 : index
    %c0_17 = arith.constant 0 : index
    %c0_18 = arith.constant 0 : index
    %14 = vector.load %arg1[%c0_16, %c2, %c0_17, %c0_18] : memref<1x4x10x128xbf16, #tpu.memory_space<vmem>>, vector<1x1x4x128xbf16>
    %15 = vector.shape_cast %14 : vector<1x1x4x128xbf16> to vector<4x128xbf16>
    %c2_19 = arith.constant 2 : index
    %c0_20 = arith.constant 0 : index
    %c0_21 = arith.constant 0 : index
    %16 = vector.load %arg2[%c2_19, %c0_20, %c0_21] : memref<16x128x128xbf16, #tpu.memory_space<vmem>>, vector<1x128x128xbf16>
    %17 = vector.shape_cast %16 : vector<1x128x128xbf16> to vector<128x128xbf16>
    %cst_22 = arith.constant dense<0.000000e+00> : vector<4x128xf32>
    %18 = tpu.matmul %15, %17, %cst_22 {dimension_numbers = #tpu.dot_dimension_numbers<[1], [0], [0], [1], [0, 0, 1, 1], [], []>} : vector<4x128xbf16>, vector<128x128xbf16>, vector<4x128xf32> -> vector<4x128xf32>
    %19 = arith.addf %13, %18 : vector<4x128xf32>
    %c0_23 = arith.constant 0 : index
    %c3 = arith.constant 3 : index
    %c0_24 = arith.constant 0 : index
    %c0_25 = arith.constant 0 : index
    %20 = vector.load %arg1[%c0_23, %c3, %c0_24, %c0_25] : memref<1x4x10x128xbf16, #tpu.memory_space<vmem>>, vector<1x1x4x128xbf16>
    %21 = vector.shape_cast %20 : vector<1x1x4x128xbf16> to vector<4x128xbf16>
    %c3_26 = arith.constant 3 : index
    %c0_27 = arith.constant 0 : index
    %c0_28 = arith.constant 0 : index
    %22 = vector.load %arg2[%c3_26, %c0_27, %c0_28] : memref<16x128x128xbf16, #tpu.memory_space<vmem>>, vector<1x128x128xbf16>
    %23 = vector.shape_cast %22 : vector<1x128x128xbf16> to vector<128x128xbf16>
    %cst_29 = arith.constant dense<0.000000e+00> : vector<4x128xf32>
    %24 = tpu.matmul %21, %23, %cst_29 {dimension_numbers = #tpu.dot_dimension_numbers<[1], [0], [0], [1], [0, 0, 1, 1], [], []>} : vector<4x128xbf16>, vector<128x128xbf16>, vector<4x128xf32> -> vector<4x128xf32>
    %25 = arith.addf %19, %24 : vector<4x128xf32>
    %c0_30 = arith.constant 0 : index
    %c0_31 = arith.constant 0 : index
    %c2_32 = arith.constant 2 : index
    %c0_33 = arith.constant 0 : index
    %26 = vector.load %arg1[%c0_30, %c0_31, %c2_32, %c0_33] : memref<1x4x10x128xbf16, #tpu.memory_space<vmem>>, vector<1x1x4x128xbf16>
    %27 = vector.shape_cast %26 : vector<1x1x4x128xbf16> to vector<4x128xbf16>
    %c4 = arith.constant 4 : index
    %c0_34 = arith.constant 0 : index
    %c0_35 = arith.constant 0 : index
    %28 = vector.load %arg2[%c4, %c0_34, %c0_35] : memref<16x128x128xbf16, #tpu.memory_space<vmem>>, vector<1x128x128xbf16>
    %29 = vector.shape_cast %28 : vector<1x128x128xbf16> to vector<128x128xbf16>
    %cst_36 = arith.constant dense<0.000000e+00> : vector<4x128xf32>
    %30 = tpu.matmul %27, %29, %cst_36 {dimension_numbers = #tpu.dot_dimension_numbers<[1], [0], [0], [1], [0, 0, 1, 1], [], []>} : vector<4x128xbf16>, vector<128x128xbf16>, vector<4x128xf32> -> vector<4x128xf32>
    %31 = arith.addf %25, %30 : vector<4x128xf32>
    %c0_37 = arith.constant 0 : index
    %c1_38 = arith.constant 1 : index
    %c2_39 = arith.constant 2 : index
    %c0_40 = arith.constant 0 : index
    %32 = vector.load %arg1[%c0_37, %c1_38, %c2_39, %c0_40] : memref<1x4x10x128xbf16, #tpu.memory_space<vmem>>, vector<1x1x4x128xbf16>
    %33 = vector.shape_cast %32 : vector<1x1x4x128xbf16> to vector<4x128xbf16>
    %c5 = arith.constant 5 : index
    %c0_41 = arith.constant 0 : index
    %c0_42 = arith.constant 0 : index
    %34 = vector.load %arg2[%c5, %c0_41, %c0_42] : memref<16x128x128xbf16, #tpu.memory_space<vmem>>, vector<1x128x128xbf16>
    %35 = vector.shape_cast %34 : vector<1x128x128xbf16> to vector<128x128xbf16>
    %cst_43 = arith.constant dense<0.000000e+00> : vector<4x128xf32>
    %36 = tpu.matmul %33, %35, %cst_43 {dimension_numbers = #tpu.dot_dimension_numbers<[1], [0], [0], [1], [0, 0, 1, 1], [], []>} : vector<4x128xbf16>, vector<128x128xbf16>, vector<4x128xf32> -> vector<4x128xf32>
    %37 = arith.addf %31, %36 : vector<4x128xf32>
    %c0_44 = arith.constant 0 : index
    %c2_45 = arith.constant 2 : index
    %c2_46 = arith.constant 2 : index
    %c0_47 = arith.constant 0 : index
    %38 = vector.load %arg1[%c0_44, %c2_45, %c2_46, %c0_47] : memref<1x4x10x128xbf16, #tpu.memory_space<vmem>>, vector<1x1x4x128xbf16>
    %39 = vector.shape_cast %38 : vector<1x1x4x128xbf16> to vector<4x128xbf16>
    %c6 = arith.constant 6 : index
    %c0_48 = arith.constant 0 : index
    %c0_49 = arith.constant 0 : index
    %40 = vector.load %arg2[%c6, %c0_48, %c0_49] : memref<16x128x128xbf16, #tpu.memory_space<vmem>>, vector<1x128x128xbf16>
    %41 = vector.shape_cast %40 : vector<1x128x128xbf16> to vector<128x128xbf16>
    %cst_50 = arith.constant dense<0.000000e+00> : vector<4x128xf32>
    %42 = tpu.matmul %39, %41, %cst_50 {dimension_numbers = #tpu.dot_dimension_numbers<[1], [0], [0], [1], [0, 0, 1, 1], [], []>} : vector<4x128xbf16>, vector<128x128xbf16>, vector<4x128xf32> -> vector<4x128xf32>
    %43 = arith.addf %37, %42 : vector<4x128xf32>
    %c0_51 = arith.constant 0 : index
    %c3_52 = arith.constant 3 : index
    %c2_53 = arith.constant 2 : index
    %c0_54 = arith.constant 0 : index
    %44 = vector.load %arg1[%c0_51, %c3_52, %c2_53, %c0_54] : memref<1x4x10x128xbf16, #tpu.memory_space<vmem>>, vector<1x1x4x128xbf16>
    %45 = vector.shape_cast %44 : vector<1x1x4x128xbf16> to vector<4x128xbf16>
    %c7 = arith.constant 7 : index
    %c0_55 = arith.constant 0 : index
    %c0_56 = arith.constant 0 : index
    %46 = vector.load %arg2[%c7, %c0_55, %c0_56] : memref<16x128x128xbf16, #tpu.memory_space<vmem>>, vector<1x128x128xbf16>
    %47 = vector.shape_cast %46 : vector<1x128x128xbf16> to vector<128x128xbf16>
    %cst_57 = arith.constant dense<0.000000e+00> : vector<4x128xf32>
    %48 = tpu.matmul %45, %47, %cst_57 {dimension_numbers = #tpu.dot_dimension_numbers<[1], [0], [0], [1], [0, 0, 1, 1], [], []>} : vector<4x128xbf16>, vector<128x128xbf16>, vector<4x128xf32> -> vector<4x128xf32>
    %49 = arith.addf %43, %48 : vector<4x128xf32>
    %c0_58 = arith.constant 0 : index
    %c0_59 = arith.constant 0 : index
    %c4_60 = arith.constant 4 : index
    %c0_61 = arith.constant 0 : index
    %50 = vector.load %arg1[%c0_58, %c0_59, %c4_60, %c0_61] : memref<1x4x10x128xbf16, #tpu.memory_space<vmem>>, vector<1x1x4x128xbf16>
    %51 = vector.shape_cast %50 : vector<1x1x4x128xbf16> to vector<4x128xbf16>
    %c8 = arith.constant 8 : index
    %c0_62 = arith.constant 0 : index
    %c0_63 = arith.constant 0 : index
    %52 = vector.load %arg2[%c8, %c0_62, %c0_63] : memref<16x128x128xbf16, #tpu.memory_space<vmem>>, vector<1x128x128xbf16>
    %53 = vector.shape_cast %52 : vector<1x128x128xbf16> to vector<128x128xbf16>
    %cst_64 = arith.constant dense<0.000000e+00> : vector<4x128xf32>
    %54 = tpu.matmul %51, %53, %cst_64 {dimension_numbers = #tpu.dot_dimension_numbers<[1], [0], [0], [1], [0, 0, 1, 1], [], []>} : vector<4x128xbf16>, vector<128x128xbf16>, vector<4x128xf32> -> vector<4x128xf32>
    %55 = arith.addf %49, %54 : vector<4x128xf32>
    %c0_65 = arith.constant 0 : index
    %c1_66 = arith.constant 1 : index
    %c4_67 = arith.constant 4 : index
    %c0_68 = arith.constant 0 : index
    %56 = vector.load %arg1[%c0_65, %c1_66, %c4_67, %c0_68] : memref<1x4x10x128xbf16, #tpu.memory_space<vmem>>, vector<1x1x4x128xbf16>
    %57 = vector.shape_cast %56 : vector<1x1x4x128xbf16> to vector<4x128xbf16>
    %c9 = arith.constant 9 : index
    %c0_69 = arith.constant 0 : index
    %c0_70 = arith.constant 0 : index
    %58 = vector.load %arg2[%c9, %c0_69, %c0_70] : memref<16x128x128xbf16, #tpu.memory_space<vmem>>, vector<1x128x128xbf16>
    %59 = vector.shape_cast %58 : vector<1x128x128xbf16> to vector<128x128xbf16>
    %cst_71 = arith.constant dense<0.000000e+00> : vector<4x128xf32>
    %60 = tpu.matmul %57, %59, %cst_71 {dimension_numbers = #tpu.dot_dimension_numbers<[1], [0], [0], [1], [0, 0, 1, 1], [], []>} : vector<4x128xbf16>, vector<128x128xbf16>, vector<4x128xf32> -> vector<4x128xf32>
    %61 = arith.addf %55, %60 : vector<4x128xf32>
    %c0_72 = arith.constant 0 : index
    %c2_73 = arith.constant 2 : index
    %c4_74 = arith.constant 4 : index
    %c0_75 = arith.constant 0 : index
    %62 = vector.load %arg1[%c0_72, %c2_73, %c4_74, %c0_75] : memref<1x4x10x128xbf16, #tpu.memory_space<vmem>>, vector<1x1x4x128xbf16>
    %63 = vector.shape_cast %62 : vector<1x1x4x128xbf16> to vector<4x128xbf16>
    %c10 = arith.constant 10 : index
    %c0_76 = arith.constant 0 : index
    %c0_77 = arith.constant 0 : index
    %64 = vector.load %arg2[%c10, %c0_76, %c0_77] : memref<16x128x128xbf16, #tpu.memory_space<vmem>>, vector<1x128x128xbf16>
    %65 = vector.shape_cast %64 : vector<1x128x128xbf16> to vector<128x128xbf16>
    %cst_78 = arith.constant dense<0.000000e+00> : vector<4x128xf32>
    %66 = tpu.matmul %63, %65, %cst_78 {dimension_numbers = #tpu.dot_dimension_numbers<[1], [0], [0], [1], [0, 0, 1, 1], [], []>} : vector<4x128xbf16>, vector<128x128xbf16>, vector<4x128xf32> -> vector<4x128xf32>
    %67 = arith.addf %61, %66 : vector<4x128xf32>
    %c0_79 = arith.constant 0 : index
    %c3_80 = arith.constant 3 : index
    %c4_81 = arith.constant 4 : index
    %c0_82 = arith.constant 0 : index
    %68 = vector.load %arg1[%c0_79, %c3_80, %c4_81, %c0_82] : memref<1x4x10x128xbf16, #tpu.memory_space<vmem>>, vector<1x1x4x128xbf16>
    %69 = vector.shape_cast %68 : vector<1x1x4x128xbf16> to vector<4x128xbf16>
    %c11 = arith.constant 11 : index
    %c0_83 = arith.constant 0 : index
    %c0_84 = arith.constant 0 : index
    %70 = vector.load %arg2[%c11, %c0_83, %c0_84] : memref<16x128x128xbf16, #tpu.memory_space<vmem>>, vector<1x128x128xbf16>
    %71 = vector.shape_cast %70 : vector<1x128x128xbf16> to vector<128x128xbf16>
    %cst_85 = arith.constant dense<0.000000e+00> : vector<4x128xf32>
    %72 = tpu.matmul %69, %71, %cst_85 {dimension_numbers = #tpu.dot_dimension_numbers<[1], [0], [0], [1], [0, 0, 1, 1], [], []>} : vector<4x128xbf16>, vector<128x128xbf16>, vector<4x128xf32> -> vector<4x128xf32>
    %73 = arith.addf %67, %72 : vector<4x128xf32>
    %c0_86 = arith.constant 0 : index
    %c0_87 = arith.constant 0 : index
    %c6_88 = arith.constant 6 : index
    %c0_89 = arith.constant 0 : index
    %74 = vector.load %arg1[%c0_86, %c0_87, %c6_88, %c0_89] : memref<1x4x10x128xbf16, #tpu.memory_space<vmem>>, vector<1x1x4x128xbf16>
    %75 = vector.shape_cast %74 : vector<1x1x4x128xbf16> to vector<4x128xbf16>
    %c12 = arith.constant 12 : index
    %c0_90 = arith.constant 0 : index
    %c0_91 = arith.constant 0 : index
    %76 = vector.load %arg2[%c12, %c0_90, %c0_91] : memref<16x128x128xbf16, #tpu.memory_space<vmem>>, vector<1x128x128xbf16>
    %77 = vector.shape_cast %76 : vector<1x128x128xbf16> to vector<128x128xbf16>
    %cst_92 = arith.constant dense<0.000000e+00> : vector<4x128xf32>
    %78 = tpu.matmul %75, %77, %cst_92 {dimension_numbers = #tpu.dot_dimension_numbers<[1], [0], [0], [1], [0, 0, 1, 1], [], []>} : vector<4x128xbf16>, vector<128x128xbf16>, vector<4x128xf32> -> vector<4x128xf32>
    %79 = arith.addf %73, %78 : vector<4x128xf32>
    %c0_93 = arith.constant 0 : index
    %c1_94 = arith.constant 1 : index
    %c6_95 = arith.constant 6 : index
    %c0_96 = arith.constant 0 : index
    %80 = vector.load %arg1[%c0_93, %c1_94, %c6_95, %c0_96] : memref<1x4x10x128xbf16, #tpu.memory_space<vmem>>, vector<1x1x4x128xbf16>
    %81 = vector.shape_cast %80 : vector<1x1x4x128xbf16> to vector<4x128xbf16>
    %c13 = arith.constant 13 : index
    %c0_97 = arith.constant 0 : index
    %c0_98 = arith.constant 0 : index
    %82 = vector.load %arg2[%c13, %c0_97, %c0_98] : memref<16x128x128xbf16, #tpu.memory_space<vmem>>, vector<1x128x128xbf16>
    %83 = vector.shape_cast %82 : vector<1x128x128xbf16> to vector<128x128xbf16>
    %cst_99 = arith.constant dense<0.000000e+00> : vector<4x128xf32>
    %84 = tpu.matmul %81, %83, %cst_99 {dimension_numbers = #tpu.dot_dimension_numbers<[1], [0], [0], [1], [0, 0, 1, 1], [], []>} : vector<4x128xbf16>, vector<128x128xbf16>, vector<4x128xf32> -> vector<4x128xf32>
    %85 = arith.addf %79, %84 : vector<4x128xf32>
    %c0_100 = arith.constant 0 : index
    %c2_101 = arith.constant 2 : index
    %c6_102 = arith.constant 6 : index
    %c0_103 = arith.constant 0 : index
    %86 = vector.load %arg1[%c0_100, %c2_101, %c6_102, %c0_103] : memref<1x4x10x128xbf16, #tpu.memory_space<vmem>>, vector<1x1x4x128xbf16>
    %87 = vector.shape_cast %86 : vector<1x1x4x128xbf16> to vector<4x128xbf16>
    %c14 = arith.constant 14 : index
    %c0_104 = arith.constant 0 : index
    %c0_105 = arith.constant 0 : index
    %88 = vector.load %arg2[%c14, %c0_104, %c0_105] : memref<16x128x128xbf16, #tpu.memory_space<vmem>>, vector<1x128x128xbf16>
    %89 = vector.shape_cast %88 : vector<1x128x128xbf16> to vector<128x128xbf16>
    %cst_106 = arith.constant dense<0.000000e+00> : vector<4x128xf32>
    %90 = tpu.matmul %87, %89, %cst_106 {dimension_numbers = #tpu.dot_dimension_numbers<[1], [0], [0], [1], [0, 0, 1, 1], [], []>} : vector<4x128xbf16>, vector<128x128xbf16>, vector<4x128xf32> -> vector<4x128xf32>
    %91 = arith.addf %85, %90 : vector<4x128xf32>
    %c0_107 = arith.constant 0 : index
    %c3_108 = arith.constant 3 : index
    %c6_109 = arith.constant 6 : index
    %c0_110 = arith.constant 0 : index
    %92 = vector.load %arg1[%c0_107, %c3_108, %c6_109, %c0_110] : memref<1x4x10x128xbf16, #tpu.memory_space<vmem>>, vector<1x1x4x128xbf16>
    %93 = vector.shape_cast %92 : vector<1x1x4x128xbf16> to vector<4x128xbf16>
    %c15 = arith.constant 15 : index
    %c0_111 = arith.constant 0 : index
    %c0_112 = arith.constant 0 : index
    %94 = vector.load %arg2[%c15, %c0_111, %c0_112] : memref<16x128x128xbf16, #tpu.memory_space<vmem>>, vector<1x128x128xbf16>
    %95 = vector.shape_cast %94 : vector<1x128x128xbf16> to vector<128x128xbf16>
    %cst_113 = arith.constant dense<0.000000e+00> : vector<4x128xf32>
    %96 = tpu.matmul %93, %95, %cst_113 {dimension_numbers = #tpu.dot_dimension_numbers<[1], [0], [0], [1], [0, 0, 1, 1], [], []>} : vector<4x128xbf16>, vector<128x128xbf16>, vector<4x128xf32> -> vector<4x128xf32>
    %97 = arith.addf %91, %96 : vector<4x128xf32>
    %98 = vector.broadcast %0 : vector<1x128xf32> to vector<4x128xf32>
    %99 = arith.addf %97, %98 : vector<4x128xf32>
    %c0_114 = arith.constant 0 : index
    %c0_115 = arith.constant 0 : index
    %c0_116 = arith.constant 0 : index
    %100 = vector.load %arg4[%c0_114, %c0_115, %c0_116] : memref<1x4x128xf32, #tpu.memory_space<vmem>>, vector<1x4x128xf32>
    %101 = vector.shape_cast %100 : vector<1x4x128xf32> to vector<4x128xf32>
    %102 = vector.shape_cast %99 : vector<4x128xf32> to vector<1x4x128xf32>
    tpu.vector_store %arg4[%c0_114, %c0_115, %c0_116], %102 {strides = array<i32>} : memref<1x4x128xf32, #tpu.memory_space<vmem>>, vector<1x4x128xf32>,
    return
  }
  func.func @transform_0(%arg0: i32) -> (i32, i32, i32, i32) {
    %c0_i32 = arith.constant 0 : i32
    %c0_i32_0 = arith.constant 0 : i32
    %c0_i32_1 = arith.constant 0 : i32
    %c0_i32_2 = arith.constant 0 : i32
    return %arg0, %c0_i32, %c0_i32_0, %c0_i32_1 : i32, i32, i32, i32
  }
  func.func @transform_1(%arg0: i32) -> (i32, i32, i32) {
    %c0_i32 = arith.constant 0 : i32
    %c0_i32_0 = arith.constant 0 : i32
    %c0_i32_1 = arith.constant 0 : i32
    %c0_i32_2 = arith.constant 0 : i32
    return %c0_i32, %c0_i32_0, %c0_i32_1 : i32, i32, i32
  }
  func.func @transform_2(%arg0: i32) -> (i32, i32) {
    %c0_i32 = arith.constant 0 : i32
    %c0_i32_0 = arith.constant 0 : i32
    %c0_i32_1 = arith.constant 0 : i32
    return %c0_i32, %c0_i32_0 : i32, i32
  }
  func.func @transform_3(%arg0: i32) -> (i32, i32, i32) {
    %c0_i32 = arith.constant 0 : i32
    %c0_i32_0 = arith.constant 0 : i32
    %c0_i32_1 = arith.constant 0 : i32
    return %arg0, %c0_i32, %c0_i32_0 : i32, i32, i32
  }
}

</mosaic_0001>

<bundles_post_ra>
// kernel: discriminator_forward.8
= control target key start
LH: loop header
LB: loop body
LE: loop exit
PB: predicated region body
PF: predicated region fallthrough
CT: control target
= control target key end

     0   :  { %s946_s12 = smov 0   ;;  %s1071_s0 = inlined_call_operand.vmem [shape: bf16[2,1,256,64], index: 0, kind: input, shape index: {}]   ;;  %s1072_s1 = inlined_call_operand.vmem [shape: bf16[1,64,128], index: 1, kind: input, shape index: {}]   ;;  %s1073_s2 = inlined_call_operand.vmem [shape: f32[1,128], index: 2, kind: input, shape index: {}]   ;;  %s1074_s3 = inlined_call_operand.vmem [shape: bf16[2,256,128], index: 3, kind: output, shape index: {}]  }
   0x1 LB: > { %s673_s13 = sadd.s32 4294967295, %s924_s12   ;;  %p677_p0 = scmp.ge.s32.totalorder %s924_s12, 1  ;;  %s924_s12 = sphi %s946_s12, %s13_s12  }
   0x2   : > { %p137_p1 = scmp.lt.s32.totalorder %s924_s12, 3 }
   0x4   : > { %p138_p2 = pnand %p677_p0, %p137_p1 }
   0x5   : > { %p161_p3 = scmp.lt.s32.totalorder (!%p138_p2), %s673_s13, 1 }
   0x6   : > { %141 = sbr.rel (%p138_p2) target bundleno = 225 (0xe1), region = 32 }
   0xb   : > { %v801_v0 = vld [vmem:[%s1072_s1 + $0x18] sm:$0xff]  ;;  %v800_v1 = vld [vmem:[%s1072_s1 + $0x10] sm:$0xff]  ;;  %s1076_s13 = smov (!%p161_p3, %s673_s13), 1  ;;  %v799_v2 = vld [vmem:[%s1072_s1 + $0x8] sm:$0xff]  ;;  %vm320_vm0 = vcmask 523264  }
   0xc   : > { %373 = vmatpush.bf16.msra.mxu0 %v801_v0  ;;  %897 = vmatpush.bf16.msra.mxu1 %v801_v0  ;;  %s780_s20 = sshll.u32 %s1076_s13, 7  ;;  %v798_v3 = vld [vmem:[%s1072_s1] sm:$0xff] }
   0xd   : > { %898 = vmatpush.bf16.msra.mxu2 %v801_v0  ;;  %899 = vmatpush.bf16.msra.mxu3 %v801_v0  ;;  %s974_s25 = scalar_lea.vmem %s1071_s0, %s780_s20  ;;  %v1011_v22 = vld [vmem:[%s1073_s2] ss:$0 sm:$0xff]  ;;  %s1024_s30 = scalar_lea.vmem %s1074_s3, %s780_s20 }
   0xe   : > { %v782_v4 = vld [vmem:[%s974_s25] sm:$0xff]  ;;  %v783_v8 = vld [vmem:[%s974_s25 + $0x8] sm:$0xff]  ;;  %v784_v12 = vld [vmem:[%s974_s25 + $0x10] sm:$0xff] }
   0xf   : > { %v786_v5 = vld [vmem:[%s974_s25 + $0x20] sm:$0xff]  ;;  %v787_v9 = vld [vmem:[%s974_s25 + $0x28] sm:$0xff]  ;;  %v788_v13 = vld [vmem:[%s974_s25 + $0x30] sm:$0xff] }
  0x10   : > { %374 = vmatpush.bf16.msra.mxu0 %v800_v1  ;;  %900 = vmatpush.bf16.msra.mxu1 %v800_v1  ;;  %v790_v6 = vld [vmem:[%s974_s25 + $0x40] sm:$0xff]  ;;  %v791_v10 = vld [vmem:[%s974_s25 + $0x48] sm:$0xff]  ;;  %v792_v14 = vld [vmem:[%s974_s25 + $0x50] sm:$0xff] }
  0x11   : > { %901 = vmatpush.bf16.msra.mxu2 %v800_v1  ;;  %902 = vmatpush.bf16.msra.mxu3 %v800_v1  ;;  %v794_v7 = vld [vmem:[%s974_s25 + $0x60] sm:$0xff]  ;;  %v795_v11 = vld [vmem:[%s974_s25 + $0x68] sm:$0xff]  ;;  %v796_v15 = vld [vmem:[%s974_s25 + $0x70] sm:$0xff] }
  0x12   : > { %v785_v16 = vld [vmem:[%s974_s25 + $0x18] sm:$0xff] }
  0x13   : > { %v789_v17 = vld [vmem:[%s974_s25 + $0x38] sm:$0xff] }
  0x14   : > { %375 = vmatpush.bf16.msra.mxu0 %v799_v2  ;;  %903 = vmatpush.bf16.msra.mxu1 %v799_v2  ;;  %v793_v18 = vld [vmem:[%s974_s25 + $0x58] sm:$0xff] }
  0x15   : > { %904 = vmatpush.bf16.msra.mxu2 %v799_v2  ;;  %905 = vmatpush.bf16.msra.mxu3 %v799_v2  ;;  %v797_v19 = vld [vmem:[%s974_s25 + $0x78] sm:$0xff] }
  0x18   : > { %376 = vmatpush.bf16.msra.mxu0 %v798_v3  ;;  %906 = vmatpush.bf16.msra.mxu1 %v798_v3 }
  0x19   : > { %907 = vmatpush.bf16.msra.mxu2 %v798_v3  ;;  %908 = vmatpush.bf16.msra.mxu3 %v798_v3 }
  0x1b   : > { %762 = vmatmul.msk.bf16.vlgmr.msra.gmra.mxu0 %vm320_vm0, %v782_v4  ;;  %766 = vmatmul.msk.bf16.vlgmr.msra.gmra.mxu1 %vm320_vm0, %v786_v5 }
  0x1c   : > { %770 = vmatmul.msk.bf16.vlgmr.msra.gmra.mxu2 %vm320_vm0, %v790_v6  ;;  %774 = vmatmul.msk.bf16.vlgmr.msra.gmra.mxu3 %vm320_vm0, %v794_v7 }
  0x2b   : > { %763 = vmatmul.msk.bf16.gmra.mxu0 %vm320_vm0, %v783_v8  ;;  %767 = vmatmul.msk.bf16.gmra.mxu1 %vm320_vm0, %v787_v9 }
  0x2c   : > { %771 = vmatmul.msk.bf16.gmra.mxu2 %vm320_vm0, %v791_v10  ;;  %775 = vmatmul.msk.bf16.gmra.mxu3 %vm320_vm0, %v795_v11 }
  0x3b   : > { %764 = vmatmul.msk.bf16.gmra.mxu0 %vm320_vm0, %v784_v12  ;;  %768 = vmatmul.msk.bf16.gmra.mxu1 %vm320_vm0, %v788_v13 }
  0x3c   : > { %772 = vmatmul.msk.bf16.gmra.mxu2 %vm320_vm0, %v792_v14  ;;  %776 = vmatmul.msk.bf16.gmra.mxu3 %vm320_vm0, %v796_v15 }
  0x4b   : > { %765 = vmatmul.msk.bf16.gmra.mxu0 %vm320_vm0, %v785_v16  ;;  %769 = vmatmul.msk.bf16.gmra.mxu1 %vm320_vm0, %v789_v17 }
  0x4c   : > { %773 = vmatmul.msk.bf16.gmra.mxu2 %vm320_vm0, %v793_v18  ;;  %777 = vmatmul.msk.bf16.gmra.mxu3 %vm320_vm0, %v797_v19 }
  0x98   : > { %v378_v20 = vpop.f32.mrf.mxu0  ;;  %v398_v21 = vpop.f32.mrf.mxu1 }
  0x99   : > { %v379_v23 = vadd.f32 %v1011_v22, %v378_v20  ;;  %v399_v24 = vadd.f32 %v1011_v22, %v398_v21 }
  0x9b   : > { %v490_v29 = vmul.f32 0.2, %v379_v23  ;;  %v498_v30 = vmul.f32 0.2, %v399_v24  ;;  %vm458_vm1 = vcmp.ge.f32.partialorder %v379_v23, 0.0  ;;  %vm466_vm2 = vcmp.ge.f32.partialorder %v399_v24, 0.0 }
  0x9d   : > { %v522_v37 = vsel %vm458_vm1, %v379_v23, %v490_v29  ;;  %v530_v38 = vsel %vm466_vm2, %v399_v24, %v498_v30 }
  0x9f   : > { %v418_v25 = vpop.f32.mrf.mxu2  ;;  %v438_v26 = vpop.f32.mrf.mxu3 }
  0xa0   : > { %v380_v27 = vpop.f32.mrf.mxu0  ;;  %v400_v28 = vpop.f32.mrf.mxu1  ;;  %v419_v35 = vadd.f32 %v1011_v22, %v418_v25  ;;  %v439_v36 = vadd.f32 %v1011_v22, %v438_v26 }
  0xa1   : > { %v381_v31 = vadd.f32 %v1011_v22, %v380_v27  ;;  %v401_v32 = vadd.f32 %v1011_v22, %v400_v28 }
  0xa2   : > { %v506_v45 = vmul.f32 0.2, %v419_v35  ;;  %v514_v46 = vmul.f32 0.2, %v439_v36  ;;  %vm474_vm5 = vcmp.ge.f32.partialorder %v419_v35, 0.0  ;;  %vm482_vm6 = vcmp.ge.f32.partialorder %v439_v36, 0.0 }
  0xa3   : > { %vm459_vm3 = vcmp.ge.f32.partialorder %v381_v31, 0.0  ;;  %v491_v33 = vmul.f32 0.2, %v381_v31  ;;  %vm467_vm4 = vcmp.ge.f32.partialorder %v401_v32, 0.0  ;;  %v499_v34 = vmul.f32 0.2, %v401_v32 }
  0xa4   : > { %v538_v53 = vsel %vm474_vm5, %v419_v35, %v506_v45  ;;  %v546_v54 = vsel %vm482_vm6, %v439_v36, %v514_v46 }
  0xa5   : > { %v523_v39 = vsel %vm459_vm3, %v381_v31, %v491_v33  ;;  %v531_v40 = vsel %vm467_vm4, %v401_v32, %v499_v34 }
  0xa6   : > { %v805_v41 = vpack.c.bf16 %v523_v39, %v522_v37  ;;  %v825_v42 = vpack.c.bf16 %v531_v40, %v530_v38 }
  0xa7   : > { %v420_v43 = vpop.f32.mrf.mxu2  ;;  %v440_v44 = vpop.f32.mrf.mxu3 }
  0xa8   : > { %806 = vst [vmem:[%s1024_s30] sm:$0xff] %v805_v41   ;;  %v421_v47 = vadd.f32 %v1011_v22, %v420_v43  ;;  %v441_v48 = vadd.f32 %v1011_v22, %v440_v44  ;;  %v383_v49 = vpop.f32.mrf.mxu0  ;;  %v403_v50 = vpop.f32.mrf.mxu1 }
  0xa9   : > { %885 = vst [vmem:[%s1024_s30 + $0x20] sm:$0xff] %v825_v42   ;;  %v384_v59 = vadd.f32 %v1011_v22, %v383_v49  ;;  %v404_v60 = vadd.f32 %v1011_v22, %v403_v50 }
  0xaa   : > { %vm475_vm7 = vcmp.ge.f32.partialorder %v421_v47, 0.0  ;;  %v507_v51 = vmul.f32 0.2, %v421_v47  ;;  %vm483_vm8 = vcmp.ge.f32.partialorder %v441_v48, 0.0  ;;  %v515_v52 = vmul.f32 0.2, %v441_v48 }
  0xab   : > { %v492_v1 = vmul.f32 0.2, %v384_v59  ;;  %v500_v2 = vmul.f32 0.2, %v404_v60  ;;  %vm460_vm9 = vcmp.ge.f32.partialorder %v384_v59, 0.0  ;;  %vm468_vm10 = vcmp.ge.f32.partialorder %v404_v60, 0.0 }
  0xac   : > { %v539_v55 = vsel %vm475_vm7, %v421_v47, %v507_v51  ;;  %v547_v56 = vsel %vm483_vm8, %v441_v48, %v515_v52 }
  0xad   : > { %v845_v57 = vpack.c.bf16 %v539_v55, %v538_v53  ;;  %v865_v58 = vpack.c.bf16 %v547_v56, %v546_v54  ;;  %v524_v9 = vsel %vm460_vm9, %v384_v59, %v492_v1  ;;  %v532_v10 = vsel %vm468_vm10, %v404_v60, %v500_v2 }
  0xaf   : > { %889 = vst [vmem:[%s1024_s30 + $0x40] sm:$0xff] %v845_v57   ;;  %v423_v61 = vpop.f32.mrf.mxu2  ;;  %v443_v62 = vpop.f32.mrf.mxu3 }
  0xb0   : > { %893 = vst [vmem:[%s1024_s30 + $0x60] sm:$0xff] %v865_v58   ;;  %v385_v63 = vpop.f32.mrf.mxu0  ;;  %v405_v0 = vpop.f32.mrf.mxu1  ;;  %v424_v7 = vadd.f32 %v1011_v22, %v423_v61  ;;  %v444_v8 = vadd.f32 %v1011_v22, %v443_v62 }
  0xb1   : > { %v386_v3 = vadd.f32 %v1011_v22, %v385_v63  ;;  %v406_v4 = vadd.f32 %v1011_v22, %v405_v0 }
  0xb2   : > { %v508_v17 = vmul.f32 0.2, %v424_v7  ;;  %v516_v18 = vmul.f32 0.2, %v444_v8  ;;  %vm476_vm13 = vcmp.ge.f32.partialorder %v424_v7, 0.0  ;;  %vm484_vm14 = vcmp.ge.f32.partialorder %v444_v8, 0.0 }
  0xb3   : > { %vm461_vm11 = vcmp.ge.f32.partialorder %v386_v3, 0.0  ;;  %v493_v5 = vmul.f32 0.2, %v386_v3  ;;  %vm469_vm12 = vcmp.ge.f32.partialorder %v406_v4, 0.0  ;;  %v501_v6 = vmul.f32 0.2, %v406_v4 }
  0xb4   : > { %v540_v26 = vsel %vm476_vm13, %v424_v7, %v508_v17  ;;  %v548_v27 = vsel %vm484_vm14, %v444_v8, %v516_v18 }
  0xb5   : > { %v525_v11 = vsel %vm461_vm11, %v386_v3, %v493_v5  ;;  %v533_v12 = vsel %vm469_vm12, %v406_v4, %v501_v6 }
  0xb6   : > { %v810_v13 = vpack.c.bf16 %v525_v11, %v524_v9  ;;  %v830_v14 = vpack.c.bf16 %v533_v12, %v532_v10 }
  0xb7   : > { %v425_v15 = vpop.f32.mrf.mxu2  ;;  %v445_v16 = vpop.f32.mrf.mxu3 }
  0xb8   : > { %882 = vst [vmem:[%s1024_s30 + $0x8] sm:$0xff] %v810_v13   ;;  %v426_v19 = vadd.f32 %v1011_v22, %v425_v15  ;;  %v446_v20 = vadd.f32 %v1011_v22, %v445_v16  ;;  %v388_v21 = vpop.f32.mrf.mxu0  ;;  %v408_v23 = vpop.f32.mrf.mxu1 }
  0xb9   : > { %886 = vst [vmem:[%s1024_s30 + $0x28] sm:$0xff] %v830_v14   ;;  %v389_v32 = vadd.f32 %v1011_v22, %v388_v21  ;;  %v409_v33 = vadd.f32 %v1011_v22, %v408_v23 }
  0xba   : > { %vm477_vm15 = vcmp.ge.f32.partialorder %v426_v19, 0.0  ;;  %v509_v24 = vmul.f32 0.2, %v426_v19  ;;  %vm485_vm0 = vcmp.ge.f32.partialorder %v446_v20, 0.0  ;;  %v517_v25 = vmul.f32 0.2, %v446_v20 }
  0xbb   : > { %v494_v38 = vmul.f32 0.2, %v389_v32  ;;  %v502_v39 = vmul.f32 0.2, %v409_v33  ;;  %vm462_vm1 = vcmp.ge.f32.partialorder %v389_v32, 0.0  ;;  %vm470_vm2 = vcmp.ge.f32.partialorder %v409_v33, 0.0 }
  0xbc   : > { %v541_v28 = vsel %vm477_vm15, %v426_v19, %v509_v24  ;;  %v549_v29 = vsel %vm485_vm0, %v446_v20, %v517_v25 }
  0xbd   : > { %v850_v30 = vpack.c.bf16 %v541_v28, %v540_v26  ;;  %v870_v31 = vpack.c.bf16 %v549_v29, %v548_v27  ;;  %v526_v46 = vsel %vm462_vm1, %v389_v32, %v494_v38  ;;  %v534_v47 = vsel %vm470_vm2, %v409_v33, %v502_v39 }
  0xbf   : > { %890 = vst [vmem:[%s1024_s30 + $0x48] sm:$0xff] %v850_v30   ;;  %v428_v34 = vpop.f32.mrf.mxu2  ;;  %v448_v35 = vpop.f32.mrf.mxu3 }
  0xc0   : > { %894 = vst [vmem:[%s1024_s30 + $0x68] sm:$0xff] %v870_v31   ;;  %v390_v36 = vpop.f32.mrf.mxu0  ;;  %v410_v37 = vpop.f32.mrf.mxu1  ;;  %v429_v44 = vadd.f32 %v1011_v22, %v428_v34  ;;  %v449_v45 = vadd.f32 %v1011_v22, %v448_v35 }
  0xc1   : > { %v391_v40 = vadd.f32 %v1011_v22, %v390_v36  ;;  %v411_v41 = vadd.f32 %v1011_v22, %v410_v37 }
  0xc2   : > { %v510_v54 = vmul.f32 0.2, %v429_v44  ;;  %v518_v55 = vmul.f32 0.2, %v449_v45  ;;  %vm478_vm5 = vcmp.ge.f32.partialorder %v429_v44, 0.0  ;;  %vm486_vm6 = vcmp.ge.f32.partialorder %v449_v45, 0.0 }
  0xc3   : > { %vm463_vm3 = vcmp.ge.f32.partialorder %v391_v40, 0.0  ;;  %v495_v42 = vmul.f32 0.2, %v391_v40  ;;  %vm471_vm4 = vcmp.ge.f32.partialorder %v411_v41, 0.0  ;;  %v503_v43 = vmul.f32 0.2, %v411_v41 }
  0xc4   : > { %v542_v62 = vsel %vm478_vm5, %v429_v44, %v510_v54  ;;  %v550_v63 = vsel %vm486_vm6, %v449_v45, %v518_v55 }
  0xc5   : > { %v527_v48 = vsel %vm463_vm3, %v391_v40, %v495_v42  ;;  %v535_v49 = vsel %vm471_vm4, %v411_v41, %v503_v43 }
  0xc6   : > { %v815_v50 = vpack.c.bf16 %v527_v48, %v526_v46  ;;  %v835_v51 = vpack.c.bf16 %v535_v49, %v534_v47 }
  0xc7   : > { %v430_v52 = vpop.f32.mrf.mxu2  ;;  %v450_v53 = vpop.f32.mrf.mxu3 }
  0xc8   : > { %883 = vst [vmem:[%s1024_s30 + $0x10] sm:$0xff] %v815_v50   ;;  %v431_v56 = vadd.f32 %v1011_v22, %v430_v52  ;;  %v451_v57 = vadd.f32 %v1011_v22, %v450_v53  ;;  %v393_v58 = vpop.f32.mrf.mxu0  ;;  %v413_v59 = vpop.f32.mrf.mxu1 }
  0xc9   : > { %887 = vst [vmem:[%s1024_s30 + $0x30] sm:$0xff] %v835_v51   ;;  %v394_v4 = vadd.f32 %v1011_v22, %v393_v58  ;;  %v414_v5 = vadd.f32 %v1011_v22, %v413_v59 }
  0xca   : > { %vm479_vm7 = vcmp.ge.f32.partialorder %v431_v56, 0.0  ;;  %v511_v60 = vmul.f32 0.2, %v431_v56  ;;  %vm487_vm8 = vcmp.ge.f32.partialorder %v451_v57, 0.0  ;;  %v519_v61 = vmul.f32 0.2, %v451_v57 }
  0xcb   : > { %v496_v10 = vmul.f32 0.2, %v394_v4  ;;  %v504_v11 = vmul.f32 0.2, %v414_v5  ;;  %vm464_vm9 = vcmp.ge.f32.partialorder %v394_v4, 0.0  ;;  %vm472_vm10 = vcmp.ge.f32.partialorder %v414_v5, 0.0 }
  0xcc   : > { %v543_v0 = vsel %vm479_vm7, %v431_v56, %v511_v60  ;;  %v551_v1 = vsel %vm487_vm8, %v451_v57, %v519_v61 }
  0xcd   : > { %v855_v2 = vpack.c.bf16 %v543_v0, %v542_v62  ;;  %v875_v3 = vpack.c.bf16 %v551_v1, %v550_v63  ;;  %v528_v18 = vsel %vm464_vm9, %v394_v4, %v496_v10  ;;  %v536_v19 = vsel %vm472_vm10, %v414_v5, %v504_v11 }
  0xcf   : > { %891 = vst [vmem:[%s1024_s30 + $0x50] sm:$0xff] %v855_v2   ;;  %v433_v6 = vpop.f32.mrf.mxu2  ;;  %v453_v7 = vpop.f32.mrf.mxu3 }
  0xd0   : > { %895 = vst [vmem:[%s1024_s30 + $0x70] sm:$0xff] %v875_v3   ;;  %v395_v8 = vpop.f32.mrf.mxu0  ;;  %v415_v9 = vpop.f32.mrf.mxu1  ;;  %v434_v16 = vadd.f32 %v1011_v22, %v433_v6  ;;  %v454_v17 = vadd.f32 %v1011_v22, %v453_v7 }
  0xd1   : > { %v396_v12 = vadd.f32 %v1011_v22, %v395_v8  ;;  %v416_v13 = vadd.f32 %v1011_v22, %v415_v9 }
  0xd2   : > { %v512_v27 = vmul.f32 0.2, %v434_v16  ;;  %v520_v28 = vmul.f32 0.2, %v454_v17  ;;  %vm480_vm13 = vcmp.ge.f32.partialorder %v434_v16, 0.0  ;;  %vm488_vm14 = vcmp.ge.f32.partialorder %v454_v17, 0.0 }
  0xd3   : > { %vm465_vm11 = vcmp.ge.f32.partialorder %v396_v12, 0.0  ;;  %v497_v14 = vmul.f32 0.2, %v396_v12  ;;  %vm473_vm12 = vcmp.ge.f32.partialorder %v416_v13, 0.0  ;;  %v505_v15 = vmul.f32 0.2, %v416_v13 }
  0xd4   : > { %v544_v33 = vsel %vm480_vm13, %v434_v16, %v512_v27  ;;  %v552_v34 = vsel %vm488_vm14, %v454_v17, %v520_v28 }
  0xd5   : > { %v529_v20 = vsel %vm465_vm11, %v396_v12, %v497_v14  ;;  %v537_v21 = vsel %vm473_vm12, %v416_v13, %v505_v15 }
  0xd6   : > { %v820_v23 = vpack.c.bf16 %v529_v20, %v528_v18  ;;  %v840_v24 = vpack.c.bf16 %v537_v21, %v536_v19 }
  0xd7   : > { %v435_v25 = vpop.f32.mrf.mxu2  ;;  %v455_v26 = vpop.f32.mrf.mxu3 }
  0xd8   : > { %884 = vst [vmem:[%s1024_s30 + $0x18] sm:$0xff] %v820_v23   ;;  %v436_v29 = vadd.f32 %v1011_v22, %v435_v25  ;;  %v456_v30 = vadd.f32 %v1011_v22, %v455_v26 }
  0xd9   : > { %888 = vst [vmem:[%s1024_s30 + $0x38] sm:$0xff] %v840_v24  }
  0xda   : > { %vm481_vm15 = vcmp.ge.f32.partialorder %v436_v29, 0.0  ;;  %v513_v31 = vmul.f32 0.2, %v436_v29  ;;  %vm489_vm0 = vcmp.ge.f32.partialorder %v456_v30, 0.0  ;;  %v521_v32 = vmul.f32 0.2, %v456_v30 }
  0xdc   : > { %v545_v35 = vsel %vm481_vm15, %v436_v29, %v513_v31  ;;  %v553_v36 = vsel %vm489_vm0, %v456_v30, %v521_v32 }
  0xdd   : > { %v860_v37 = vpack.c.bf16 %v545_v35, %v544_v33  ;;  %v880_v38 = vpack.c.bf16 %v553_v36, %v552_v34 }
  0xdf   : > { %892 = vst [vmem:[%s1024_s30 + $0x58] sm:$0xff] %v860_v37  }
  0xe0   : > { %896 = vst [vmem:[%s1024_s30 + $0x78] sm:$0xff] %v880_v38  }
  0xe1 PF: > { %s13_s12 = sadd.s32 1, %s924_s12  }
  0xe2   : > { %p10_p4 = scmp.ge.s32.totalorder %s13_s12, 4  }
  0xe4   :  { %12 = sbr.rel (!%p10_p4) target bundleno = 1 (0x1), region = 62 }

// kernel: discriminator_forward.10
= control target key start
LH: loop header
LB: loop body
LE: loop exit
PB: predicated region body
PF: predicated region fallthrough
CT: control target
= control target key end

     0   :  { %s368_s0 = inlined_call_operand.vmem [shape: bf16[128,128], index: 0, kind: input, shape index: {}]   ;;  %s369_s1 = inlined_call_operand.vmem [shape: f32[1,128], index: 1, kind: input, shape index: {}]   ;;  %s370_s2 = inlined_call_operand.vmem [shape: f32[1,128], index: 2, kind: input, shape index: {}]   ;;  %s371_s3 = inlined_call_operand.vmem [shape: bf16[128,128], index: 3, kind: output, shape index: {}]  }
   0x1   :  { %v171_v0 = vld [vmem:[%s368_s0] sm:$0xff]   ;;  %v242_v5 = vld [vmem:[%s368_s0 + $0x8] sm:$0xff]   ;;  %v243_v8 = vld [vmem:[%s368_s0 + $0x10] sm:$0xff]  }
   0x2   :  { %v284_v1 = vld [vmem:[%s369_s1] ss:$0 sm:$0xff]  ;;  %v172_v2 = vunpack.c.l.bf16 %v171_v0  ;;  %v173_v3 = vunpack.c.h.bf16 %v171_v0  ;;  %v176_v6 = vunpack.c.l.bf16 %v242_v5  ;;  %v177_v7 = vunpack.c.h.bf16 %v242_v5  ;;  %v244_v9 = vld [vmem:[%s368_s0 + $0x18] sm:$0xff]   ;;  %v246_v39 = vld [vmem:[%s368_s0 + $0x28] sm:$0xff]  }
   0x3   :  { %v289_v4 = vld [vmem:[%s370_s2] ss:$0 sm:$0xff]  ;;  %v180_v12 = vunpack.c.l.bf16 %v243_v8  ;;  %v181_v13 = vunpack.c.h.bf16 %v243_v8  ;;  %v184_v16 = vunpack.c.l.bf16 %v244_v9  ;;  %v185_v17 = vunpack.c.h.bf16 %v244_v9  ;;  %v247_v49 = vld [vmem:[%s368_s0 + $0x30] sm:$0xff]   ;;  %v248_v57 = vld [vmem:[%s368_s0 + $0x38] sm:$0xff]  }
   0x4   :  { %v50_v10 = vmul.f32 %v284_v1, %v172_v2  ;;  %v51_v11 = vmul.f32 %v284_v1, %v173_v3  ;;  %v52_v14 = vmul.f32 %v284_v1, %v176_v6  ;;  %v53_v15 = vmul.f32 %v284_v1, %v177_v7  ;;  %v245_v38 = vld [vmem:[%s368_s0 + $0x20] sm:$0xff]  }
   0x5   :  { %v54_v20 = vmul.f32 %v284_v1, %v180_v12  ;;  %v55_v21 = vmul.f32 %v284_v1, %v181_v13  ;;  %v56_v24 = vmul.f32 %v284_v1, %v184_v16  ;;  %v57_v25 = vmul.f32 %v284_v1, %v185_v17 }
   0x6   :  { %v70_v18 = vadd.f32 %v289_v4, %v50_v10  ;;  %v71_v19 = vadd.f32 %v289_v4, %v51_v11  ;;  %v72_v22 = vadd.f32 %v289_v4, %v52_v14  ;;  %v73_v23 = vadd.f32 %v289_v4, %v53_v15 }
   0x7   :  { %v74_v32 = vadd.f32 %v289_v4, %v54_v20  ;;  %v75_v33 = vadd.f32 %v289_v4, %v55_v21  ;;  %v76_v37 = vadd.f32 %v289_v4, %v56_v24  ;;  %v77_v43 = vadd.f32 %v289_v4, %v57_v25 }
   0x8   :  { %vm86_vm0 = vcmp.ge.f32.partialorder %v70_v18, 0.0  ;;  %vm87_vm1 = vcmp.ge.f32.partialorder %v71_v19, 0.0  ;;  %v102_v26 = vmul.f32 0.2, %v70_v18  ;;  %v103_v27 = vmul.f32 0.2, %v71_v19 }
   0x9   :  { %vm88_vm2 = vcmp.ge.f32.partialorder %v72_v22, 0.0  ;;  %vm89_vm3 = vcmp.ge.f32.partialorder %v73_v23, 0.0  ;;  %v104_v28 = vmul.f32 0.2, %v72_v22  ;;  %v105_v29 = vmul.f32 0.2, %v73_v23 }
   0xa   :  { %v118_v30 = vsel %vm86_vm0, %v70_v18, %v102_v26  ;;  %v119_v31 = vsel %vm87_vm1, %v71_v19, %v103_v27  ;;  %vm90_vm4 = vcmp.ge.f32.partialorder %v74_v32, 0.0  ;;  %vm91_vm5 = vcmp.ge.f32.partialorder %v75_v33, 0.0 }
   0xb   :  { %v205_v34 = vpack.c.bf16 %v119_v31, %v118_v30  ;;  %v120_v35 = vsel %vm88_vm2, %v72_v22, %v104_v28  ;;  %v121_v36 = vsel %vm89_vm3, %v73_v23, %v105_v29  ;;  %v106_v41 = vmul.f32 0.2, %v74_v32 }
   0xc   :  { %v210_v40 = vpack.c.bf16 %v121_v36, %v120_v35  ;;  %v107_v42 = vmul.f32 0.2, %v75_v33  ;;  %vm92_vm6 = vcmp.ge.f32.partialorder %v76_v37, 0.0  ;;  %v108_v44 = vmul.f32 0.2, %v76_v37 }
   0xd   :  { %206 = vst [vmem:[%s371_s3] sm:$0xff] %v205_v34   ;;  %v122_v45 = vsel %vm90_vm4, %v74_v32, %v106_v41  ;;  %v188_v46 = vunpack.c.l.bf16 %v245_v38  ;;  %v189_v47 = vunpack.c.h.bf16 %v245_v38  ;;  %v192_v48 = vunpack.c.l.bf16 %v246_v39 }
   0xe   :  { %249 = vst [vmem:[%s371_s3 + $0x8] sm:$0xff] %v210_v40   ;;  %v123_v50 = vsel %vm91_vm5, %v75_v33, %v107_v42  ;;  %vm93_vm7 = vcmp.ge.f32.partialorder %v77_v43, 0.0  ;;  %v109_v51 = vmul.f32 0.2, %v77_v43  ;;  %v124_v52 = vsel %vm92_vm6, %v76_v37, %v108_v44 }
   0xf   :  { %v215_v53 = vpack.c.bf16 %v123_v50, %v122_v45  ;;  %v58_v54 = vmul.f32 %v284_v1, %v188_v46  ;;  %v59_v55 = vmul.f32 %v284_v1, %v189_v47  ;;  %v193_v56 = vunpack.c.h.bf16 %v246_v39 }
  0x10   :  { %v125_v58 = vsel %vm93_vm7, %v77_v43, %v109_v51  ;;  %v60_v59 = vmul.f32 %v284_v1, %v192_v48  ;;  %v196_v60 = vunpack.c.l.bf16 %v247_v49  ;;  %v197_v61 = vunpack.c.h.bf16 %v247_v49 }
  0x11   :  { %250 = vst [vmem:[%s371_s3 + $0x10] sm:$0xff] %v215_v53   ;;  %v220_v62 = vpack.c.bf16 %v125_v58, %v124_v52  ;;  %v78_v63 = vadd.f32 %v289_v4, %v58_v54  ;;  %v79_v0 = vadd.f32 %v289_v4, %v59_v55  ;;  %v61_v2 = vmul.f32 %v284_v1, %v193_v56 }
  0x12   :  { %v80_v3 = vadd.f32 %v289_v4, %v60_v59  ;;  %v62_v5 = vmul.f32 %v284_v1, %v196_v60  ;;  %v63_v6 = vmul.f32 %v284_v1, %v197_v61  ;;  %v200_v7 = vunpack.c.l.bf16 %v248_v57 }
  0x13   :  { %251 = vst [vmem:[%s371_s3 + $0x18] sm:$0xff] %v220_v62   ;;  %vm94_vm8 = vcmp.ge.f32.partialorder %v78_v63, 0.0  ;;  %vm95_vm9 = vcmp.ge.f32.partialorder %v79_v0, 0.0  ;;  %v110_v8 = vmul.f32 0.2, %v78_v63  ;;  %v81_v9 = vadd.f32 %v289_v4, %v61_v2 }
  0x14   :  { %v111_v10 = vmul.f32 0.2, %v79_v0  ;;  %vm96_vm10 = vcmp.ge.f32.partialorder %v80_v3, 0.0  ;;  %v112_v11 = vmul.f32 0.2, %v80_v3  ;;  %v82_v12 = vadd.f32 %v289_v4, %v62_v5 }
  0x15   :  { %v126_v13 = vsel %vm94_vm8, %v78_v63, %v110_v8  ;;  %vm97_vm11 = vcmp.ge.f32.partialorder %v81_v9, 0.0  ;;  %v113_v14 = vmul.f32 0.2, %v81_v9  ;;  %v83_v15 = vadd.f32 %v289_v4, %v63_v6 }
  0x16   :  { %v127_v16 = vsel %vm95_vm9, %v79_v0, %v111_v10  ;;  %v128_v17 = vsel %vm96_vm10, %v80_v3, %v112_v11  ;;  %vm98_vm12 = vcmp.ge.f32.partialorder %v82_v12, 0.0  ;;  %v114_v18 = vmul.f32 0.2, %v82_v12 }
  0x17   :  { %v225_v19 = vpack.c.bf16 %v127_v16, %v126_v13  ;;  %v129_v20 = vsel %vm97_vm11, %v81_v9, %v113_v14  ;;  %vm99_vm13 = vcmp.ge.f32.partialorder %v83_v15, 0.0  ;;  %v115_v21 = vmul.f32 0.2, %v83_v15 }
  0x18   :  { %v230_v22 = vpack.c.bf16 %v129_v20, %v128_v17  ;;  %v130_v23 = vsel %vm98_vm12, %v82_v12, %v114_v18  ;;  %v201_v24 = vunpack.c.h.bf16 %v248_v57  ;;  %v64_v25 = vmul.f32 %v284_v1, %v200_v7 }
  0x19   :  { %252 = vst [vmem:[%s371_s3 + $0x20] sm:$0xff] %v225_v19   ;;  %v131_v26 = vsel %vm99_vm13, %v83_v15, %v115_v21 }
  0x1a   :  { %253 = vst [vmem:[%s371_s3 + $0x28] sm:$0xff] %v230_v22   ;;  %v235_v27 = vpack.c.bf16 %v131_v26, %v130_v23  ;;  %v65_v28 = vmul.f32 %v284_v1, %v201_v24  ;;  %v84_v29 = vadd.f32 %v289_v4, %v64_v25 }
  0x1c   :  { %254 = vst [vmem:[%s371_s3 + $0x30] sm:$0xff] %v235_v27   ;;  %v85_v30 = vadd.f32 %v289_v4, %v65_v28  ;;  %vm100_vm14 = vcmp.ge.f32.partialorder %v84_v29, 0.0  ;;  %v116_v31 = vmul.f32 0.2, %v84_v29 }
  0x1e   :  { %vm101_vm15 = vcmp.ge.f32.partialorder %v85_v30, 0.0  ;;  %v117_v32 = vmul.f32 0.2, %v85_v30  ;;  %v132_v33 = vsel %vm100_vm14, %v84_v29, %v116_v31 }
  0x20   :  { %v133_v34 = vsel %vm101_vm15, %v85_v30, %v117_v32 }
  0x21   :  { %v240_v35 = vpack.c.bf16 %v133_v34, %v132_v33 }
  0x23   :  { %255 = vst [vmem:[%s371_s3 + $0x38] sm:$0xff] %v240_v35  }

// kernel: discriminator_forward.9
= control target key start
LH: loop header
LB: loop body
LE: loop exit
PB: predicated region body
PF: predicated region fallthrough
CT: control target
= control target key end

     0   :  { %s3515_s15 = smov 0   ;;  %s4161_s0 = inlined_call_operand.vmem [shape: bf16[2,2,72,512], index: 0, kind: input, shape index: {}]   ;;  %s4162_s1 = inlined_call_operand.vmem [shape: bf16[4,512,128], index: 1, kind: input, shape index: {}]   ;;  %s4163_s2 = inlined_call_operand.vmem [shape: f32[1,128], index: 2, kind: input, shape index: {}]   ;;  %s4164_s3 = inlined_call_operand.vmem [shape: bf16[2,64,128], index: 3, kind: output, shape index: {0}]   ;;  %s4165_s4 = inlined_call_operand.vmem [shape: f32[2,2,128], index: 4, kind: output, shape index: {1}]  }
   0x1 LB: > { %s2253_s16 = sadd.s32 4294967295, %s3488_s15   ;;  %p2257_p0 = scmp.ge.s32.totalorder %s3488_s15, 1  ;;  %s3488_s15 = sphi %s3515_s15, %s15_s15  }
   0x2   : > { %p165_p1 = scmp.lt.s32.totalorder %s3488_s15, 3 }
   0x4   : > { %p166_p2 = pnand %p2257_p0, %p165_p1 }
   0x5   : > { %p195_p3 = scmp.lt.s32.totalorder (!%p166_p2), %s2253_s16, 1 }
   0x6   : > { %169 = sbr.rel (%p166_p2) target bundleno = 450 (0x1c2), region = 32 }
   0xb   : > { %v3328_v0 = vld [vmem:[%s4162_s1 + $0x138] sm:$0xff]  ;;  %v3327_v4 = vld [vmem:[%s4162_s1 + $0x130] sm:$0xff]  ;;  %v3326_v8 = vld [vmem:[%s4162_s1 + $0x128] sm:$0xff]  ;;  %s4167_s16 = smov (!%p195_p3, %s2253_s16), 1 }
   0xc   : > { %v3336_v1 = vld [vmem:[%s4162_s1 + $0x178] sm:$0xff]  ;;  %644 = vmatpush.bf16.msra.mxu0 %v3328_v0  ;;  %v3335_v5 = vld [vmem:[%s4162_s1 + $0x170] sm:$0xff]  ;;  %v3334_v9 = vld [vmem:[%s4162_s1 + $0x168] sm:$0xff]  ;;  %s3472_s11 = smul.u32 288, %s4167_s16  ;;  %s3256_s22 = sshll.u32 %s4167_s16, 5 }
   0xd   : > { %v3344_v2 = vld [vmem:[%s4162_s1 + $0x1b8] sm:$0xff]  ;;  %673 = vmatpush.bf16.msra.mxu1 %v3336_v1  ;;  %v3343_v6 = vld [vmem:[%s4162_s1 + $0x1b0] sm:$0xff]  ;;  %v3342_v10 = vld [vmem:[%s4162_s1 + $0x1a8] sm:$0xff]  ;;  %s4126_s26 = scalar_lea.vmem %s4164_s3, %s3256_s22  ;;  %s2261_s27 = sshll.u32 %s4167_s16, 1 }
   0xe   : > { %v3352_v3 = vld [vmem:[%s4162_s1 + $0x1f8] sm:$0xff]  ;;  %702 = vmatpush.bf16.msra.mxu2 %v3344_v2  ;;  %v3351_v7 = vld [vmem:[%s4162_s1 + $0x1f0] sm:$0xff]  ;;  %v3350_v11 = vld [vmem:[%s4162_s1 + $0x1e8] sm:$0xff]  ;;  %s3611_s24 = scalar_lea.vmem %s4161_s0, %s3472_s11  ;;  %s208_s30 = scalar_lea.vmem %s4165_s4, %s2261_s27 }
   0xf   : > { %731 = vmatpush.bf16.msra.mxu3 %v3352_v3  ;;  %v3325_v12 = vld [vmem:[%s4162_s1 + $0x120] sm:$0xff]  ;;  %v3324_v16 = vld [vmem:[%s4162_s1 + $0x118] sm:$0xff]  ;;  %v3323_v20 = vld [vmem:[%s4162_s1 + $0x110] sm:$0xff] }
  0x10   : > { %645 = vmatpush.bf16.msra.mxu0 %v3327_v4  ;;  %v3333_v13 = vld [vmem:[%s4162_s1 + $0x160] sm:$0xff]  ;;  %v3332_v17 = vld [vmem:[%s4162_s1 + $0x158] sm:$0xff]  ;;  %v3331_v21 = vld [vmem:[%s4162_s1 + $0x150] sm:$0xff] }
  0x11   : > { %674 = vmatpush.bf16.msra.mxu1 %v3335_v5  ;;  %v3341_v14 = vld [vmem:[%s4162_s1 + $0x1a0] sm:$0xff]  ;;  %v3340_v18 = vld [vmem:[%s4162_s1 + $0x198] sm:$0xff]  ;;  %v3339_v22 = vld [vmem:[%s4162_s1 + $0x190] sm:$0xff] }
  0x12   : > { %703 = vmatpush.bf16.msra.mxu2 %v3343_v6  ;;  %v3349_v15 = vld [vmem:[%s4162_s1 + $0x1e0] sm:$0xff]  ;;  %v3348_v19 = vld [vmem:[%s4162_s1 + $0x1d8] sm:$0xff]  ;;  %v3347_v23 = vld [vmem:[%s4162_s1 + $0x1d0] sm:$0xff] }
  0x13   : > { %732 = vmatpush.bf16.msra.mxu3 %v3351_v7  ;;  %v3322_v24 = vld [vmem:[%s4162_s1 + $0x108] sm:$0xff]  ;;  %v3321_v28 = vld [vmem:[%s4162_s1 + $0x100] sm:$0xff]  ;;  %v2344_v32 = vld [vmem:[%s3611_s24 + $0x90] sm:$0xf] }
  0x14   : > { %646 = vmatpush.bf16.msra.mxu0 %v3326_v8  ;;  %v3330_v25 = vld [vmem:[%s4162_s1 + $0x148] sm:$0xff]  ;;  %v3329_v29 = vld [vmem:[%s4162_s1 + $0x140] sm:$0xff]  ;;  %v3305_v34 = vld [vmem:[%s3611_s24 + $0x94] sm:$0xf] }
  0x15   : > { %675 = vmatpush.bf16.msra.mxu1 %v3334_v9  ;;  %v3338_v26 = vld [vmem:[%s4162_s1 + $0x188] sm:$0xff]  ;;  %v3337_v30 = vld [vmem:[%s4162_s1 + $0x180] sm:$0xff]  ;;  %v2352_v36 = vld [vmem:[%s3611_s24 + $0x98] sm:$0xf] }
  0x16   : > { %704 = vmatpush.bf16.msra.mxu2 %v3342_v10  ;;  %v3346_v27 = vld [vmem:[%s4162_s1 + $0x1c8] sm:$0xff]  ;;  %v3345_v31 = vld [vmem:[%s4162_s1 + $0x1c0] sm:$0xff]  ;;  %v3306_v38 = vld [vmem:[%s3611_s24 + $0x9c] sm:$0xf] }
  0x17   : > { %733 = vmatpush.bf16.msra.mxu3 %v3350_v11  ;;  %v3307_v33 = vld [vmem:[%s3611_s24 + $0x9c] sm:$0xf0]  ;;  %v2346_v35 = vld [vmem:[%s3611_s24 + $0xa0] sm:$0xf0]  ;;  %v3308_v37 = vld [vmem:[%s3611_s24 + $0xa4] sm:$0xf0] }
  0x18   : > { %647 = vmatpush.bf16.msra.mxu0 %v3325_v12  ;;  %v2354_v39 = vld [vmem:[%s3611_s24 + $0xa8] sm:$0xf0]  ;;  %v3296_v40 = vld [vmem:[%s4162_s1 + $0xb8] sm:$0xff]  ;;  %v2345_v42 = vor.u32 %v3307_v33, %v2344_v32  ;;  %v2349_v43 = vor.u32 %v3305_v34, %v2346_v35  ;;  %v2353_v44 = vor.u32 %v3308_v37, %v2352_v36  ;;  %v3295_v48 = vld [vmem:[%s4162_s1 + $0xb0] sm:$0xff] }
  0x19   : > { %676 = vmatpush.bf16.msra.mxu1 %v3333_v13  ;;  %v3304_v41 = vld [vmem:[%s4162_s1 + $0xf8] sm:$0xff]  ;;  %v2357_v45 = vor.u32 %v3306_v38, %v2354_v39  ;;  %v3303_v49 = vld [vmem:[%s4162_s1 + $0xf0] sm:$0xff]  ;;  %v3294_v52 = vld [vmem:[%s4162_s1 + $0xa8] sm:$0xff] }
  0x1a   : > { %705 = vmatpush.bf16.msra.mxu2 %v3341_v14  ;;  %v3280_v46 = vld [vmem:[%s4162_s1 + $0x38] sm:$0xff]  ;;  %v3279_v50 = vld [vmem:[%s4162_s1 + $0x30] sm:$0xff]  ;;  %v3302_v53 = vld [vmem:[%s4162_s1 + $0xe8] sm:$0xff] }
  0x1b   : > { %734 = vmatpush.bf16.msra.mxu3 %v3349_v15  ;;  %v3288_v47 = vld [vmem:[%s4162_s1 + $0x78] sm:$0xff]  ;;  %v3287_v51 = vld [vmem:[%s4162_s1 + $0x70] sm:$0xff]  ;;  %v3278_v54 = vld [vmem:[%s4162_s1 + $0x28] sm:$0xff] }
  0x1c   : > { %648 = vmatpush.bf16.msra.mxu0 %v3324_v16  ;;  %v3286_v55 = vld [vmem:[%s4162_s1 + $0x68] sm:$0xff]  ;;  %v2360_v56 = vld [vmem:[%s3611_s24 + $0xb0] sm:$0xf]  ;;  %v3293_v57 = vld [vmem:[%s4162_s1 + $0xa0] sm:$0xff] }
  0x1d   : > { %677 = vmatpush.bf16.msra.mxu1 %v3332_v17  ;;  %v3301_v58 = vld [vmem:[%s4162_s1 + $0xe0] sm:$0xff]  ;;  %v3309_v60 = vld [vmem:[%s3611_s24 + $0xb4] sm:$0xf]  ;;  %v2368_v62 = vld [vmem:[%s3611_s24 + $0xb8] sm:$0xf] }
  0x1e   : > { %706 = vmatpush.bf16.msra.mxu2 %v3340_v18  ;;  %v3311_v59 = vld [vmem:[%s3611_s24 + $0xbc] sm:$0xf0]  ;;  %v2362_v61 = vld [vmem:[%s3611_s24 + $0xc0] sm:$0xf0]  ;;  %v3312_v63 = vld [vmem:[%s3611_s24 + $0xc4] sm:$0xf0] }
  0x1f   : > { %735 = vmatpush.bf16.msra.mxu3 %v3348_v19  ;;  %v3310_v0 = vld [vmem:[%s3611_s24 + $0xbc] sm:$0xf]  ;;  %v2370_v1 = vld [vmem:[%s3611_s24 + $0xc8] sm:$0xf0]  ;;  %v3277_v2 = vld [vmem:[%s4162_s1 + $0x20] sm:$0xff]  ;;  %v2361_v6 = vor.u32 %v3311_v59, %v2360_v56  ;;  %v2365_v7 = vor.u32 %v3309_v60, %v2362_v61  ;;  %v2369_v8 = vor.u32 %v3312_v63, %v2368_v62 }
  0x20   : > { %649 = vmatpush.bf16.msra.mxu0 %v3323_v20  ;;  %v3285_v3 = vld [vmem:[%s4162_s1 + $0x60] sm:$0xff]  ;;  %v3292_v4 = vld [vmem:[%s4162_s1 + $0x98] sm:$0xff]  ;;  %v2373_v9 = vor.u32 %v3310_v0, %v2370_v1  ;;  %v3291_v12 = vld [vmem:[%s4162_s1 + $0x90] sm:$0xff] }
  0x21   : > { %678 = vmatpush.bf16.msra.mxu1 %v3331_v21  ;;  %v3300_v5 = vld [vmem:[%s4162_s1 + $0xd8] sm:$0xff]  ;;  %v3299_v13 = vld [vmem:[%s4162_s1 + $0xd0] sm:$0xff]  ;;  %v3290_v16 = vld [vmem:[%s4162_s1 + $0x88] sm:$0xff] }
  0x22   : > { %707 = vmatpush.bf16.msra.mxu2 %v3339_v22  ;;  %v3276_v10 = vld [vmem:[%s4162_s1 + $0x18] sm:$0xff]  ;;  %v3275_v14 = vld [vmem:[%s4162_s1 + $0x10] sm:$0xff]  ;;  %v3298_v17 = vld [vmem:[%s4162_s1 + $0xc8] sm:$0xff] }
  0x23   : > { %736 = vmatpush.bf16.msra.mxu3 %v3347_v23  ;;  %v3284_v11 = vld [vmem:[%s4162_s1 + $0x58] sm:$0xff]  ;;  %v3283_v15 = vld [vmem:[%s4162_s1 + $0x50] sm:$0xff]  ;;  %v3274_v18 = vld [vmem:[%s4162_s1 + $0x8] sm:$0xff] }
  0x24   : > { %650 = vmatpush.bf16.msra.mxu0 %v3322_v24  ;;  %v3282_v19 = vld [vmem:[%s4162_s1 + $0x48] sm:$0xff]  ;;  %v2376_v20 = vld [vmem:[%s3611_s24 + $0xd0] sm:$0xf]  ;;  %v3289_v21 = vld [vmem:[%s4162_s1 + $0x80] sm:$0xff] }
  0x25   : > { %679 = vmatpush.bf16.msra.mxu1 %v3330_v25  ;;  %v3297_v22 = vld [vmem:[%s4162_s1 + $0xc0] sm:$0xff]  ;;  %v3313_v24 = vld [vmem:[%s3611_s24 + $0xd4] sm:$0xf]  ;;  %v3392_v36 = vld [vmem:[%s4162_s1 + $0x2b8] sm:$0xff] }
  0x26   : > { %708 = vmatpush.bf16.msra.mxu2 %v3338_v26  ;;  %v3315_v23 = vld [vmem:[%s3611_s24 + $0xdc] sm:$0xf0]  ;;  %v2378_v25 = vld [vmem:[%s3611_s24 + $0xe0] sm:$0xf0]  ;;  %v2384_v26 = vld [vmem:[%s3611_s24 + $0xd8] sm:$0xf] }
  0x27   : > { %737 = vmatpush.bf16.msra.mxu3 %v3346_v27  ;;  %v3316_v27 = vld [vmem:[%s3611_s24 + $0xe4] sm:$0xf0]  ;;  %v2377_v32 = vor.u32 %v3315_v23, %v2376_v20  ;;  %v2381_v33 = vor.u32 %v3313_v24, %v2378_v25  ;;  %v3400_v37 = vld [vmem:[%s4162_s1 + $0x2f8] sm:$0xff]  ;;  %v3389_v60 = vld [vmem:[%s4162_s1 + $0x2a0] sm:$0xff] }
  0x28   : > { %651 = vmatpush.bf16.msra.mxu0 %v3321_v28  ;;  %v3314_v28 = vld [vmem:[%s3611_s24 + $0xdc] sm:$0xf]  ;;  %v2385_v34 = vor.u32 %v3316_v27, %v2384_v26  ;;  %v3390_v56 = vld [vmem:[%s4162_s1 + $0x2a8] sm:$0xff]  ;;  %v3397_v61 = vld [vmem:[%s4162_s1 + $0x2e0] sm:$0xff] }
  0x29   : > { %680 = vmatpush.bf16.msra.mxu1 %v3329_v29  ;;  %v2386_v29 = vld [vmem:[%s3611_s24 + $0xe8] sm:$0xf0]  ;;  %v3376_v38 = vld [vmem:[%s4162_s1 + $0x238] sm:$0xff]  ;;  %v3373_v62 = vld [vmem:[%s4162_s1 + $0x220] sm:$0xff] }
  0x2a   : > { %709 = vmatpush.bf16.msra.mxu2 %v3337_v30  ;;  %v3273_v30 = vld [vmem:[%s4162_s1] sm:$0xff]  ;;  %v2389_v35 = vor.u32 %v3314_v28, %v2386_v29  ;;  %v3384_v39 = vld [vmem:[%s4162_s1 + $0x278] sm:$0xff]  ;;  %v3382_v59 = vld [vmem:[%s4162_s1 + $0x268] sm:$0xff] }
  0x2b   : > { %738 = vmatpush.bf16.msra.mxu3 %v3345_v31  ;;  %652 = vmatmul.bf16.vlgmr.msra.gmra.mxu0 %v2345_v42  ;;  %v3281_v31 = vld [vmem:[%s4162_s1 + $0x40] sm:$0xff]  ;;  %v3375_v42 = vld [vmem:[%s4162_s1 + $0x230] sm:$0xff]  ;;  %v2560_v24 = vld [vmem:[%s3611_s24 + $0x28] sm:$0xf] }
  0x2c   : > { %681 = vmatmul.bf16.vlgmr.msra.gmra.mxu1 %v2349_v43  ;;  %1032 = vmatpush.bf16.msrb.mxu0 %v3280_v46  ;;  %v3383_v43 = vld [vmem:[%s4162_s1 + $0x270] sm:$0xff]  ;;  %v3381_v63 = vld [vmem:[%s4162_s1 + $0x260] sm:$0xff]  ;;  %v3264_v25 = vld [vmem:[%s3611_s24 + $0x34] sm:$0xf0] }
  0x2d   : > { %710 = vmatmul.bf16.vlgmr.msra.gmra.mxu2 %v2353_v44  ;;  %1061 = vmatpush.bf16.msrb.mxu1 %v3288_v47  ;;  %v2392_v44 = vld [vmem:[%s3611_s24 + $0xf0] sm:$0xf]  ;;  %v3317_v46 = vld [vmem:[%s3611_s24 + $0xf4] sm:$0xf]  ;;  %v2394_v47 = vld [vmem:[%s3611_s24 + $0x100] sm:$0xf0] }
  0x2e   : > { %1090 = vmatpush.bf16.msrb.mxu2 %v3296_v40  ;;  %739 = vmatmul.bf16.vlgmr.msra.gmra.mxu3 %v2357_v45  ;;  %v3391_v40 = vld [vmem:[%s4162_s1 + $0x2b0] sm:$0xff]  ;;  %v3319_v45 = vld [vmem:[%s3611_s24 + $0xfc] sm:$0xf0]  ;;  %v3262_v26 = vld [vmem:[%s3611_s24 + $0x2c] sm:$0xf] }
  0x2f   : > { %1119 = vmatpush.bf16.msrb.mxu3 %v3304_v41  ;;  %v3399_v41 = vld [vmem:[%s4162_s1 + $0x2f0] sm:$0xff]  ;;  %v2536_v0 = vld [vmem:[%s3611_s24] sm:$0xf]  ;;  %v2562_v27 = vld [vmem:[%s3611_s24 + $0x38] sm:$0xf0] }
  0x30   : > { %1033 = vmatpush.bf16.msrb.mxu0 %v3279_v50  ;;  %v3318_v50 = vld [vmem:[%s3611_s24 + $0xfc] sm:$0xf]  ;;  %v3259_v1 = vld [vmem:[%s3611_s24 + $0xc] sm:$0xf0]  ;;  %v2552_v20 = vld [vmem:[%s3611_s24 + $0x20] sm:$0xf] }
  0x31   : > { %1062 = vmatpush.bf16.msrb.mxu1 %v3287_v51  ;;  %v2402_v51 = vld [vmem:[%s3611_s24 + $0x108] sm:$0xf0]  ;;  %v2554_v23 = vld [vmem:[%s3611_s24 + $0x30] sm:$0xf0] }
  0x32   : > { %1091 = vmatpush.bf16.msrb.mxu2 %v3295_v48  ;;  %v2400_v48 = vld [vmem:[%s3611_s24 + $0xf8] sm:$0xf] }
  0x33   : > { %1120 = vmatpush.bf16.msrb.mxu3 %v3303_v49  ;;  %v3320_v49 = vld [vmem:[%s3611_s24 + $0x104] sm:$0xf0] }
  0x34   : > { %1034 = vmatpush.bf16.msrb.mxu0 %v3278_v54  ;;  %v2401_v54 = vor.u32 %v3320_v49, %v2400_v48 }
  0x35   : > { %1063 = vmatpush.bf16.msrb.mxu1 %v3286_v55  ;;  %v2405_v55 = vor.u32 %v3318_v50, %v2402_v51 }
  0x36   : > { %1092 = vmatpush.bf16.msrb.mxu2 %v3294_v52  ;;  %v2393_v52 = vor.u32 %v3319_v45, %v2392_v44  ;;  %v2576_v44 = vld [vmem:[%s3611_s24 + $0x48] sm:$0xf]  ;;  %v3268_v45 = vld [vmem:[%s3611_s24 + $0x54] sm:$0xf0] }
  0x37   : > { %1121 = vmatpush.bf16.msrb.mxu3 %v3302_v53  ;;  %v2397_v53 = vor.u32 %v3317_v46, %v2394_v47  ;;  %v3266_v46 = vld [vmem:[%s3611_s24 + $0x4c] sm:$0xf]  ;;  %v2578_v47 = vld [vmem:[%s3611_s24 + $0x58] sm:$0xf0]  ;;  %v2577_v50 = vor.u32 %v3268_v45, %v2576_v44  ;;  %v3359_v44 = vld [vmem:[%s3611_s24 + $0x3c] sm:$0xf0] }
  0x38   : > { %1035 = vmatpush.bf16.msrb.mxu0 %v3277_v2  ;;  %v3257_v2 = vld [vmem:[%s3611_s24 + $0x4] sm:$0xf]  ;;  %v2581_v51 = vor.u32 %v3266_v46, %v2578_v47  ;;  %v3443_v45 = vld [vmem:[%s4162_s1 + $0x3d0] sm:$0xff] }
  0x39   : > { %1064 = vmatpush.bf16.msrb.mxu1 %v3285_v3  ;;  %v2538_v3 = vld [vmem:[%s3611_s24 + $0x10] sm:$0xf0]  ;;  %v2810_v47 = vld [vmem:[%s3611_s24 + $0x40] sm:$0xf0] }
  0x3a   : > { %1093 = vmatpush.bf16.msrb.mxu2 %v3293_v57  ;;  %v3398_v57 = vld [vmem:[%s4162_s1 + $0x2e8] sm:$0xff]  ;;  %v3357_v46 = vld [vmem:[%s3611_s24 + $0x34] sm:$0xf] }
  0x3b   : > { %1122 = vmatpush.bf16.msrb.mxu3 %v3301_v58  ;;  %657 = vmatmul.bf16.gmra.mxu0 %v2361_v6  ;;  %v3374_v58 = vld [vmem:[%s4162_s1 + $0x228] sm:$0xff] }
  0x3c   : > { %686 = vmatmul.bf16.gmra.mxu1 %v2365_v7  ;;  %1036 = vmatpush.bf16.msrb.mxu0 %v3276_v10  ;;  %v3258_v6 = vld [vmem:[%s3611_s24 + $0xc] sm:$0xf]  ;;  %v2546_v7 = vld [vmem:[%s3611_s24 + $0x18] sm:$0xf0] }
  0x3d   : > { %715 = vmatmul.bf16.gmra.mxu2 %v2369_v8  ;;  %1065 = vmatpush.bf16.msrb.mxu1 %v3284_v11  ;;  %v2537_v8 = vor.u32 %v3259_v1, %v2536_v0  ;;  %v2549_v11 = vor.u32 %v3258_v6, %v2546_v7  ;;  %v3270_v0 = vld [vmem:[%s3611_s24 + $0x6c] sm:$0xf]  ;;  %v2594_v1 = vld [vmem:[%s3611_s24 + $0x78] sm:$0xf0]  ;;  %v3423_v6 = vld [vmem:[%s4162_s1 + $0x330] sm:$0xff] }
  0x3e   : > { %1094 = vmatpush.bf16.msrb.mxu2 %v3292_v4  ;;  %744 = vmatmul.bf16.gmra.mxu3 %v2373_v9  ;;  %v2544_v4 = vld [vmem:[%s3611_s24 + $0x8] sm:$0xf]  ;;  %v2541_v9 = vor.u32 %v3257_v2, %v2538_v3  ;;  %v3431_v7 = vld [vmem:[%s4162_s1 + $0x370] sm:$0xff] }
  0x3f   : > { %1123 = vmatpush.bf16.msrb.mxu3 %v3300_v5  ;;  %v3260_v5 = vld [vmem:[%s3611_s24 + $0x14] sm:$0xf0] }
  0x40   : > { %1037 = vmatpush.bf16.msrb.mxu0 %v3275_v14  ;;  %v2545_v10 = vor.u32 %v3260_v5, %v2544_v4  ;;  %v3372_v14 = vld [vmem:[%s4162_s1 + $0x218] sm:$0xff]  ;;  %v2597_v5 = vor.u32 %v3270_v0, %v2594_v1  ;;  %v3427_v0 = vld [vmem:[%s4162_s1 + $0x350] sm:$0xff]  ;;  %v3434_v1 = vld [vmem:[%s4162_s1 + $0x388] sm:$0xff] }
  0x41   : > { %1066 = vmatpush.bf16.msrb.mxu1 %v3283_v15  ;;  %v3380_v15 = vld [vmem:[%s4162_s1 + $0x258] sm:$0xff] }
  0x42   : > { %1095 = vmatpush.bf16.msrb.mxu2 %v3291_v12  ;;  %v3388_v12 = vld [vmem:[%s4162_s1 + $0x298] sm:$0xff] }
  0x43   : > { %1124 = vmatpush.bf16.msrb.mxu3 %v3299_v13  ;;  %v3396_v13 = vld [vmem:[%s4162_s1 + $0x2d8] sm:$0xff] }
  0x44   : > { %1038 = vmatpush.bf16.msrb.mxu0 %v3274_v18  ;;  %v3371_v18 = vld [vmem:[%s4162_s1 + $0x210] sm:$0xff] }
  0x45   : > { %1067 = vmatpush.bf16.msrb.mxu1 %v3282_v19  ;;  %v3379_v19 = vld [vmem:[%s4162_s1 + $0x250] sm:$0xff] }
  0x46   : > { %1096 = vmatpush.bf16.msrb.mxu2 %v3290_v16  ;;  %v3387_v16 = vld [vmem:[%s4162_s1 + $0x290] sm:$0xff] }
  0x47   : > { %1125 = vmatpush.bf16.msrb.mxu3 %v3298_v17  ;;  %v3395_v17 = vld [vmem:[%s4162_s1 + $0x2d0] sm:$0xff] }
  0x48   : > { %1039 = vmatpush.bf16.msrb.mxu0 %v3273_v30  ;;  %v2561_v30 = vor.u32 %v3264_v25, %v2560_v24 }
  0x49   : > { %1068 = vmatpush.bf16.msrb.mxu1 %v3281_v31  ;;  %v2565_v31 = vor.u32 %v3262_v26, %v2562_v27 }
  0x4a   : > { %1097 = vmatpush.bf16.msrb.mxu2 %v3289_v21  ;;  %v3263_v21 = vld [vmem:[%s3611_s24 + $0x2c] sm:$0xf0] }
  0x4b   : > { %1126 = vmatpush.bf16.msrb.mxu3 %v3297_v22  ;;  %662 = vmatmul.bf16.gmra.mxu0 %v2377_v32  ;;  %v3261_v22 = vld [vmem:[%s3611_s24 + $0x24] sm:$0xf]  ;;  %v2553_v28 = vor.u32 %v3263_v21, %v2552_v20  ;;  %v3386_v32 = vld [vmem:[%s4162_s1 + $0x288] sm:$0xff]  ;;  %v3354_v20 = vld [vmem:[%s3611_s24 + $0x1c] sm:$0xf] }
  0x4c   : > { %691 = vmatmul.bf16.gmra.mxu1 %v2381_v33  ;;  %1501 = vmatpush.bf16.msra.mxu0 %v3376_v38  ;;  %v2557_v29 = vor.u32 %v3261_v22, %v2554_v23  ;;  %v3394_v33 = vld [vmem:[%s4162_s1 + $0x2c8] sm:$0xff]  ;;  %v3369_v38 = vld [vmem:[%s4162_s1 + $0x200] sm:$0xff] }
  0x4d   : > { %720 = vmatmul.bf16.gmra.mxu2 %v2385_v34  ;;  %1530 = vmatpush.bf16.msra.mxu1 %v3384_v39  ;;  %v3370_v34 = vld [vmem:[%s4162_s1 + $0x208] sm:$0xff]  ;;  %v3377_v39 = vld [vmem:[%s4162_s1 + $0x240] sm:$0xff] }
  0x4e   : > { %749 = vmatmul.bf16.gmra.mxu3 %v2389_v35  ;;  %1559 = vmatpush.bf16.msra.mxu2 %v3392_v36  ;;  %v3378_v35 = vld [vmem:[%s4162_s1 + $0x248] sm:$0xff]  ;;  %v3385_v36 = vld [vmem:[%s4162_s1 + $0x280] sm:$0xff] }
  0x4f   : > { %1588 = vmatpush.bf16.msra.mxu3 %v3400_v37  ;;  %v3393_v37 = vld [vmem:[%s4162_s1 + $0x2c0] sm:$0xff]  ;;  %v2802_v21 = vld [vmem:[%s3611_s24 + $0x28] sm:$0xf0] }
  0x50   : > { %1502 = vmatpush.bf16.msra.mxu0 %v3375_v42  ;;  %v3265_v42 = vld [vmem:[%s3611_s24 + $0x44] sm:$0xf]  ;;  %v2805_v27 = vor.u32 %v3354_v20, %v2802_v21  ;;  %v3362_v20 = vld [vmem:[%s3611_s24 + $0x5c] sm:$0xf]  ;;  %v2834_v21 = vld [vmem:[%s3611_s24 + $0x68] sm:$0xf0] }
  0x51   : > { %1531 = vmatpush.bf16.msra.mxu1 %v3383_v43  ;;  %v2570_v43 = vld [vmem:[%s3611_s24 + $0x50] sm:$0xf0] }
  0x52   : > { %1560 = vmatpush.bf16.msra.mxu2 %v3391_v40  ;;  %v2568_v40 = vld [vmem:[%s3611_s24 + $0x40] sm:$0xf]  ;;  %v2573_v49 = vor.u32 %v3265_v42, %v2570_v43  ;;  %v3435_v42 = vld [vmem:[%s4162_s1 + $0x390] sm:$0xff] }
  0x53   : > { %1589 = vmatpush.bf16.msra.mxu3 %v3399_v41  ;;  %v3267_v41 = vld [vmem:[%s3611_s24 + $0x4c] sm:$0xf0] }
  0x54   : > { %1503 = vmatpush.bf16.msra.mxu0 %v3374_v58  ;;  %v2569_v48 = vor.u32 %v3267_v41, %v2568_v40  ;;  %v3271_v58 = vld [vmem:[%s3611_s24 + $0x6c] sm:$0xf0]  ;;  %v3420_v40 = vld [vmem:[%s4162_s1 + $0x318] sm:$0xff] }
  0x55   : > { %1532 = vmatpush.bf16.msra.mxu1 %v3382_v59  ;;  %v3447_v59 = vld [vmem:[%s4162_s1 + $0x3f0] sm:$0xff]  ;;  %v3428_v41 = vld [vmem:[%s4162_s1 + $0x358] sm:$0xff] }
  0x56   : > { %1561 = vmatpush.bf16.msra.mxu2 %v3390_v56  ;;  %v3439_v56 = vld [vmem:[%s4162_s1 + $0x3b0] sm:$0xff] }
  0x57   : > { %1590 = vmatpush.bf16.msra.mxu3 %v3398_v57  ;;  %v2584_v57 = vld [vmem:[%s3611_s24 + $0x60] sm:$0xf]  ;;  %v2808_v43 = vld [vmem:[%s3611_s24 + $0x30] sm:$0xf] }
  0x58   : > { %1504 = vmatpush.bf16.msra.mxu0 %v3373_v62  ;;  %v2592_v62 = vld [vmem:[%s3611_s24 + $0x68] sm:$0xf]  ;;  %v2585_v2 = vor.u32 %v3271_v58, %v2584_v57 }
  0x59   : > { %1533 = vmatpush.bf16.msra.mxu1 %v3381_v63  ;;  %v3272_v63 = vld [vmem:[%s3611_s24 + $0x74] sm:$0xf0] }
  0x5a   : > { %1562 = vmatpush.bf16.msra.mxu2 %v3389_v60  ;;  %v3269_v60 = vld [vmem:[%s3611_s24 + $0x64] sm:$0xf]  ;;  %v2593_v4 = vor.u32 %v3272_v63, %v2592_v62  ;;  %v3419_v63 = vld [vmem:[%s4162_s1 + $0x310] sm:$0xff] }
  0x5b   : > { %667 = vmatmul.bf16.gmra.mxu0 %v2393_v52  ;;  %1591 = vmatpush.bf16.msra.mxu3 %v3397_v61  ;;  %v3440_v52 = vld [vmem:[%s4162_s1 + $0x3b8] sm:$0xff]  ;;  %v2586_v61 = vld [vmem:[%s3611_s24 + $0x70] sm:$0xf0] }
  0x5c   : > { %696 = vmatmul.bf16.gmra.mxu1 %v2397_v53  ;;  %1505 = vmatpush.bf16.msra.mxu0 %v3372_v14  ;;  %v3448_v53 = vld [vmem:[%s4162_s1 + $0x3f8] sm:$0xff]  ;;  %v2589_v3 = vor.u32 %v3269_v60, %v2586_v61  ;;  %v3355_v14 = vld [vmem:[%s3611_s24 + $0x1c] sm:$0xf0] }
  0x5d   : > { %725 = vmatmul.bf16.gmra.mxu2 %v2401_v54  ;;  %1534 = vmatpush.bf16.msra.mxu1 %v3380_v15  ;;  %v3424_v54 = vld [vmem:[%s4162_s1 + $0x338] sm:$0xff]  ;;  %v3445_v15 = vld [vmem:[%s4162_s1 + $0x3e0] sm:$0xff] }
  0x5e   : > { %754 = vmatmul.bf16.gmra.mxu3 %v2405_v55  ;;  %1563 = vmatpush.bf16.msra.mxu2 %v3388_v12  ;;  %v3432_v55 = vld [vmem:[%s4162_s1 + $0x378] sm:$0xff]  ;;  %v3437_v12 = vld [vmem:[%s4162_s1 + $0x3a0] sm:$0xff] }
  0x5f   : > { %1592 = vmatpush.bf16.msra.mxu3 %v3396_v13  ;;  %v2792_v13 = vld [vmem:[%s3611_s24 + $0x10] sm:$0xf] }
  0x60   : > { %1506 = vmatpush.bf16.msra.mxu0 %v3371_v18  ;;  %v2800_v18 = vld [vmem:[%s3611_s24 + $0x18] sm:$0xf]  ;;  %v2793_v22 = vor.u32 %v3355_v14, %v2792_v13  ;;  %v2824_v13 = vld [vmem:[%s3611_s24 + $0x50] sm:$0xf]  ;;  %v3363_v14 = vld [vmem:[%s3611_s24 + $0x5c] sm:$0xf0] }
  0x61   : > { %1535 = vmatpush.bf16.msra.mxu1 %v3379_v19  ;;  %v3356_v19 = vld [vmem:[%s3611_s24 + $0x24] sm:$0xf0] }
  0x62   : > { %1564 = vmatpush.bf16.msra.mxu2 %v3387_v16  ;;  %v3353_v16 = vld [vmem:[%s3611_s24 + $0x14] sm:$0xf]  ;;  %v2801_v26 = vor.u32 %v3356_v19, %v2800_v18  ;;  %v2832_v18 = vld [vmem:[%s3611_s24 + $0x58] sm:$0xf]  ;;  %v3364_v19 = vld [vmem:[%s3611_s24 + $0x64] sm:$0xf0] }
  0x63   : > { %1593 = vmatpush.bf16.msra.mxu3 %v3395_v17  ;;  %v2794_v17 = vld [vmem:[%s3611_s24 + $0x20] sm:$0xf0] }
  0x64   : > { %1507 = vmatpush.bf16.msra.mxu0 %v3370_v34  ;;  %v2797_v23 = vor.u32 %v3353_v16, %v2794_v17  ;;  %v3361_v16 = vld [vmem:[%s3611_s24 + $0x54] sm:$0xf]  ;;  %v2826_v17 = vld [vmem:[%s3611_s24 + $0x60] sm:$0xf0] }
  0x65   : > { %1536 = vmatpush.bf16.msra.mxu1 %v3378_v35 }
  0x66   : > { %1565 = vmatpush.bf16.msra.mxu2 %v3386_v32  ;;  %v3444_v32 = vld [vmem:[%s4162_s1 + $0x3d8] sm:$0xff] }
  0x67   : > { %1594 = vmatpush.bf16.msra.mxu3 %v3394_v33 }
  0x68   : > { %1508 = vmatpush.bf16.msra.mxu0 %v3369_v38 }
  0x69   : > { %1537 = vmatpush.bf16.msra.mxu1 %v3377_v39 }
  0x6a   : > { %1566 = vmatpush.bf16.msra.mxu2 %v3385_v36 }
  0x6b   : > { %1040 = vmatmul.bf16.vlgmr.msrb.gmra.mxu0 %v2537_v8  ;;  %1595 = vmatpush.bf16.msra.mxu3 %v3393_v37  ;;  %v3438_v8 = vld [vmem:[%s4162_s1 + $0x3a8] sm:$0xff] }
  0x6c   : > { %1069 = vmatmul.bf16.vlgmr.msrb.gmra.mxu1 %v2541_v9  ;;  %1978 = vmatpush.bf16.msrb.mxu0 %v3424_v54  ;;  %v3446_v9 = vld [vmem:[%s4162_s1 + $0x3e8] sm:$0xff]  ;;  %v2809_v54 = vor.u32 %v3359_v44, %v2808_v43  ;;  %v2840_v43 = vld [vmem:[%s3611_s24 + $0x70] sm:$0xf]  ;;  %v3367_v44 = vld [vmem:[%s3611_s24 + $0x7c] sm:$0xf0] }
  0x6d   : > { %1098 = vmatmul.bf16.vlgmr.msrb.gmra.mxu2 %v2545_v10  ;;  %2007 = vmatpush.bf16.msrb.mxu1 %v3432_v55  ;;  %v3422_v10 = vld [vmem:[%s4162_s1 + $0x328] sm:$0xff]  ;;  %v2813_v55 = vor.u32 %v3357_v46, %v2810_v47  ;;  %v2842_v46 = vld [vmem:[%s3611_s24 + $0x80] sm:$0xf0]  ;;  %v2848_v47 = vld [vmem:[%s3611_s24 + $0x78] sm:$0xf] }
  0x6e   : > { %1127 = vmatmul.bf16.vlgmr.msrb.gmra.mxu3 %v2549_v11  ;;  %2036 = vmatpush.bf16.msrb.mxu2 %v3440_v52  ;;  %v3430_v11 = vld [vmem:[%s4162_s1 + $0x368] sm:$0xff] }
  0x6f   : > { %2065 = vmatpush.bf16.msrb.mxu3 %v3448_v53 }
  0x70   : > { %1979 = vmatpush.bf16.msrb.mxu0 %v3423_v6 }
  0x71   : > { %2008 = vmatpush.bf16.msrb.mxu1 %v3431_v7 }
  0x72   : > { %2037 = vmatpush.bf16.msrb.mxu2 %v3439_v56 }
  0x73   : > { %2066 = vmatpush.bf16.msrb.mxu3 %v3447_v59 }
  0x74   : > { %1980 = vmatpush.bf16.msrb.mxu0 %v3422_v10  ;;  %v3418_v10 = vld [vmem:[%s4162_s1 + $0x308] sm:$0xff] }
  0x75   : > { %2009 = vmatpush.bf16.msrb.mxu1 %v3430_v11  ;;  %v3426_v11 = vld [vmem:[%s4162_s1 + $0x348] sm:$0xff] }
  0x76   : > { %2038 = vmatpush.bf16.msrb.mxu2 %v3438_v8 }
  0x77   : > { %2067 = vmatpush.bf16.msrb.mxu3 %v3446_v9 }
  0x7a   : > { %2039 = vmatpush.bf16.msrb.mxu2 %v3437_v12  ;;  %v3433_v12 = vld [vmem:[%s4162_s1 + $0x380] sm:$0xff] }
  0x7b   : > { %1045 = vmatmul.bf16.gmra.mxu0 %v2553_v28  ;;  %2068 = vmatpush.bf16.msrb.mxu3 %v3445_v15  ;;  %v3441_v15 = vld [vmem:[%s4162_s1 + $0x3c0] sm:$0xff] }
  0x7c   : > { %1074 = vmatmul.bf16.gmra.mxu1 %v2557_v29  ;;  %v3421_v29 = vld [vmem:[%s4162_s1 + $0x320] sm:$0xff] }
  0x7d   : > { %1103 = vmatmul.bf16.gmra.mxu2 %v2561_v30  ;;  %v3429_v30 = vld [vmem:[%s4162_s1 + $0x360] sm:$0xff]  ;;  %1981 = vmatpush.bf16.msrb.mxu0 %v3421_v29 }
  0x7e   : > { %1132 = vmatmul.bf16.gmra.mxu3 %v2565_v31  ;;  %v3436_v31 = vld [vmem:[%s4162_s1 + $0x398] sm:$0xff]  ;;  %2010 = vmatpush.bf16.msrb.mxu1 %v3429_v30 }
  0x7f   : > { %2040 = vmatpush.bf16.msrb.mxu2 %v3436_v31  ;;  %2069 = vmatpush.bf16.msrb.mxu3 %v3444_v32  ;;  %v2833_v31 = vor.u32 %v3364_v19, %v2832_v18  ;;  %v2837_v32 = vor.u32 %v3362_v20, %v2834_v21 }
  0x81   : > { %1982 = vmatpush.bf16.msrb.mxu0 %v3420_v40 }
  0x82   : > { %2011 = vmatpush.bf16.msrb.mxu1 %v3428_v41 }
  0x83   : > { %2041 = vmatpush.bf16.msrb.mxu2 %v3435_v42  ;;  %2070 = vmatpush.bf16.msrb.mxu3 %v3443_v45  ;;  %v3365_v45 = vld [vmem:[%s3611_s24 + $0x74] sm:$0xf] }
  0x85   : > { %1983 = vmatpush.bf16.msrb.mxu0 %v3419_v63 }
  0x86   : > { %2012 = vmatpush.bf16.msrb.mxu1 %v3427_v0 }
  0x87   : > { %2042 = vmatpush.bf16.msrb.mxu2 %v3434_v1 }
  0x89   : > { %1984 = vmatpush.bf16.msrb.mxu0 %v3418_v10  ;;  %v3066_v10 = vld [vmem:[%s3611_s24 + $0xb0] sm:$0xf0] }
  0x8a   : > { %2013 = vmatpush.bf16.msrb.mxu1 %v3426_v11  ;;  %v3072_v11 = vld [vmem:[%s3611_s24 + $0xa8] sm:$0xf] }
  0x8b   : > { %1050 = vmatmul.bf16.gmra.mxu0 %v2569_v48  ;;  %v2816_v48 = vld [vmem:[%s3611_s24 + $0x38] sm:$0xf]  ;;  %2043 = vmatpush.bf16.msrb.mxu2 %v3433_v12 }
  0x8c   : > { %1079 = vmatmul.bf16.gmra.mxu1 %v2573_v49  ;;  %v3360_v49 = vld [vmem:[%s3611_s24 + $0x44] sm:$0xf0]  ;;  %v3404_v12 = vld [vmem:[%s3611_s24 + $0xb4] sm:$0xf0] }
  0x8d   : > { %1108 = vmatmul.bf16.gmra.mxu2 %v2577_v50  ;;  %v3358_v50 = vld [vmem:[%s3611_s24 + $0x3c] sm:$0xf]  ;;  %v2817_v59 = vor.u32 %v3360_v49, %v2816_v48  ;;  %v3368_v48 = vld [vmem:[%s3611_s24 + $0x84] sm:$0xf0] }
  0x8e   : > { %1137 = vmatmul.bf16.gmra.mxu3 %v2581_v51  ;;  %v2818_v51 = vld [vmem:[%s3611_s24 + $0x48] sm:$0xf0]  ;;  %v3366_v49 = vld [vmem:[%s3611_s24 + $0x7c] sm:$0xf] }
  0x8f   : > { %v2821_v60 = vor.u32 %v3358_v50, %v2818_v51  ;;  %v2850_v50 = vld [vmem:[%s3611_s24 + $0x88] sm:$0xf0] }
  0x9b   : > { %1055 = vmatmul.bf16.gmra.mxu0 %v2585_v2  ;;  %v3442_v2 = vld [vmem:[%s4162_s1 + $0x3c8] sm:$0xff] }
  0x9c   : > { %1084 = vmatmul.bf16.gmra.mxu1 %v2589_v3  ;;  %2071 = vmatpush.bf16.msrb.mxu3 %v3442_v2 }
  0x9d   : > { %1113 = vmatmul.bf16.gmra.mxu2 %v2593_v4 }
  0x9e   : > { %1142 = vmatmul.bf16.gmra.mxu3 %v2597_v5 }
  0xa0   : > { %2072 = vmatpush.bf16.msrb.mxu3 %v3441_v15 }
  0xa8   : > { %v653_v24 = vpop.f32.mrf.mxu0 }
  0xa9   : > { %v682_v25 = vpop.f32.mrf.mxu1 }
  0xaa   : > { %v683_v28 = vadd.f32 %v682_v25, %v653_v24  ;;  %v2825_v24 = vor.u32 %v3363_v14, %v2824_v13  ;;  %v2829_v25 = vor.u32 %v3361_v16, %v2826_v17  ;;  %v3402_v13 = vld [vmem:[%s3611_s24 + $0xac] sm:$0xf]  ;;  %v3074_v14 = vld [vmem:[%s3611_s24 + $0xb8] sm:$0xf0] }
  0xab   : > { %1509 = vmatmul.bf16.vlgmr.msra.gmra.mxu0 %v2793_v22 }
  0xac   : > { %1538 = vmatmul.bf16.vlgmr.msra.gmra.mxu1 %v2797_v23 }
  0xad   : > { %1567 = vmatmul.bf16.vlgmr.msra.gmra.mxu2 %v2801_v26  ;;  %v3417_v26 = vld [vmem:[%s4162_s1 + $0x300] sm:$0xff] }
  0xae   : > { %1596 = vmatmul.bf16.vlgmr.msra.gmra.mxu3 %v2805_v27  ;;  %v3425_v27 = vld [vmem:[%s4162_s1 + $0x340] sm:$0xff]  ;;  %1985 = vmatpush.bf16.msrb.mxu0 %v3417_v26 }
  0xaf   : > { %2014 = vmatpush.bf16.msrb.mxu1 %v3425_v27 }
  0xb0   : > { %v711_v33 = vpop.f32.mrf.mxu2  ;;  %v655_v36 = vpop.f32.mrf.mxu0 }
  0xb1   : > { %v740_v34 = vpop.f32.mrf.mxu3  ;;  %v712_v35 = vadd.f32 %v711_v33, %v683_v28  ;;  %v684_v37 = vpop.f32.mrf.mxu1 }
  0xb2   : > { %v685_v38 = vadd.f32 %v684_v37, %v655_v36 }
  0xb3   : > { %v3949_v39 = vadd.f32 %v740_v34, %v712_v35 }
  0xb8   : > { %v713_v52 = vpop.f32.mrf.mxu2  ;;  %v658_v57 = vpop.f32.mrf.mxu0 }
  0xb9   : > { %v742_v53 = vpop.f32.mrf.mxu3  ;;  %v714_v56 = vadd.f32 %v713_v52, %v685_v38  ;;  %v687_v58 = vpop.f32.mrf.mxu1 }
  0xba   : > { %v688_v61 = vadd.f32 %v687_v58, %v658_v57  ;;  %v2849_v58 = vor.u32 %v3368_v48, %v2848_v47 }
  0xbb   : > { %v3971_v62 = vadd.f32 %v742_v53, %v714_v56  ;;  %1514 = vmatmul.bf16.gmra.mxu0 %v2809_v54  ;;  %v2841_v53 = vor.u32 %v3367_v44, %v2840_v43  ;;  %v2845_v54 = vor.u32 %v3365_v45, %v2842_v46  ;;  %v3406_v43 = vld [vmem:[%s3611_s24 + $0xcc] sm:$0xf]  ;;  %v3090_v44 = vld [vmem:[%s3611_s24 + $0xd8] sm:$0xf0] }
  0xbc   : > { %1543 = vmatmul.bf16.gmra.mxu1 %v2813_v55 }
  0xbd   : > { %1572 = vmatmul.bf16.gmra.mxu2 %v2817_v59  ;;  %v2853_v59 = vor.u32 %v3366_v49, %v2850_v50 }
  0xbe   : > { %1601 = vmatmul.bf16.gmra.mxu3 %v2821_v60 }
  0xc0   : > { %v716_v3 = vpop.f32.mrf.mxu2  ;;  %v660_v6 = vpop.f32.mrf.mxu0 }
  0xc1   : > { %v745_v4 = vpop.f32.mrf.mxu3  ;;  %v717_v5 = vadd.f32 %v716_v3, %v688_v61  ;;  %v689_v7 = vpop.f32.mrf.mxu1 }
  0xc2   : > { %v690_v8 = vadd.f32 %v689_v7, %v660_v6  ;;  %v3064_v6 = vld [vmem:[%s3611_s24 + $0xa0] sm:$0xf]  ;;  %v3403_v7 = vld [vmem:[%s3611_s24 + $0xac] sm:$0xf0] }
  0xc3   : > { %v3985_v9 = vadd.f32 %v745_v4, %v717_v5  ;;  %v3065_v17 = vor.u32 %v3403_v7, %v3064_v6  ;;  %v3104_v6 = vld [vmem:[%s3611_s24 + $0xe8] sm:$0xf]  ;;  %v3412_v7 = vld [vmem:[%s3611_s24 + $0xf4] sm:$0xf0] }
  0xc8   : > { %v718_v22 = vpop.f32.mrf.mxu2  ;;  %v663_v29 = vpop.f32.mrf.mxu0 }
  0xc9   : > { %v747_v23 = vpop.f32.mrf.mxu3  ;;  %v719_v28 = vadd.f32 %v718_v22, %v690_v8  ;;  %v692_v30 = vpop.f32.mrf.mxu1  ;;  %v3401_v8 = vld [vmem:[%s3611_s24 + $0xa4] sm:$0xf]  ;;  %v3073_v22 = vor.u32 %v3404_v12, %v3072_v11 }
  0xca   : > { %v693_v33 = vadd.f32 %v692_v30, %v663_v29  ;;  %v3069_v18 = vor.u32 %v3401_v8, %v3066_v10  ;;  %v3410_v8 = vld [vmem:[%s3611_s24 + $0xec] sm:$0xf]  ;;  %v3106_v10 = vld [vmem:[%s3611_s24 + $0xf8] sm:$0xf0] }
  0xcb   : > { %v4013_v34 = vadd.f32 %v747_v23, %v719_v28  ;;  %1519 = vmatmul.bf16.gmra.mxu0 %v2825_v24  ;;  %v3077_v23 = vor.u32 %v3402_v13, %v3074_v14 }
  0xcc   : > { %1548 = vmatmul.bf16.gmra.mxu1 %v2829_v25 }
  0xcd   : > { %1577 = vmatmul.bf16.gmra.mxu2 %v2833_v31 }
  0xce   : > { %1606 = vmatmul.bf16.gmra.mxu3 %v2837_v32 }
  0xd0   : > { %v721_v35 = vpop.f32.mrf.mxu2  ;;  %v665_v38 = vpop.f32.mrf.mxu0 }
  0xd1   : > { %v750_v36 = vpop.f32.mrf.mxu3  ;;  %v722_v37 = vadd.f32 %v721_v35, %v693_v33  ;;  %v694_v40 = vpop.f32.mrf.mxu1  ;;  %v3080_v35 = vld [vmem:[%s3611_s24 + $0xc0] sm:$0xf] }
  0xd2   : > { %v695_v41 = vadd.f32 %v694_v40, %v665_v38  ;;  %v3082_v38 = vld [vmem:[%s3611_s24 + $0xd0] sm:$0xf0]  ;;  %v3088_v40 = vld [vmem:[%s3611_s24 + $0xc8] sm:$0xf] }
  0xd3   : > { %v4015_v42 = vadd.f32 %v750_v36, %v722_v37  ;;  %v3407_v36 = vld [vmem:[%s3611_s24 + $0xcc] sm:$0xf0]  ;;  %v3405_v37 = vld [vmem:[%s3611_s24 + $0xc4] sm:$0xf] }
  0xd4   : > { %v3081_v47 = vor.u32 %v3407_v36, %v3080_v35  ;;  %v3085_v48 = vor.u32 %v3405_v37, %v3082_v38  ;;  %v3120_v35 = vld [vmem:[%s3611_s24 + $0x108] sm:$0xf]  ;;  %v3416_v36 = vld [vmem:[%s3611_s24 + $0x114] sm:$0xf0]  ;;  %v3414_v37 = vld [vmem:[%s3611_s24 + $0x10c] sm:$0xf] }
  0xd5   : > { %v3122_v38 = vld [vmem:[%s3611_s24 + $0x118] sm:$0xf0] }
  0xd8   : > { %v723_v51 = vpop.f32.mrf.mxu2  ;;  %v668_v56 = vpop.f32.mrf.mxu0 }
  0xd9   : > { %v752_v52 = vpop.f32.mrf.mxu3  ;;  %v724_v55 = vadd.f32 %v723_v51, %v695_v41  ;;  %v697_v57 = vpop.f32.mrf.mxu1  ;;  %v3408_v41 = vld [vmem:[%s3611_s24 + $0xd4] sm:$0xf0] }
  0xda   : > { %v698_v60 = vadd.f32 %v697_v57, %v668_v56 }
  0xdb   : > { %v4025_v61 = vadd.f32 %v752_v52, %v724_v55  ;;  %1524 = vmatmul.bf16.gmra.mxu0 %v2841_v53  ;;  %v3089_v52 = vor.u32 %v3408_v41, %v3088_v40 }
  0xdc   : > { %1553 = vmatmul.bf16.gmra.mxu1 %v2845_v54 }
  0xdd   : > { %1582 = vmatmul.bf16.gmra.mxu2 %v2849_v58 }
  0xde   : > { %1611 = vmatmul.bf16.gmra.mxu3 %v2853_v59 }
  0xe0   : > { %v726_v63 = vpop.f32.mrf.mxu2  ;;  %v670_v2 = vpop.f32.mrf.mxu0 }
  0xe1   : > { %v755_v0 = vpop.f32.mrf.mxu3  ;;  %v727_v1 = vadd.f32 %v726_v63, %v698_v60  ;;  %v699_v3 = vpop.f32.mrf.mxu1 }
  0xe2   : > { %v700_v4 = vadd.f32 %v699_v3, %v670_v2  ;;  %v3411_v2 = vld [vmem:[%s3611_s24 + $0xec] sm:$0xf0]  ;;  %v3409_v3 = vld [vmem:[%s3611_s24 + $0xe4] sm:$0xf] }
  0xe3   : > { %v4027_v5 = vadd.f32 %v755_v0, %v727_v1  ;;  %v3096_v1 = vld [vmem:[%s3611_s24 + $0xe0] sm:$0xf] }
  0xe4   : > { %v3097_v13 = vor.u32 %v3411_v2, %v3096_v1 }
  0xe8   : > { %v728_v15 = vpop.f32.mrf.mxu2  ;;  %v1041_v20 = vpop.f32.mrf.mxu0 }
  0xe9   : > { %v757_v16 = vpop.f32.mrf.mxu3  ;;  %v729_v19 = vadd.f32 %v728_v15, %v700_v4  ;;  %v1070_v21 = vpop.f32.mrf.mxu1  ;;  %v1042_v24 = vadd.f32 %v1041_v20, %v3949_v39  ;;  %v3098_v4 = vld [vmem:[%s3611_s24 + $0xf0] sm:$0xf0] }
  0xea   : > { %v3101_v14 = vor.u32 %v3409_v3, %v3098_v4 }
  0xeb   : > { %v4038_v25 = vadd.f32 %v757_v16, %v729_v19  ;;  %v1071_v26 = vadd.f32 %v1070_v21, %v1042_v24  ;;  %1986 = vmatmul.bf16.vlgmr.msrb.gmra.mxu0 %v3065_v17 }
  0xec   : > { %2015 = vmatmul.bf16.vlgmr.msrb.gmra.mxu1 %v3069_v18  ;;  %v3105_v18 = vor.u32 %v3412_v7, %v3104_v6 }
  0xed   : > { %2044 = vmatmul.bf16.vlgmr.msrb.gmra.mxu2 %v3073_v22 }
  0xee   : > { %2073 = vmatmul.bf16.vlgmr.msrb.gmra.mxu3 %v3077_v23 }
  0xf0   : > { %v1099_v27 = vpop.f32.mrf.mxu2  ;;  %v1043_v30 = vpop.f32.mrf.mxu0 }
  0xf1   : > { %v1128_v28 = vpop.f32.mrf.mxu3  ;;  %v1100_v29 = vadd.f32 %v1099_v27, %v1071_v26  ;;  %v1072_v31 = vpop.f32.mrf.mxu1  ;;  %v1044_v39 = vadd.f32 %v1043_v30, %v3971_v62  ;;  %v3093_v62 = vor.u32 %v3406_v43, %v3090_v44  ;;  %v3112_v30 = vld [vmem:[%s3611_s24 + $0x100] sm:$0xf] }
  0xf3   : > { %v4041_v32 = vadd.f32 %v1128_v28, %v1100_v29  ;;  %v1073_v33 = vadd.f32 %v1072_v31, %v1044_v39  ;;  %v3415_v31 = vld [vmem:[%s3611_s24 + $0x10c] sm:$0xf0]  ;;  %v3413_v39 = vld [vmem:[%s3611_s24 + $0x104] sm:$0xf] }
  0xf4   : > { %v3113_v43 = vor.u32 %v3415_v31, %v3112_v30 }
  0xf8   : > { %v1101_v45 = vpop.f32.mrf.mxu2  ;;  %v1046_v50 = vpop.f32.mrf.mxu0 }
  0xf9   : > { %v1130_v46 = vpop.f32.mrf.mxu3  ;;  %v1102_v49 = vadd.f32 %v1101_v45, %v1073_v33  ;;  %v1075_v51 = vpop.f32.mrf.mxu1  ;;  %v1047_v53 = vadd.f32 %v1046_v50, %v3985_v9  ;;  %v3114_v33 = vld [vmem:[%s3611_s24 + $0x110] sm:$0xf0] }
  0xfa   : > { %v3117_v44 = vor.u32 %v3413_v39, %v3114_v33 }
  0xfb   : > { %v4052_v54 = vadd.f32 %v1130_v46, %v1102_v49  ;;  %v1076_v55 = vadd.f32 %v1075_v51, %v1047_v53  ;;  %1991 = vmatmul.bf16.gmra.mxu0 %v3081_v47 }
  0xfc   : > { %2020 = vmatmul.bf16.gmra.mxu1 %v3085_v48  ;;  %v3121_v48 = vor.u32 %v3416_v36, %v3120_v35 }
  0xfd   : > { %2049 = vmatmul.bf16.gmra.mxu2 %v3089_v52 }
  0xfe   : > { %2078 = vmatmul.bf16.gmra.mxu3 %v3093_v62 }
 0x100   : > { %v1104_v56 = vpop.f32.mrf.mxu2  ;;  %v1048_v59 = vpop.f32.mrf.mxu0 }
 0x101   : > { %v1133_v57 = vpop.f32.mrf.mxu3  ;;  %v1105_v58 = vadd.f32 %v1104_v56, %v1076_v55  ;;  %v1077_v60 = vpop.f32.mrf.mxu1  ;;  %v1049_v9 = vadd.f32 %v1048_v59, %v4013_v34  ;;  %v3109_v34 = vor.u32 %v3410_v8, %v3106_v10 }
 0x103   : > { %v4055_v63 = vadd.f32 %v1133_v57, %v1105_v58  ;;  %v1078_v0 = vadd.f32 %v1077_v60, %v1049_v9 }
 0x108   : > { %v1106_v11 = vpop.f32.mrf.mxu2  ;;  %v1051_v16 = vpop.f32.mrf.mxu0 }
 0x109   : > { %v1135_v12 = vpop.f32.mrf.mxu3  ;;  %v1107_v15 = vadd.f32 %v1106_v11, %v1078_v0  ;;  %v1080_v17 = vpop.f32.mrf.mxu1  ;;  %v1052_v19 = vadd.f32 %v1051_v16, %v4015_v42 }
 0x10b   : > { %v4066_v20 = vadd.f32 %v1135_v12, %v1107_v15  ;;  %v1081_v21 = vadd.f32 %v1080_v17, %v1052_v19  ;;  %1996 = vmatmul.bf16.gmra.mxu0 %v3097_v13 }
 0x10c   : > { %2025 = vmatmul.bf16.gmra.mxu1 %v3101_v14 }
 0x10d   : > { %2054 = vmatmul.bf16.gmra.mxu2 %v3105_v18 }
 0x10e   : > { %2083 = vmatmul.bf16.gmra.mxu3 %v3109_v34 }
 0x110   : > { %v1109_v22 = vpop.f32.mrf.mxu2  ;;  %v1053_v26 = vpop.f32.mrf.mxu0 }
 0x111   : > { %v1138_v23 = vpop.f32.mrf.mxu3  ;;  %v1110_v24 = vadd.f32 %v1109_v22, %v1081_v21  ;;  %v1082_v27 = vpop.f32.mrf.mxu1  ;;  %v1054_v42 = vadd.f32 %v1053_v26, %v4025_v61  ;;  %v3125_v61 = vor.u32 %v3414_v37, %v3122_v38 }
 0x113   : > { %v4069_v28 = vadd.f32 %v1138_v23, %v1110_v24  ;;  %v1083_v29 = vadd.f32 %v1082_v27, %v1054_v42 }
 0x118   : > { %v1111_v40 = vpop.f32.mrf.mxu2  ;;  %v1056_v46 = vpop.f32.mrf.mxu0 }
 0x119   : > { %v1140_v41 = vpop.f32.mrf.mxu3  ;;  %v1112_v45 = vadd.f32 %v1111_v40, %v1083_v29  ;;  %v1085_v47 = vpop.f32.mrf.mxu1  ;;  %v1057_v49 = vadd.f32 %v1056_v46, %v4027_v5 }
 0x11b   : > { %v4080_v50 = vadd.f32 %v1140_v41, %v1112_v45  ;;  %v1086_v51 = vadd.f32 %v1085_v47, %v1057_v49  ;;  %2001 = vmatmul.bf16.gmra.mxu0 %v3113_v43 }
 0x11c   : > { %2030 = vmatmul.bf16.gmra.mxu1 %v3117_v44 }
 0x11d   : > { %2059 = vmatmul.bf16.gmra.mxu2 %v3121_v48 }
 0x11e   : > { %2088 = vmatmul.bf16.gmra.mxu3 %v3125_v61 }
 0x120   : > { %v1114_v52 = vpop.f32.mrf.mxu2  ;;  %v1058_v55 = vpop.f32.mrf.mxu0 }
 0x121   : > { %v1143_v62 = vpop.f32.mrf.mxu3  ;;  %v1115_v53 = vadd.f32 %v1114_v52, %v1086_v51  ;;  %v1087_v56 = vpop.f32.mrf.mxu1  ;;  %v1059_v57 = vadd.f32 %v1058_v55, %v4038_v25 }
 0x123   : > { %v1144_v58 = vadd.f32 %v1143_v62, %v1115_v53  ;;  %v1088_v59 = vadd.f32 %v1087_v56, %v1059_v57 }
 0x128   : > { %v1116_v60 = vpop.f32.mrf.mxu2  ;;  %v1510_v5 = vpop.f32.mrf.mxu0 }
 0x129   : > { %v1145_v9 = vpop.f32.mrf.mxu3  ;;  %v1117_v0 = vadd.f32 %v1116_v60, %v1088_v59  ;;  %v1539_v1 = vpop.f32.mrf.mxu1 }
 0x12a   : > { %v1540_v2 = vadd.f32 %v1539_v1, %v1510_v5 }
 0x12b   : > { %v4083_v3 = vadd.f32 %v1145_v9, %v1117_v0 }
 0x130   : > { %v1568_v4 = vpop.f32.mrf.mxu2  ;;  %v1512_v8 = vpop.f32.mrf.mxu0 }
 0x131   : > { %v1597_v6 = vpop.f32.mrf.mxu3  ;;  %v1569_v7 = vadd.f32 %v1568_v4, %v1540_v2  ;;  %v1541_v10 = vpop.f32.mrf.mxu1  ;;  %v4117_v2 = vld [vmem:[%s4163_s2] ss:$0 sm:$0xff] }
 0x132   : > { %v1542_v56 = vadd.f32 %v1541_v10, %v1512_v8 }
 0x133   : > { %v1598_v11 = vadd.f32 %v1597_v6, %v1569_v7 }
 0x135   : > { %v1617_v12 = vadd.f32 %v1598_v11, %v4041_v32 }
 0x138   : > { %v1570_v13 = vpop.f32.mrf.mxu2  ;;  %v1515_v14 = vpop.f32.mrf.mxu0 }
 0x139   : > { %v1599_v25 = vpop.f32.mrf.mxu3  ;;  %v1544_v15 = vpop.f32.mrf.mxu1  ;;  %v1571_v9 = vadd.f32 %v1570_v13, %v1542_v56 }
 0x13a   : > { %v1545_v16 = vadd.f32 %v1544_v15, %v1515_v14 }
 0x13b   : > { %v1600_v5 = vadd.f32 %v1599_v25, %v1571_v9 }
 0x13d   : > { %v1618_v8 = vadd.f32 %v1600_v5, %v4052_v54 }
 0x140   : > { %v1573_v17 = vpop.f32.mrf.mxu2  ;;  %v1517_v19 = vpop.f32.mrf.mxu0 }
 0x141   : > { %v1602_v18 = vpop.f32.mrf.mxu3  ;;  %v1574_v34 = vadd.f32 %v1573_v17, %v1545_v16  ;;  %v1546_v21 = vpop.f32.mrf.mxu1 }
 0x142   : > { %v1547_v16 = vadd.f32 %v1546_v21, %v1517_v19 }
 0x143   : > { %v1603_v22 = vadd.f32 %v1602_v18, %v1574_v34 }
 0x145   : > { %v4087_v23 = vadd.f32 %v1603_v22, %v4055_v63 }
 0x148   : > { %v4089_v24 = vpop.f32.mrf.mxu2  ;;  %v1520_v27 = vpop.f32.mrf.mxu0 }
 0x149   : > { %v4091_v26 = vpop.f32.mrf.mxu3  ;;  %v1549_v32 = vpop.f32.mrf.mxu1 }
 0x14a   : > { %v1550_v42 = vadd.f32 %v1549_v32, %v1520_v27 }
 0x150   : > { %v1578_v29 = vpop.f32.mrf.mxu2  ;;  %v4093_v39 = vpop.f32.mrf.mxu0 }
 0x151   : > { %v1607_v30 = vpop.f32.mrf.mxu3  ;;  %v1579_v31 = vadd.f32 %v1578_v29, %v1550_v42  ;;  %v4095_v33 = vpop.f32.mrf.mxu1 }
 0x153   : > { %v1608_v35 = vadd.f32 %v1607_v30, %v1579_v31  ;;  %v1576_v30 = vadd.f32 %v4089_v24, %v1547_v16 }
 0x155   : > { %v4098_v36 = vadd.f32 %v1608_v35, %v4069_v28  ;;  %v1605_v35 = vadd.f32 %v4091_v26, %v1576_v30  ;;  %v1552_v26 = vadd.f32 %v4095_v33, %v4093_v39 }
 0x158   : > { %v4100_v63 = vpop.f32.mrf.mxu2  ;;  %v1525_v38 = vpop.f32.mrf.mxu0 }
 0x159   : > { %v4102_v37 = vpop.f32.mrf.mxu3  ;;  %v1554_v40 = vpop.f32.mrf.mxu1 }
 0x15a   : > { %v1555_v41 = vadd.f32 %v1554_v40, %v1525_v38 }
 0x160   : > { %v1583_v43 = vpop.f32.mrf.mxu2  ;;  %v4104_v46 = vpop.f32.mrf.mxu0 }
 0x161   : > { %v1612_v44 = vpop.f32.mrf.mxu3  ;;  %v1584_v45 = vadd.f32 %v1583_v43, %v1555_v41  ;;  %v4106_v47 = vpop.f32.mrf.mxu1 }
 0x163   : > { %v1613_v48 = vadd.f32 %v1612_v44, %v1584_v45 }
 0x165   : > { %v4108_v61 = vadd.f32 %v1613_v48, %v1144_v58 }
 0x168   : > { %v4110_v49 = vpop.f32.mrf.mxu2  ;;  %v1987_v51 = vpop.f32.mrf.mxu0 }
 0x169   : > { %v4112_v28 = vpop.f32.mrf.mxu3  ;;  %v2016_v52 = vpop.f32.mrf.mxu1 }
 0x16a   : > { %v2017_v62 = vadd.f32 %v2016_v52, %v1987_v51 }
 0x170   : > { %v2045_v53 = vpop.f32.mrf.mxu2  ;;  %v1989_v59 = vpop.f32.mrf.mxu0 }
 0x171   : > { %v2074_v55 = vpop.f32.mrf.mxu3  ;;  %v2046_v57 = vadd.f32 %v2045_v53, %v2017_v62  ;;  %v2018_v60 = vpop.f32.mrf.mxu1  ;;  %v1620_v62 = vadd.f32 %v1605_v35, %v4066_v20  ;;  %v1581_v20 = vadd.f32 %v4100_v63, %v1552_v26 }
 0x172   : > { %v2019_v1 = vadd.f32 %v2018_v60, %v1989_v59 }
 0x173   : > { %v2075_v0 = vadd.f32 %v2074_v55, %v2046_v57 }
 0x175   : > { %v2094_v58 = vadd.f32 %v2075_v0, %v1617_v12 }
 0x177   : > { %v2105_v15 = vadd.f32 %v4117_v2, %v2094_v58 }
 0x178   : > { %v2047_v4 = vpop.f32.mrf.mxu2  ;;  %v1992_v11 = vpop.f32.mrf.mxu0 }
 0x179   : > { %v2076_v6 = vpop.f32.mrf.mxu3  ;;  %v2048_v7 = vadd.f32 %v2047_v4, %v2019_v1  ;;  %v2021_v14 = vpop.f32.mrf.mxu1  ;;  %v2127_v17 = vmul.f32 %v2105_v15, %v2105_v15 }
 0x17a   : > { %v2022_v25 = vadd.f32 %v2021_v14, %v1992_v11  ;;  %v1610_v11 = vadd.f32 %v4102_v37, %v1581_v20  ;;  %v1557_v37 = vadd.f32 %v4106_v47, %v4104_v46 }
 0x17b   : > { %v2077_v10 = vadd.f32 %v2076_v6, %v2048_v7 }
 0x17c   : > { %v1622_v63 = vadd.f32 %v1610_v11, %v4080_v50  ;;  %v1586_v30 = vadd.f32 %v4110_v49, %v1557_v37 }
 0x17d   : > { %v2095_v13 = vadd.f32 %v2077_v10, %v1618_v8 }
 0x17f   : > { %v2106_v12 = vadd.f32 %v4117_v2, %v2095_v13 }
 0x180   : > { %v2050_v18 = vpop.f32.mrf.mxu2  ;;  %v1994_v42 = vpop.f32.mrf.mxu0 }
 0x181   : > { %v2079_v34 = vpop.f32.mrf.mxu3  ;;  %v2113_v22 = vadd.f32 %v2106_v12, %v2105_v15  ;;  %v2128_v54 = vmul.f32 %v2106_v12, %v2106_v12  ;;  %v3452_v27 = vpack.c.bf16 %v2106_v12, %v2105_v15  ;;  %v2051_v32 = vadd.f32 %v2050_v18, %v2022_v25  ;;  %v2023_v29 = vpop.f32.mrf.mxu1 }
 0x182   : > { %v2024_v40 = vadd.f32 %v2023_v29, %v1994_v42 }
 0x183   : > { %v2135_v31 = vadd.f32 %v2128_v54, %v2127_v17  ;;  %3453 = vst [vmem:[%s4126_s26] sm:$0xff] %v3452_v27   ;;  %v2080_v19 = vadd.f32 %v2079_v34, %v2051_v32 }
 0x185   : > { %v2096_v21 = vadd.f32 %v2080_v19, %v4087_v23 }
 0x187   : > { %v2107_v38 = vadd.f32 %v4117_v2, %v2096_v21 }
 0x188   : > { %v2052_v41 = vpop.f32.mrf.mxu2  ;;  %v1997_v51 = vpop.f32.mrf.mxu0 }
 0x189   : > { %v2081_v43 = vpop.f32.mrf.mxu3  ;;  %v2114_v44 = vadd.f32 %v2113_v22, %v2107_v38  ;;  %v2129_v45 = vmul.f32 %v2107_v38, %v2107_v38  ;;  %v2053_v48 = vadd.f32 %v2052_v41, %v2024_v40  ;;  %v2026_v52 = vpop.f32.mrf.mxu1 }
 0x18a   : > { %v2027_v56 = vadd.f32 %v2026_v52, %v1997_v51 }
 0x18b   : > { %v2136_v24 = vadd.f32 %v2135_v31, %v2129_v45  ;;  %v2082_v53 = vadd.f32 %v2081_v43, %v2053_v48 }
 0x18d   : > { %v2097_v55 = vadd.f32 %v2082_v53, %v1620_v62 }
 0x18f   : > { %v2108_v23 = vadd.f32 %v4117_v2, %v2097_v55 }
 0x190   : > { %v2055_v57 = vpop.f32.mrf.mxu2  ;;  %v1999_v1 = vpop.f32.mrf.mxu0 }
 0x191   : > { %v2084_v59 = vpop.f32.mrf.mxu3  ;;  %v2115_v60 = vadd.f32 %v2114_v44, %v2108_v23  ;;  %v2130_v9 = vmul.f32 %v2108_v23, %v2108_v23  ;;  %v3457_v0 = vpack.c.bf16 %v2108_v23, %v2107_v38  ;;  %v2056_v5 = vadd.f32 %v2055_v57, %v2027_v56  ;;  %v2028_v58 = vpop.f32.mrf.mxu1 }
 0x192   : > { %v2029_v39 = vadd.f32 %v2028_v58, %v1999_v1  ;;  %v1615_v38 = vadd.f32 %v4112_v28, %v1586_v30 }
 0x193   : > { %v2137_v4 = vadd.f32 %v2136_v24, %v2130_v9  ;;  %3469 = vst [vmem:[%s4126_s26 + $0x8] sm:$0xff] %v3457_v0   ;;  %v2085_v6 = vadd.f32 %v2084_v59, %v2056_v5 }
 0x194   : > { %v1624_v49 = vadd.f32 %v1615_v38, %v4083_v3 }
 0x195   : > { %v2098_v7 = vadd.f32 %v2085_v6, %v4098_v36 }
 0x197   : > { %v2109_v14 = vadd.f32 %v4117_v2, %v2098_v7 }
 0x198   : > { %v2057_v33 = vpop.f32.mrf.mxu2  ;;  %v2002_v25 = vpop.f32.mrf.mxu0 }
 0x199   : > { %v2086_v8 = vpop.f32.mrf.mxu3  ;;  %v2116_v10 = vadd.f32 %v2115_v60, %v2109_v14  ;;  %v2131_v15 = vmul.f32 %v2109_v14, %v2109_v14  ;;  %v2058_v13 = vadd.f32 %v2057_v33, %v2029_v39  ;;  %v2031_v12 = vpop.f32.mrf.mxu1 }
 0x19a   : > { %v2032_v34 = vadd.f32 %v2031_v12, %v2002_v25 }
 0x19b   : > { %v2138_v16 = vadd.f32 %v2137_v4, %v2131_v15  ;;  %v2087_v17 = vadd.f32 %v2086_v8, %v2058_v13 }
 0x19d   : > { %v2099_v18 = vadd.f32 %v2087_v17, %v1622_v63 }
 0x19f   : > { %v2110_v36 = vadd.f32 %v4117_v2, %v2099_v18 }
 0x1a0   : > { %v2060_v22 = vpop.f32.mrf.mxu2  ;;  %v2004_v19 = vpop.f32.mrf.mxu0 }
 0x1a1   : > { %v2089_v54 = vpop.f32.mrf.mxu3  ;;  %v2117_v27 = vadd.f32 %v2116_v10, %v2110_v36  ;;  %v2132_v32 = vmul.f32 %v2110_v36, %v2110_v36  ;;  %v3462_v42 = vpack.c.bf16 %v2110_v36, %v2109_v14  ;;  %v2061_v29 = vadd.f32 %v2060_v22, %v2032_v34  ;;  %v2033_v21 = vpop.f32.mrf.mxu1 }
 0x1a2   : > { %v2034_v46 = vadd.f32 %v2033_v21, %v2004_v19 }
 0x1a3   : > { %v2139_v31 = vadd.f32 %v2138_v16, %v2132_v32  ;;  %3470 = vst [vmem:[%s4126_s26 + $0x10] sm:$0xff] %v3462_v42   ;;  %v2090_v50 = vadd.f32 %v2089_v54, %v2061_v29 }
 0x1a5   : > { %v2100_v35 = vadd.f32 %v2090_v50, %v4108_v61 }
 0x1a7   : > { %v2111_v40 = vadd.f32 %v4117_v2, %v2100_v35 }
 0x1a8   : > { %v2062_v47 = vpop.f32.mrf.mxu2 }
 0x1a9   : > { %v2118_v41 = vadd.f32 %v2117_v27, %v2111_v40  ;;  %v2133_v43 = vmul.f32 %v2111_v40, %v2111_v40  ;;  %v2063_v44 = vadd.f32 %v2062_v47, %v2034_v46  ;;  %v2091_v45 = vpop.f32.mrf.mxu3 }
 0x1ab   : > { %v2140_v48 = vadd.f32 %v2139_v31, %v2133_v43  ;;  %v2092_v51 = vadd.f32 %v2091_v45, %v2063_v44 }
 0x1ad   : > { %v2101_v52 = vadd.f32 %v2092_v51, %v1624_v49 }
 0x1af   : > { %v2112_v62 = vadd.f32 %v4117_v2, %v2101_v52 }
 0x1b1   : > { %v2119_v61 = vadd.f32 %v2118_v41, %v2112_v62  ;;  %v2134_v24 = vmul.f32 %v2112_v62, %v2112_v62  ;;  %v3467_v28 = vpack.c.bf16 %v2112_v62, %v2111_v40 }
 0x1b3   : > { %v2120_v53 = vrot.slane %v2119_v61, 4  ;;  %v2141_v55 = vadd.f32 %v2140_v48, %v2134_v24  ;;  %3471 = vst [vmem:[%s4126_s26 + $0x18] sm:$0xff] %v3467_v28  }
 0x1b5   : > { %v2121_v56 = vadd.f32 %v2120_v53, %v2119_v61  ;;  %v2142_v23 = vrot.slane %v2141_v55, 4 }
 0x1b7   : > { %v2122_v26 = vrot.slane %v2121_v56, 2  ;;  %v2143_v57 = vadd.f32 %v2142_v23, %v2141_v55 }
 0x1b9   : > { %v2123_v59 = vadd.f32 %v2122_v26, %v2121_v56  ;;  %v2144_v60 = vrot.slane %v2143_v57, 2 }
 0x1bb   : > { %v2124_v9 = vrot.slane %v2123_v59, 1  ;;  %v2145_v3 = vadd.f32 %v2144_v60, %v2143_v57 }
 0x1bd   : > { %v2125_v2 = vadd.f32 %v2124_v9, %v2123_v59  ;;  %v2146_v0 = vrot.slane %v2145_v3, 1 }
 0x1bf   : > { %v2147_v5 = vadd.f32 %v2146_v0, %v2145_v3  ;;  %2165 = vst [vmem:[%s208_s30] sm:$0x1] %v2125_v2 }
 0x1c1   : > { %2166 = vst [vmem:[%s208_s30 + $0x1] sm:$0x1] %v2147_v5 }
 0x1c2 PF: > { %s15_s15 = sadd.s32 1, %s3488_s15  }
 0x1c3   : > { %p12_p4 = scmp.ge.s32.totalorder %s15_s15, 4  }
 0x1c5   :  { %14 = sbr.rel (!%p12_p4) target bundleno = 1 (0x1), region = 78 }

// kernel: discriminator_forward.12
= control target key start
LH: loop header
LB: loop body
LE: loop exit
PB: predicated region body
PF: predicated region fallthrough
CT: control target
= control target key end

     0   :  { %s122_s0 = inlined_call_operand.vmem [shape: bf16[32,128], index: 0, kind: input, shape index: {}]   ;;  %s123_s1 = inlined_call_operand.vmem [shape: f32[1,128], index: 1, kind: input, shape index: {}]   ;;  %s124_s2 = inlined_call_operand.vmem [shape: f32[1,128], index: 2, kind: input, shape index: {}]   ;;  %s125_s3 = inlined_call_operand.vmem [shape: bf16[32,128], index: 3, kind: output, shape index: {}]  }
   0x1   :  { %v63_v0 = vld [vmem:[%s122_s0] sm:$0xff]   ;;  %v80_v5 = vld [vmem:[%s122_s0 + $0x8] sm:$0xff]  }
   0x2   :  { %v82_v1 = vld [vmem:[%s123_s1] ss:$0 sm:$0xff]  ;;  %v64_v2 = vunpack.c.l.bf16 %v63_v0  ;;  %v65_v3 = vunpack.c.h.bf16 %v63_v0  ;;  %v68_v6 = vunpack.c.l.bf16 %v80_v5  ;;  %v69_v7 = vunpack.c.h.bf16 %v80_v5 }
   0x3   :  { %v83_v4 = vld [vmem:[%s124_s2] ss:$0 sm:$0xff] }
   0x4   :  { %v26_v8 = vmul.f32 %v82_v1, %v64_v2  ;;  %v27_v9 = vmul.f32 %v82_v1, %v65_v3  ;;  %v28_v10 = vmul.f32 %v82_v1, %v68_v6  ;;  %v29_v11 = vmul.f32 %v82_v1, %v69_v7 }
   0x6   :  { %v34_v12 = vadd.f32 %v83_v4, %v26_v8  ;;  %v35_v13 = vadd.f32 %v83_v4, %v27_v9  ;;  %v36_v14 = vadd.f32 %v83_v4, %v28_v10  ;;  %v37_v15 = vadd.f32 %v83_v4, %v29_v11 }
   0x8   :  { %vm38_vm0 = vcmp.ge.f32.partialorder %v34_v12, 0.0  ;;  %vm39_vm1 = vcmp.ge.f32.partialorder %v35_v13, 0.0  ;;  %v42_v16 = vmul.f32 0.2, %v34_v12  ;;  %v43_v17 = vmul.f32 0.2, %v35_v13 }
   0x9   :  { %vm40_vm2 = vcmp.ge.f32.partialorder %v36_v14, 0.0  ;;  %vm41_vm3 = vcmp.ge.f32.partialorder %v37_v15, 0.0  ;;  %v44_v18 = vmul.f32 0.2, %v36_v14  ;;  %v45_v19 = vmul.f32 0.2, %v37_v15 }
   0xa   :  { %v46_v20 = vsel %vm38_vm0, %v34_v12, %v42_v16  ;;  %v47_v21 = vsel %vm39_vm1, %v35_v13, %v43_v17 }
   0xb   :  { %v73_v22 = vpack.c.bf16 %v47_v21, %v46_v20  ;;  %v48_v23 = vsel %vm40_vm2, %v36_v14, %v44_v18  ;;  %v49_v24 = vsel %vm41_vm3, %v37_v15, %v45_v19 }
   0xc   :  { %v78_v25 = vpack.c.bf16 %v49_v24, %v48_v23 }
   0xd   :  { %74 = vst [vmem:[%s125_s3] sm:$0xff] %v73_v22  }
   0xe   :  { %81 = vst [vmem:[%s125_s3 + $0x8] sm:$0xff] %v78_v25  }

// kernel: discriminator_forward.14
= control target key start
LH: loop header
LB: loop body
LE: loop exit
PB: predicated region body
PF: predicated region fallthrough
CT: control target
= control target key end

     0   :  { %s102_s0 = inlined_call_operand.vmem [shape: bf16[18,128], index: 0, kind: input, shape index: {}]   ;;  %s103_s1 = inlined_call_operand.vmem [shape: f32[1,128], index: 1, kind: input, shape index: {}]   ;;  %s104_s2 = inlined_call_operand.vmem [shape: f32[1,128], index: 2, kind: input, shape index: {}]   ;;  %s105_s3 = inlined_call_operand.vmem [shape: bf16[18,128], index: 3, kind: output, shape index: {}]  }
   0x1   :  { %v54_v0 = vld [vmem:[%s102_s0] sm:$0xff]   ;;  %v16_v5 = vld [vmem:[%s102_s0 + $0x8] sm:$0x1] }
   0x2   :  { %v62_v1 = vld [vmem:[%s103_s1] ss:$0 sm:$0xff]  ;;  %v55_v2 = vunpack.c.l.bf16 %v54_v0  ;;  %v56_v3 = vunpack.c.h.bf16 %v54_v0  ;;  %v19_v6 = vunpack.c.l.bf16 %v16_v5 }
   0x3   :  { %v63_v4 = vld [vmem:[%s104_s2] ss:$0 sm:$0xff] }
   0x4   :  { %v24_v7 = vmul.f32 %v62_v1, %v55_v2  ;;  %v25_v8 = vmul.f32 %v62_v1, %v56_v3  ;;  %v26_v9 = vmul.f32 %v62_v1, %v19_v6 }
   0x6   :  { %v31_v10 = vadd.f32 %v63_v4, %v24_v7  ;;  %v32_v11 = vadd.f32 %v63_v4, %v25_v8  ;;  %v33_v12 = vadd.f32 %v63_v4, %v26_v9 }
   0x8   :  { %vm34_vm0 = vcmp.ge.f32.partialorder %v31_v10, 0.0  ;;  %vm35_vm1 = vcmp.ge.f32.partialorder %v32_v11, 0.0  ;;  %v37_v13 = vmul.f32 0.2, %v31_v10  ;;  %v38_v14 = vmul.f32 0.2, %v32_v11 }
   0x9   :  { %vm36_vm2 = vcmp.ge.f32.partialorder %v33_v12, 0.0  ;;  %v39_v15 = vmul.f32 0.2, %v33_v12 }
   0xa   :  { %v40_v16 = vsel %vm34_vm0, %v31_v10, %v37_v13  ;;  %v41_v17 = vsel %vm35_vm1, %v32_v11, %v38_v14 }
   0xb   :  { %v60_v18 = vpack.c.bf16 %v41_v17, %v40_v16  ;;  %v42_v19 = vsel %vm36_vm2, %v33_v12, %v39_v15 }
   0xc   :  { %v45_v20 = vpack.c.bf16 %v42_v19, %v42_v19 }
   0xd   :  { %61 = vst [vmem:[%s105_s3] sm:$0xff] %v60_v18  }
   0xe   :  { %48 = vst [vmem:[%s105_s3 + $0x8] sm:$0x1] %v45_v20 }

// kernel: discriminator_forward.11
= control target key start
LH: loop header
LB: loop body
LE: loop exit
PB: predicated region body
PF: predicated region fallthrough
CT: control target
= control target key end

     0   :  { %s2708_s15 = smov 0   ;;  %s3170_s0 = inlined_call_operand.vmem [shape: bf16[2,2,20,512], index: 0, kind: input, shape index: {}]   ;;  %s3171_s1 = inlined_call_operand.vmem [shape: bf16[4,512,128], index: 1, kind: input, shape index: {}]   ;;  %s3172_s2 = inlined_call_operand.vmem [shape: f32[1,128], index: 2, kind: input, shape index: {}]   ;;  %s3173_s3 = inlined_call_operand.vmem [shape: bf16[2,16,128], index: 3, kind: output, shape index: {0}]   ;;  %s3174_s4 = inlined_call_operand.vmem [shape: f32[2,2,128], index: 4, kind: output, shape index: {1}]  }
   0x1 LB: > { %s1726_s16 = sadd.s32 4294967295, %s2681_s15   ;;  %p1730_p0 = scmp.ge.s32.totalorder %s2681_s15, 1  ;;  %s2681_s15 = sphi %s2708_s15, %s15_s15  }
   0x2   : > { %p165_p1 = scmp.lt.s32.totalorder %s2681_s15, 3 }
   0x4   : > { %p166_p2 = pnand %p1730_p0, %p165_p1 }
   0x5   : > { %p195_p3 = scmp.lt.s32.totalorder (!%p166_p2), %s1726_s16, 1 }
   0x6   : > { %169 = sbr.rel (%p166_p2) target bundleno = 306 (0x132), region = 32 }
   0xb   : > { %v2563_v0 = vld [vmem:[%s3171_s1 + $0x138] sm:$0xff]  ;;  %v2562_v4 = vld [vmem:[%s3171_s1 + $0x130] sm:$0xff]  ;;  %v2561_v8 = vld [vmem:[%s3171_s1 + $0x128] sm:$0xff]  ;;  %s3176_s16 = smov (!%p195_p3, %s1726_s16), 1  ;;  %vm981_vm0 = vcmask 1045504  }
   0xc   : > { %v2571_v1 = vld [vmem:[%s3171_s1 + $0x178] sm:$0xff]  ;;  %560 = vmatpush.bf16.msra.mxu0 %v2563_v0  ;;  %v2570_v5 = vld [vmem:[%s3171_s1 + $0x170] sm:$0xff]  ;;  %v2569_v9 = vld [vmem:[%s3171_s1 + $0x168] sm:$0xff]  ;;  %s2665_s17 = smul.u32 96, %s3176_s16  ;;  %s2515_s22 = sshll.u32 %s3176_s16, 3 }
   0xd   : > { %v2579_v2 = vld [vmem:[%s3171_s1 + $0x1b8] sm:$0xff]  ;;  %574 = vmatpush.bf16.msra.mxu1 %v2571_v1  ;;  %v2578_v6 = vld [vmem:[%s3171_s1 + $0x1b0] sm:$0xff]  ;;  %v2577_v10 = vld [vmem:[%s3171_s1 + $0x1a8] sm:$0xff]  ;;  %s204_s25 = scalar_lea.vmem %s3173_s3, %s2515_s22  ;;  %s1734_s26 = sshll.u32 %s3176_s16, 1 }
   0xe   : > { %v2587_v3 = vld [vmem:[%s3171_s1 + $0x1f8] sm:$0xff]  ;;  %588 = vmatpush.bf16.msra.mxu2 %v2579_v2  ;;  %v2586_v7 = vld [vmem:[%s3171_s1 + $0x1f0] sm:$0xff]  ;;  %v2585_v11 = vld [vmem:[%s3171_s1 + $0x1e8] sm:$0xff]  ;;  %s2810_s28 = scalar_lea.vmem %s3170_s0, %s2665_s17  ;;  %s208_s30 = scalar_lea.vmem %s3174_s4, %s1734_s26 }
   0xf   : > { %602 = vmatpush.bf16.msra.mxu3 %v2587_v3  ;;  %v2560_v12 = vld [vmem:[%s3171_s1 + $0x120] sm:$0xff]  ;;  %v2559_v16 = vld [vmem:[%s3171_s1 + $0x118] sm:$0xff]  ;;  %v2558_v20 = vld [vmem:[%s3171_s1 + $0x110] sm:$0xff] }
  0x10   : > { %561 = vmatpush.bf16.msra.mxu0 %v2562_v4  ;;  %v2568_v13 = vld [vmem:[%s3171_s1 + $0x160] sm:$0xff]  ;;  %v2567_v17 = vld [vmem:[%s3171_s1 + $0x158] sm:$0xff]  ;;  %v2566_v21 = vld [vmem:[%s3171_s1 + $0x150] sm:$0xff] }
  0x11   : > { %575 = vmatpush.bf16.msra.mxu1 %v2570_v5  ;;  %v2576_v14 = vld [vmem:[%s3171_s1 + $0x1a0] sm:$0xff]  ;;  %v2575_v18 = vld [vmem:[%s3171_s1 + $0x198] sm:$0xff]  ;;  %v2574_v22 = vld [vmem:[%s3171_s1 + $0x190] sm:$0xff] }
  0x12   : > { %589 = vmatpush.bf16.msra.mxu2 %v2578_v6  ;;  %v2584_v15 = vld [vmem:[%s3171_s1 + $0x1e0] sm:$0xff]  ;;  %v2583_v19 = vld [vmem:[%s3171_s1 + $0x1d8] sm:$0xff]  ;;  %v2582_v23 = vld [vmem:[%s3171_s1 + $0x1d0] sm:$0xff] }
  0x13   : > { %603 = vmatpush.bf16.msra.mxu3 %v2586_v7  ;;  %v2557_v24 = vld [vmem:[%s3171_s1 + $0x108] sm:$0xff]  ;;  %v2556_v28 = vld [vmem:[%s3171_s1 + $0x100] sm:$0xff]  ;;  %v2527_v32 = vld [vmem:[%s3171_s1 + $0x38] sm:$0xff] }
  0x14   : > { %562 = vmatpush.bf16.msra.mxu0 %v2561_v8  ;;  %v2565_v25 = vld [vmem:[%s3171_s1 + $0x148] sm:$0xff]  ;;  %v2564_v29 = vld [vmem:[%s3171_s1 + $0x140] sm:$0xff]  ;;  %v2535_v33 = vld [vmem:[%s3171_s1 + $0x78] sm:$0xff] }
  0x15   : > { %576 = vmatpush.bf16.msra.mxu1 %v2569_v9  ;;  %v2573_v26 = vld [vmem:[%s3171_s1 + $0x188] sm:$0xff]  ;;  %v2572_v30 = vld [vmem:[%s3171_s1 + $0x180] sm:$0xff]  ;;  %v1805_v34 = vld [vmem:[%s2810_s28 + $0x30] sm:$0xf] }
  0x16   : > { %590 = vmatpush.bf16.msra.mxu2 %v2577_v10  ;;  %v2581_v27 = vld [vmem:[%s3171_s1 + $0x1c8] sm:$0xff]  ;;  %v2580_v31 = vld [vmem:[%s3171_s1 + $0x1c0] sm:$0xff]  ;;  %v1813_v36 = vld [vmem:[%s2810_s28 + $0x38] sm:$0xf] }
  0x17   : > { %604 = vmatpush.bf16.msra.mxu3 %v2585_v11  ;;  %v2554_v35 = vld [vmem:[%s2810_s28 + $0x3c] sm:$0xf0]  ;;  %v2555_v37 = vld [vmem:[%s2810_s28 + $0x44] sm:$0xf0]  ;;  %v2552_v38 = vld [vmem:[%s2810_s28 + $0x34] sm:$0xf] }
  0x18   : > { %563 = vmatpush.bf16.msra.mxu0 %v2560_v12  ;;  %v1807_v39 = vld [vmem:[%s2810_s28 + $0x40] sm:$0xf0]  ;;  %v2553_v40 = vld [vmem:[%s2810_s28 + $0x3c] sm:$0xf]  ;;  %v1815_v41 = vld [vmem:[%s2810_s28 + $0x48] sm:$0xf0]  ;;  %v1806_v44 = vor.u32 %v2554_v35, %v1805_v34  ;;  %v1814_v45 = vor.u32 %v2555_v37, %v1813_v36 }
  0x19   : > { %577 = vmatpush.bf16.msra.mxu1 %v2568_v13  ;;  %v2543_v42 = vld [vmem:[%s3171_s1 + $0xb8] sm:$0xff]  ;;  %v1810_v46 = vor.u32 %v2552_v38, %v1807_v39  ;;  %v1818_v47 = vor.u32 %v2553_v40, %v1815_v41  ;;  %v2526_v48 = vld [vmem:[%s3171_s1 + $0x30] sm:$0xff]  ;;  %v2525_v52 = vld [vmem:[%s3171_s1 + $0x28] sm:$0xff] }
  0x1a   : > { %591 = vmatpush.bf16.msra.mxu2 %v2576_v14  ;;  %v2551_v43 = vld [vmem:[%s3171_s1 + $0xf8] sm:$0xff]  ;;  %v2534_v49 = vld [vmem:[%s3171_s1 + $0x70] sm:$0xff]  ;;  %v2533_v53 = vld [vmem:[%s3171_s1 + $0x68] sm:$0xff] }
  0x1b   : > { %605 = vmatpush.bf16.msra.mxu3 %v2584_v15  ;;  %v2542_v50 = vld [vmem:[%s3171_s1 + $0xb0] sm:$0xff]  ;;  %v2541_v54 = vld [vmem:[%s3171_s1 + $0xa8] sm:$0xff]  ;;  %v2524_v56 = vld [vmem:[%s3171_s1 + $0x20] sm:$0xff] }
  0x1c   : > { %564 = vmatpush.bf16.msra.mxu0 %v2559_v16  ;;  %v2550_v51 = vld [vmem:[%s3171_s1 + $0xf0] sm:$0xff]  ;;  %v2549_v55 = vld [vmem:[%s3171_s1 + $0xe8] sm:$0xff]  ;;  %v2532_v57 = vld [vmem:[%s3171_s1 + $0x60] sm:$0xff] }
  0x1d   : > { %578 = vmatpush.bf16.msra.mxu1 %v2567_v17  ;;  %v2540_v58 = vld [vmem:[%s3171_s1 + $0xa0] sm:$0xff]  ;;  %v2523_v60 = vld [vmem:[%s3171_s1 + $0x18] sm:$0xff]  ;;  %v2522_v0 = vld [vmem:[%s3171_s1 + $0x10] sm:$0xff] }
  0x1e   : > { %592 = vmatpush.bf16.msra.mxu2 %v2575_v18  ;;  %v2548_v59 = vld [vmem:[%s3171_s1 + $0xe0] sm:$0xff]  ;;  %v2531_v61 = vld [vmem:[%s3171_s1 + $0x58] sm:$0xff]  ;;  %v2530_v1 = vld [vmem:[%s3171_s1 + $0x50] sm:$0xff] }
  0x1f   : > { %606 = vmatpush.bf16.msra.mxu3 %v2583_v19  ;;  %v2539_v62 = vld [vmem:[%s3171_s1 + $0x98] sm:$0xff]  ;;  %v2538_v2 = vld [vmem:[%s3171_s1 + $0x90] sm:$0xff]  ;;  %v2521_v4 = vld [vmem:[%s3171_s1 + $0x8] sm:$0xff] }
  0x20   : > { %565 = vmatpush.bf16.msra.mxu0 %v2558_v20  ;;  %v2547_v63 = vld [vmem:[%s3171_s1 + $0xd8] sm:$0xff]  ;;  %v2546_v3 = vld [vmem:[%s3171_s1 + $0xd0] sm:$0xff]  ;;  %v2529_v5 = vld [vmem:[%s3171_s1 + $0x48] sm:$0xff] }
  0x21   : > { %579 = vmatpush.bf16.msra.mxu1 %v2566_v21  ;;  %v2537_v6 = vld [vmem:[%s3171_s1 + $0x88] sm:$0xff]  ;;  %v2520_v8 = vld [vmem:[%s3171_s1] sm:$0xff]  ;;  %v2599_v12 = vld [vmem:[%s3171_s1 + $0x238] sm:$0xff] }
  0x22   : > { %593 = vmatpush.bf16.msra.mxu2 %v2574_v22  ;;  %v2545_v7 = vld [vmem:[%s3171_s1 + $0xc8] sm:$0xff]  ;;  %v2528_v9 = vld [vmem:[%s3171_s1 + $0x40] sm:$0xff]  ;;  %v2607_v13 = vld [vmem:[%s3171_s1 + $0x278] sm:$0xff] }
  0x23   : > { %607 = vmatpush.bf16.msra.mxu3 %v2582_v23  ;;  %v2536_v10 = vld [vmem:[%s3171_s1 + $0x80] sm:$0xff]  ;;  %v2518_v15 = vld [vmem:[%s2810_s28 + $0xc] sm:$0xf0]  ;;  %v1957_v16 = vld [vmem:[%s2810_s28 + $0x8] sm:$0xf] }
  0x24   : > { %566 = vmatpush.bf16.msra.mxu0 %v2557_v24  ;;  %v2544_v11 = vld [vmem:[%s3171_s1 + $0xc0] sm:$0xff]  ;;  %v2519_v17 = vld [vmem:[%s2810_s28 + $0x14] sm:$0xf0]  ;;  %v1951_v19 = vld [vmem:[%s2810_s28 + $0x10] sm:$0xf0] }
  0x25   : > { %580 = vmatpush.bf16.msra.mxu1 %v2565_v25  ;;  %v1949_v14 = vld [vmem:[%s2810_s28] sm:$0xf]  ;;  %v2516_v18 = vld [vmem:[%s2810_s28 + $0x4] sm:$0xf]  ;;  %v2517_v20 = vld [vmem:[%s2810_s28 + $0xc] sm:$0xf]  ;;  %v1958_v25 = vor.u32 %v2519_v17, %v1957_v16 }
  0x26   : > { %594 = vmatpush.bf16.msra.mxu2 %v2573_v26  ;;  %v1959_v21 = vld [vmem:[%s2810_s28 + $0x18] sm:$0xf0]  ;;  %v1950_v24 = vor.u32 %v2518_v15, %v1949_v14  ;;  %v1954_v26 = vor.u32 %v2516_v18, %v1951_v19  ;;  %v2613_v34 = vld [vmem:[%s3171_s1 + $0x2a8] sm:$0xff]  ;;  %v2596_v36 = vld [vmem:[%s3171_s1 + $0x220] sm:$0xff] }
  0x27   : > { %608 = vmatpush.bf16.msra.mxu3 %v2581_v27  ;;  %v2615_v22 = vld [vmem:[%s3171_s1 + $0x2b8] sm:$0xff]  ;;  %v1962_v27 = vor.u32 %v2517_v20, %v1959_v21  ;;  %v2621_v35 = vld [vmem:[%s3171_s1 + $0x2e8] sm:$0xff]  ;;  %v2604_v37 = vld [vmem:[%s3171_s1 + $0x260] sm:$0xff] }
  0x28   : > { %567 = vmatpush.bf16.msra.mxu0 %v2556_v28  ;;  %v2623_v23 = vld [vmem:[%s3171_s1 + $0x2f8] sm:$0xff]  ;;  %v2598_v28 = vld [vmem:[%s3171_s1 + $0x230] sm:$0xff]  ;;  %v2612_v38 = vld [vmem:[%s3171_s1 + $0x2a0] sm:$0xff] }
  0x29   : > { %581 = vmatpush.bf16.msra.mxu1 %v2564_v29  ;;  %v2606_v29 = vld [vmem:[%s3171_s1 + $0x270] sm:$0xff]  ;;  %v2620_v39 = vld [vmem:[%s3171_s1 + $0x2e0] sm:$0xff]  ;;  %v2595_v40 = vld [vmem:[%s3171_s1 + $0x218] sm:$0xff] }
  0x2a   : > { %595 = vmatpush.bf16.msra.mxu2 %v2572_v30  ;;  %v2614_v30 = vld [vmem:[%s3171_s1 + $0x2b0] sm:$0xff]  ;;  %v2603_v41 = vld [vmem:[%s3171_s1 + $0x258] sm:$0xff]  ;;  %v2616_v14 = vld [vmem:[%s3171_s1 + $0x2c0] sm:$0xff] }
  0x2b   : > { %609 = vmatpush.bf16.msra.mxu3 %v2580_v31  ;;  %568 = vmatmul.bf16.vlgmr.msra.gmra.mxu0 %v1806_v44  ;;  %v2622_v31 = vld [vmem:[%s3171_s1 + $0x2f0] sm:$0xff]  ;;  %v889_v44 = vld [vmem:[%s2810_s28 + $0x28] sm:$0x33]  ;;  %v2635_v18 = vld [vmem:[%s3171_s1 + $0x338] sm:$0xff] }
  0x2c   : > { %828 = vmatpush.bf16.msrb.mxu0 %v2527_v32  ;;  %582 = vmatmul.bf16.vlgmr.msra.gmra.mxu1 %v1810_v46  ;;  %v2597_v32 = vld [vmem:[%s3171_s1 + $0x228] sm:$0xff]  ;;  %v2594_v46 = vld [vmem:[%s3171_s1 + $0x210] sm:$0xff]  ;;  %v2643_v19 = vld [vmem:[%s3171_s1 + $0x378] sm:$0xff] }
  0x2d   : > { %842 = vmatpush.bf16.msrb.mxu1 %v2535_v33  ;;  %596 = vmatmul.bf16.vlgmr.msra.gmra.mxu2 %v1814_v45  ;;  %v2605_v33 = vld [vmem:[%s3171_s1 + $0x268] sm:$0xff]  ;;  %v888_v45 = vld [vmem:[%s2810_s28 + $0x20] sm:$0x33] }
  0x2e   : > { %856 = vmatpush.bf16.msrb.mxu2 %v2543_v42  ;;  %610 = vmatmul.bf16.vlgmr.msra.gmra.mxu3 %v1818_v47  ;;  %v2611_v42 = vld [vmem:[%s3171_s1 + $0x298] sm:$0xff]  ;;  %v2602_v47 = vld [vmem:[%s3171_s1 + $0x250] sm:$0xff] }
  0x2f   : > { %870 = vmatpush.bf16.msrb.mxu3 %v2551_v43  ;;  %v2619_v43 = vld [vmem:[%s3171_s1 + $0x2d8] sm:$0xff] }
  0x30   : > { %829 = vmatpush.bf16.msrb.mxu0 %v2526_v48  ;;  %v2610_v48 = vld [vmem:[%s3171_s1 + $0x290] sm:$0xff] }
  0x31   : > { %843 = vmatpush.bf16.msrb.mxu1 %v2534_v49  ;;  %v971_v49 = vunpack.c.l.b16 %v889_v44 }
  0x32   : > { %857 = vmatpush.bf16.msrb.mxu2 %v2542_v50  ;;  %v2618_v50 = vld [vmem:[%s3171_s1 + $0x2d0] sm:$0xff] }
  0x33   : > { %871 = vmatpush.bf16.msrb.mxu3 %v2550_v51  ;;  %v2165_v51 = vld [vmem:[%s2810_s28 + $0x8] sm:$0xc] }
  0x34   : > { %830 = vmatpush.bf16.msrb.mxu0 %v2525_v52  ;;  %v2591_v52 = vld [vmem:[%s2810_s28 + $0x14] sm:$0xf0] }
  0x35   : > { %844 = vmatpush.bf16.msrb.mxu1 %v2533_v53  ;;  %v972_v53 = vunpack.c.h.b16 %v889_v44  ;;  %v2303_v44 = vld [vmem:[%s2810_s28 + $0x50] sm:$0x33] }
  0x36   : > { %858 = vmatpush.bf16.msrb.mxu2 %v2541_v54  ;;  %v2589_v54 = vld [vmem:[%s2810_s28 + $0xc] sm:$0xc] }
  0x37   : > { %872 = vmatpush.bf16.msrb.mxu3 %v2549_v55  ;;  %v2167_v55 = vld [vmem:[%s2810_s28 + $0x18] sm:$0xf0] }
  0x38   : > { %831 = vmatpush.bf16.msrb.mxu0 %v2524_v56  ;;  %v2157_v56 = vld [vmem:[%s2810_s28] sm:$0xc] }
  0x39   : > { %845 = vmatpush.bf16.msrb.mxu1 %v2532_v57  ;;  %v969_v57 = vunpack.c.l.b16 %v888_v45 }
  0x3a   : > { %859 = vmatpush.bf16.msrb.mxu2 %v2540_v58  ;;  %v970_v58 = vunpack.c.h.b16 %v888_v45  ;;  %v2647_v45 = vld [vmem:[%s3171_s1 + $0x398] sm:$0xff] }
  0x3b   : > { %873 = vmatpush.bf16.msrb.mxu3 %v2548_v59  ;;  %v2590_v59 = vld [vmem:[%s2810_s28 + $0xc] sm:$0xf0] }
  0x3c   : > { %832 = vmatpush.bf16.msrb.mxu0 %v2523_v60  ;;  %v2588_v60 = vld [vmem:[%s2810_s28 + $0x4] sm:$0xc] }
  0x3d   : > { %846 = vmatpush.bf16.msrb.mxu1 %v2531_v61  ;;  %v2159_v61 = vld [vmem:[%s2810_s28 + $0x10] sm:$0xf0] }
  0x3e   : > { %860 = vmatpush.bf16.msrb.mxu2 %v2539_v62  ;;  %v2593_v62 = vld [vmem:[%s3171_s1 + $0x208] sm:$0xff] }
  0x3f   : > { %874 = vmatpush.bf16.msrb.mxu3 %v2547_v63  ;;  %v2601_v63 = vld [vmem:[%s3171_s1 + $0x248] sm:$0xff] }
  0x40   : > { %833 = vmatpush.bf16.msrb.mxu0 %v2522_v0  ;;  %v979_v0 = vpack.c.b16 %v971_v49, %v971_v49  ;;  %v2638_v49 = vld [vmem:[%s3171_s1 + $0x350] sm:$0xff] }
  0x41   : > { %847 = vmatpush.bf16.msrb.mxu1 %v2530_v1  ;;  %v2609_v1 = vld [vmem:[%s3171_s1 + $0x288] sm:$0xff] }
  0x42   : > { %861 = vmatpush.bf16.msrb.mxu2 %v2538_v2  ;;  %v2617_v2 = vld [vmem:[%s3171_s1 + $0x2c8] sm:$0xff] }
  0x43   : > { %875 = vmatpush.bf16.msrb.mxu3 %v2546_v3  ;;  %v2166_v3 = vor.u32 %v2591_v52, %v2165_v51  ;;  %v1333_v51 = vunpack.c.l.b16 %v2303_v44  ;;  %v2654_v52 = vld [vmem:[%s3171_s1 + $0x3d0] sm:$0xff] }
  0x44   : > { %834 = vmatpush.bf16.msrb.mxu0 %v2521_v4  ;;  %v2170_v4 = vor.u32 %v2589_v54, %v2167_v55  ;;  %v2626_v54 = vld [vmem:[%s2810_s28 + $0x3c] sm:$0xf0]  ;;  %v1334_v55 = vunpack.c.h.b16 %v2303_v44 }
  0x45   : > { %848 = vmatpush.bf16.msrb.mxu1 %v2529_v5  ;;  %v980_v5 = vpack.c.b16 %v972_v53, %v972_v53  ;;  %v988_v15 = vrot.slane %v2166_v3, 2  ;;  %v2371_v53 = vld [vmem:[%s2810_s28 + $0x30] sm:$0xc]  ;;  %v2637_v3 = vld [vmem:[%s3171_s1 + $0x348] sm:$0xff] }
  0x46   : > { %862 = vmatpush.bf16.msrb.mxu2 %v2537_v6  ;;  %v2158_v6 = vor.u32 %v2590_v59, %v2157_v56  ;;  %v991_v16 = vrot.slane %v2170_v4, 2  ;;  %v2379_v59 = vld [vmem:[%s2810_s28 + $0x38] sm:$0xc] }
  0x47   : > { %876 = vmatpush.bf16.msrb.mxu3 %v2545_v7  ;;  %v977_v7 = vpack.c.b16 %v969_v57, %v969_v57  ;;  %v992_v17 = vrot.slane %v980_v5, 2  ;;  %v2624_v57 = vld [vmem:[%s2810_s28 + $0x34] sm:$0xc]  ;;  %v1342_v5 = vpack.c.b16 %v1334_v55, %v1334_v55 }
  0x48   : > { %835 = vmatpush.bf16.msrb.mxu0 %v2520_v8  ;;  %v2162_v8 = vor.u32 %v2588_v60, %v2159_v61  ;;  %v982_v20 = vrot.slane %v2158_v6, 2  ;;  %v2627_v61 = vld [vmem:[%s2810_s28 + $0x44] sm:$0xf0] }
  0x49   : > { %849 = vmatpush.bf16.msrb.mxu1 %v2528_v9  ;;  %v978_v9 = vpack.c.b16 %v970_v58, %v970_v58  ;;  %v983_v21 = vrot.slane %v977_v7, 2  ;;  %v2373_v58 = vld [vmem:[%s2810_s28 + $0x40] sm:$0xf0]  ;;  %v2645_v7 = vld [vmem:[%s3171_s1 + $0x388] sm:$0xff] }
  0x4a   : > { %863 = vmatpush.bf16.msrb.mxu2 %v2536_v10  ;;  %v2592_v10 = vld [vmem:[%s3171_s1 + $0x200] sm:$0xff]  ;;  %v2376_v4 = vor.u32 %v2624_v57, %v2373_v58 }
  0x4b   : > { %877 = vmatpush.bf16.msrb.mxu3 %v2544_v11  ;;  %836 = vmatmul.bf16.vlgmr.msrb.gmra.mxu0 %v1950_v24  ;;  %v2600_v11 = vld [vmem:[%s3171_s1 + $0x240] sm:$0xff]  ;;  %v2651_v24 = vld [vmem:[%s3171_s1 + $0x3b8] sm:$0xff] }
  0x4c   : > { %1190 = vmatpush.bf16.msra.mxu0 %v2599_v12  ;;  %850 = vmatmul.bf16.vlgmr.msrb.gmra.mxu1 %v1954_v26  ;;  %v989_v12 = vrot.slane %v979_v0, 2  ;;  %v2372_v0 = vor.u32 %v2626_v54, %v2371_v53 }
  0x4d   : > { %1204 = vmatpush.bf16.msra.mxu1 %v2607_v13  ;;  %864 = vmatmul.bf16.vlgmr.msrb.gmra.mxu2 %v1958_v25  ;;  %v2608_v13 = vld [vmem:[%s3171_s1 + $0x280] sm:$0xff]  ;;  %v2659_v25 = vld [vmem:[%s3171_s1 + $0x3f8] sm:$0xff] }
  0x4e   : > { %1218 = vmatpush.bf16.msra.mxu2 %v2615_v22  ;;  %878 = vmatmul.bf16.vlgmr.msrb.gmra.mxu3 %v1962_v27  ;;  %v985_v22 = vrot.slane %v2162_v8, 2  ;;  %v990_v26 = vsel %vm981_vm0, %v988_v15, %v989_v12  ;;  %v993_v27 = vsel %vm981_vm0, %v991_v16, %v992_v17  ;;  %v2653_v8 = vld [vmem:[%s3171_s1 + $0x3c8] sm:$0xff]  ;;  %v2628_v12 = vld [vmem:[%s3171_s1 + $0x300] sm:$0xff]  ;;  %v1348_v16 = vrot.slane %v2376_v4, 2 }
  0x4f   : > { %1232 = vmatpush.bf16.msra.mxu3 %v2623_v23  ;;  %v986_v23 = vrot.slane %v978_v9, 2  ;;  %v2380_v9 = vor.u32 %v2627_v61, %v2379_v59  ;;  %v1349_v17 = vrot.slane %v1342_v5, 2 }
  0x50   : > { %1191 = vmatpush.bf16.msra.mxu0 %v2598_v28  ;;  %v2634_v28 = vld [vmem:[%s3171_s1 + $0x330] sm:$0xff] }
  0x51   : > { %1205 = vmatpush.bf16.msra.mxu1 %v2606_v29  ;;  %v2642_v29 = vld [vmem:[%s3171_s1 + $0x370] sm:$0xff] }
  0x52   : > { %1219 = vmatpush.bf16.msra.mxu2 %v2614_v30  ;;  %v984_v30 = vsel %vm981_vm0, %v982_v20, %v983_v21  ;;  %v1351_v20 = vrot.slane %v2380_v9, 2 }
  0x53   : > { %1233 = vmatpush.bf16.msra.mxu3 %v2622_v31  ;;  %v987_v31 = vsel %vm981_vm0, %v985_v22, %v986_v23 }
  0x54   : > { %1192 = vmatpush.bf16.msra.mxu0 %v2597_v32  ;;  %v2650_v32 = vld [vmem:[%s3171_s1 + $0x3b0] sm:$0xff] }
  0x55   : > { %1206 = vmatpush.bf16.msra.mxu1 %v2605_v33  ;;  %v2658_v33 = vld [vmem:[%s3171_s1 + $0x3f0] sm:$0xff] }
  0x56   : > { %1220 = vmatpush.bf16.msra.mxu2 %v2613_v34  ;;  %v2633_v34 = vld [vmem:[%s3171_s1 + $0x328] sm:$0xff] }
  0x57   : > { %1234 = vmatpush.bf16.msra.mxu3 %v2621_v35  ;;  %v2641_v35 = vld [vmem:[%s3171_s1 + $0x368] sm:$0xff] }
  0x58   : > { %1193 = vmatpush.bf16.msra.mxu0 %v2596_v36  ;;  %v2649_v36 = vld [vmem:[%s3171_s1 + $0x3a8] sm:$0xff] }
  0x59   : > { %1207 = vmatpush.bf16.msra.mxu1 %v2604_v37  ;;  %v2657_v37 = vld [vmem:[%s3171_s1 + $0x3e8] sm:$0xff] }
  0x5a   : > { %1221 = vmatpush.bf16.msra.mxu2 %v2612_v38  ;;  %v2632_v38 = vld [vmem:[%s3171_s1 + $0x320] sm:$0xff] }
  0x5b   : > { %1235 = vmatpush.bf16.msra.mxu3 %v2620_v39  ;;  %v2640_v39 = vld [vmem:[%s3171_s1 + $0x360] sm:$0xff] }
  0x5c   : > { %1194 = vmatpush.bf16.msra.mxu0 %v2595_v40  ;;  %v2648_v40 = vld [vmem:[%s3171_s1 + $0x3a0] sm:$0xff] }
  0x5d   : > { %1208 = vmatpush.bf16.msra.mxu1 %v2603_v41  ;;  %v2656_v41 = vld [vmem:[%s3171_s1 + $0x3e0] sm:$0xff] }
  0x5e   : > { %1222 = vmatpush.bf16.msra.mxu2 %v2611_v42  ;;  %v2631_v42 = vld [vmem:[%s3171_s1 + $0x318] sm:$0xff] }
  0x5f   : > { %1236 = vmatpush.bf16.msra.mxu3 %v2619_v43  ;;  %v2639_v43 = vld [vmem:[%s3171_s1 + $0x358] sm:$0xff] }
  0x60   : > { %1195 = vmatpush.bf16.msra.mxu0 %v2594_v46  ;;  %v2655_v46 = vld [vmem:[%s3171_s1 + $0x3d8] sm:$0xff] }
  0x61   : > { %1209 = vmatpush.bf16.msra.mxu1 %v2602_v47  ;;  %v2304_v47 = vld [vmem:[%s2810_s28 + $0x58] sm:$0x33] }
  0x62   : > { %1223 = vmatpush.bf16.msra.mxu2 %v2610_v48  ;;  %v2630_v48 = vld [vmem:[%s3171_s1 + $0x310] sm:$0xff]  ;;  %v1335_v56 = vunpack.c.l.b16 %v2304_v47  ;;  %v1336_v60 = vunpack.c.h.b16 %v2304_v47 }
  0x63   : > { %1237 = vmatpush.bf16.msra.mxu3 %v2618_v50  ;;  %v2646_v50 = vld [vmem:[%s3171_s1 + $0x390] sm:$0xff] }
  0x64   : > { %1196 = vmatpush.bf16.msra.mxu0 %v2593_v62  ;;  %v2625_v62 = vld [vmem:[%s2810_s28 + $0x3c] sm:$0xc]  ;;  %v1343_v6 = vpack.c.b16 %v1335_v56, %v1335_v56 }
  0x65   : > { %1210 = vmatpush.bf16.msra.mxu1 %v2601_v63  ;;  %v2381_v63 = vld [vmem:[%s2810_s28 + $0x48] sm:$0xf0] }
  0x66   : > { %1224 = vmatpush.bf16.msra.mxu2 %v2609_v1  ;;  %v1341_v1 = vpack.c.b16 %v1333_v51, %v1333_v51  ;;  %v1352_v21 = vrot.slane %v1343_v6, 2 }
  0x67   : > { %1238 = vmatpush.bf16.msra.mxu3 %v2617_v2  ;;  %v2629_v2 = vld [vmem:[%s3171_s1 + $0x308] sm:$0xff] }
  0x68   : > { %1197 = vmatpush.bf16.msra.mxu0 %v2592_v10  ;;  %v2384_v10 = vor.u32 %v2625_v62, %v2381_v63  ;;  %v1346_v15 = vrot.slane %v1341_v1, 2 }
  0x69   : > { %1211 = vmatpush.bf16.msra.mxu1 %v2600_v11  ;;  %v1344_v11 = vpack.c.b16 %v1336_v60, %v1336_v60 }
  0x6a   : > { %1225 = vmatpush.bf16.msra.mxu2 %v2608_v13  ;;  %v2636_v13 = vld [vmem:[%s3171_s1 + $0x340] sm:$0xff]  ;;  %v1354_v22 = vrot.slane %v2384_v10, 2 }
  0x6b   : > { %1239 = vmatpush.bf16.msra.mxu3 %v2616_v14  ;;  %1198 = vmatmul.bf16.vlgmr.msra.gmra.mxu0 %v984_v30  ;;  %v1345_v14 = vrot.slane %v2372_v0, 2  ;;  %v1355_v23 = vrot.slane %v1344_v11, 2 }
  0x6c   : > { %1553 = vmatpush.bf16.msrb.mxu0 %v2635_v18  ;;  %1212 = vmatmul.bf16.vlgmr.msra.gmra.mxu1 %v987_v31  ;;  %v2644_v18 = vld [vmem:[%s3171_s1 + $0x380] sm:$0xff] }
  0x6d   : > { %1567 = vmatpush.bf16.msrb.mxu1 %v2643_v19  ;;  %1226 = vmatmul.bf16.vlgmr.msra.gmra.mxu2 %v990_v26  ;;  %v2652_v19 = vld [vmem:[%s3171_s1 + $0x3c0] sm:$0xff]  ;;  %v1353_v26 = vsel %vm981_vm0, %v1351_v20, %v1352_v21 }
  0x6e   : > { %1581 = vmatpush.bf16.msrb.mxu2 %v2651_v24  ;;  %1240 = vmatmul.bf16.vlgmr.msra.gmra.mxu3 %v993_v27  ;;  %v1347_v24 = vsel %vm981_vm0, %v1345_v14, %v1346_v15  ;;  %v1356_v27 = vsel %vm981_vm0, %v1354_v22, %v1355_v23  ;;  %v2674_v21 = vld [vmem:[%s3172_s2] ss:$0 sm:$0xff] }
  0x6f   : > { %1595 = vmatpush.bf16.msrb.mxu3 %v2659_v25  ;;  %v1350_v25 = vsel %vm981_vm0, %v1348_v16, %v1349_v17 }
  0x70   : > { %1554 = vmatpush.bf16.msrb.mxu0 %v2634_v28 }
  0x71   : > { %1568 = vmatpush.bf16.msrb.mxu1 %v2642_v29 }
  0x72   : > { %1582 = vmatpush.bf16.msrb.mxu2 %v2650_v32 }
  0x73   : > { %1596 = vmatpush.bf16.msrb.mxu3 %v2658_v33 }
  0x74   : > { %1555 = vmatpush.bf16.msrb.mxu0 %v2633_v34 }
  0x75   : > { %1569 = vmatpush.bf16.msrb.mxu1 %v2641_v35 }
  0x76   : > { %1583 = vmatpush.bf16.msrb.mxu2 %v2649_v36 }
  0x77   : > { %1597 = vmatpush.bf16.msrb.mxu3 %v2657_v37 }
  0x78   : > { %1556 = vmatpush.bf16.msrb.mxu0 %v2632_v38 }
  0x79   : > { %1570 = vmatpush.bf16.msrb.mxu1 %v2640_v39 }
  0x7a   : > { %1584 = vmatpush.bf16.msrb.mxu2 %v2648_v40 }
  0x7b   : > { %1598 = vmatpush.bf16.msrb.mxu3 %v2656_v41 }
  0x7c   : > { %1557 = vmatpush.bf16.msrb.mxu0 %v2631_v42 }
  0x7d   : > { %1571 = vmatpush.bf16.msrb.mxu1 %v2639_v43 }
  0x7e   : > { %1585 = vmatpush.bf16.msrb.mxu2 %v2647_v45 }
  0x7f   : > { %1599 = vmatpush.bf16.msrb.mxu3 %v2655_v46 }
  0x80   : > { %1558 = vmatpush.bf16.msrb.mxu0 %v2630_v48 }
  0x81   : > { %1572 = vmatpush.bf16.msrb.mxu1 %v2638_v49 }
  0x82   : > { %1586 = vmatpush.bf16.msrb.mxu2 %v2646_v50 }
  0x83   : > { %1600 = vmatpush.bf16.msrb.mxu3 %v2654_v52 }
  0x84   : > { %1559 = vmatpush.bf16.msrb.mxu0 %v2629_v2 }
  0x85   : > { %1573 = vmatpush.bf16.msrb.mxu1 %v2637_v3 }
  0x86   : > { %1587 = vmatpush.bf16.msrb.mxu2 %v2645_v7 }
  0x87   : > { %1601 = vmatpush.bf16.msrb.mxu3 %v2653_v8 }
  0x88   : > { %1560 = vmatpush.bf16.msrb.mxu0 %v2628_v12 }
  0x89   : > { %1574 = vmatpush.bf16.msrb.mxu1 %v2636_v13 }
  0x8a   : > { %1588 = vmatpush.bf16.msrb.mxu2 %v2644_v18 }
  0x8b   : > { %1602 = vmatpush.bf16.msrb.mxu3 %v2652_v19  ;;  %1561 = vmatmul.bf16.vlgmr.msrb.gmra.mxu0 %v1347_v24 }
  0x8c   : > { %1575 = vmatmul.bf16.vlgmr.msrb.gmra.mxu1 %v1350_v25 }
  0x8d   : > { %1589 = vmatmul.bf16.vlgmr.msrb.gmra.mxu2 %v1353_v26 }
  0x8e   : > { %1603 = vmatmul.bf16.vlgmr.msrb.gmra.mxu3 %v1356_v27 }
  0xa8   : > { %v569_v28 = vpop.f32.mrf.mxu0 }
  0xa9   : > { %v583_v29 = vpop.f32.mrf.mxu1 }
  0xaa   : > { %v584_v46 = vadd.f32 %v583_v29, %v569_v28 }
  0xb0   : > { %v597_v30 = vpop.f32.mrf.mxu2  ;;  %v571_v32 = vpop.f32.mrf.mxu0 }
  0xb1   : > { %v611_v31 = vpop.f32.mrf.mxu3  ;;  %v585_v33 = vpop.f32.mrf.mxu1  ;;  %v598_v49 = vadd.f32 %v597_v30, %v584_v46 }
  0xb2   : > { %v586_v52 = vadd.f32 %v585_v33, %v571_v32 }
  0xb3   : > { %v612_v53 = vadd.f32 %v611_v31, %v598_v49 }
  0xb8   : > { %v599_v34 = vpop.f32.mrf.mxu2 }
  0xb9   : > { %v613_v35 = vpop.f32.mrf.mxu3  ;;  %v600_v54 = vadd.f32 %v599_v34, %v586_v52 }
  0xbb   : > { %v614_v60 = vadd.f32 %v613_v35, %v600_v54 }
  0xc8   : > { %v837_v36 = vpop.f32.mrf.mxu0 }
  0xc9   : > { %v851_v37 = vpop.f32.mrf.mxu1  ;;  %v838_v57 = vadd.f32 %v837_v36, %v612_v53 }
  0xcb   : > { %v852_v62 = vadd.f32 %v851_v37, %v838_v57 }
  0xd0   : > { %v865_v38 = vpop.f32.mrf.mxu2  ;;  %v839_v40 = vpop.f32.mrf.mxu0 }
  0xd1   : > { %v879_v39 = vpop.f32.mrf.mxu3  ;;  %v853_v41 = vpop.f32.mrf.mxu1  ;;  %v840_v0 = vadd.f32 %v839_v40, %v614_v60  ;;  %v866_v5 = vadd.f32 %v865_v38, %v852_v62 }
  0xd3   : > { %v854_v7 = vadd.f32 %v853_v41, %v840_v0  ;;  %v880_v12 = vadd.f32 %v879_v39, %v866_v5 }
  0xd8   : > { %v867_v42 = vpop.f32.mrf.mxu2 }
  0xd9   : > { %v881_v43 = vpop.f32.mrf.mxu3  ;;  %v868_v13 = vadd.f32 %v867_v42, %v854_v7 }
  0xdb   : > { %v882_v19 = vadd.f32 %v881_v43, %v868_v13 }
  0xe8   : > { %v1199_v44 = vpop.f32.mrf.mxu0 }
  0xe9   : > { %v1213_v45 = vpop.f32.mrf.mxu1 }
  0xea   : > { %v1214_v61 = vadd.f32 %v1213_v45, %v1199_v44 }
  0xf0   : > { %v1227_v47 = vpop.f32.mrf.mxu2  ;;  %v1201_v50 = vpop.f32.mrf.mxu0 }
  0xf1   : > { %v1241_v48 = vpop.f32.mrf.mxu3  ;;  %v1215_v51 = vpop.f32.mrf.mxu1  ;;  %v1228_v1 = vadd.f32 %v1227_v47, %v1214_v61 }
  0xf2   : > { %v1216_v2 = vadd.f32 %v1215_v51, %v1201_v50 }
  0xf3   : > { %v1242_v8 = vadd.f32 %v1241_v48, %v1228_v1 }
  0xf5   : > { %v1246_v15 = vadd.f32 %v1242_v8, %v880_v12 }
  0xf8   : > { %v1229_v55 = vpop.f32.mrf.mxu2 }
  0xf9   : > { %v1243_v56 = vpop.f32.mrf.mxu3  ;;  %v1230_v9 = vadd.f32 %v1229_v55, %v1216_v2 }
  0xfb   : > { %v1244_v16 = vadd.f32 %v1243_v56, %v1230_v9 }
  0xfd   : > { %v1247_v24 = vadd.f32 %v1244_v16, %v882_v19 }
 0x108   : > { %v1562_v58 = vpop.f32.mrf.mxu0 }
 0x109   : > { %v1576_v59 = vpop.f32.mrf.mxu1 }
 0x10a   : > { %v1577_v63 = vadd.f32 %v1576_v59, %v1562_v58 }
 0x110   : > { %v1590_v3 = vpop.f32.mrf.mxu2  ;;  %v1564_v10 = vpop.f32.mrf.mxu0 }
 0x111   : > { %v1604_v4 = vpop.f32.mrf.mxu3  ;;  %v1591_v6 = vadd.f32 %v1590_v3, %v1577_v63  ;;  %v1578_v11 = vpop.f32.mrf.mxu1 }
 0x112   : > { %v1579_v17 = vadd.f32 %v1578_v11, %v1564_v10 }
 0x113   : > { %v1605_v14 = vadd.f32 %v1604_v4, %v1591_v6 }
 0x115   : > { %v1609_v20 = vadd.f32 %v1605_v14, %v1246_v15 }
 0x117   : > { %v1614_v26 = vadd.f32 %v2674_v21, %v1609_v20 }
 0x118   : > { %v1592_v18 = vpop.f32.mrf.mxu2 }
 0x119   : > { %v1593_v22 = vadd.f32 %v1592_v18, %v1579_v17  ;;  %v1606_v23 = vpop.f32.mrf.mxu3  ;;  %v1624_v29 = vmul.f32 %v1614_v26, %v1614_v26 }
 0x11b   : > { %v1607_v25 = vadd.f32 %v1606_v23, %v1593_v22 }
 0x11d   : > { %v1610_v27 = vadd.f32 %v1607_v25, %v1247_v24 }
 0x11f   : > { %v1615_v28 = vadd.f32 %v2674_v21, %v1610_v27 }
 0x121   : > { %v1616_v30 = vadd.f32 %v1615_v28, %v1614_v26  ;;  %v1625_v31 = vmul.f32 %v1615_v28, %v1615_v28  ;;  %v2663_v32 = vpack.c.bf16 %v1615_v28, %v1614_v26 }
 0x123   : > { %v1617_v33 = vrot.slane %v1616_v30, 4  ;;  %v1626_v34 = vadd.f32 %v1625_v31, %v1624_v29  ;;  %2664 = vst [vmem:[%s204_s25] sm:$0xff] %v2663_v32  }
 0x125   : > { %v1618_v35 = vadd.f32 %v1617_v33, %v1616_v30  ;;  %v1627_v36 = vrot.slane %v1626_v34, 4 }
 0x127   : > { %v1619_v37 = vrot.slane %v1618_v35, 2  ;;  %v1628_v38 = vadd.f32 %v1627_v36, %v1626_v34 }
 0x129   : > { %v1620_v39 = vadd.f32 %v1619_v37, %v1618_v35  ;;  %v1629_v40 = vrot.slane %v1628_v38, 2 }
 0x12b   : > { %v1621_v41 = vrot.slane %v1620_v39, 1  ;;  %v1630_v42 = vadd.f32 %v1629_v40, %v1628_v38 }
 0x12d   : > { %v1622_v43 = vadd.f32 %v1621_v41, %v1620_v39  ;;  %v1631_v44 = vrot.slane %v1630_v42, 1 }
 0x12f   : > { %v1632_v45 = vadd.f32 %v1631_v44, %v1630_v42  ;;  %1638 = vst [vmem:[%s208_s30] sm:$0x1] %v1622_v43 }
 0x131   : > { %1639 = vst [vmem:[%s208_s30 + $0x1] sm:$0x1] %v1632_v45 }
 0x132 PF: > { %s15_s15 = sadd.s32 1, %s2681_s15  }
 0x133   : > { %p12_p4 = scmp.ge.s32.totalorder %s15_s15, 4  }
 0x135   :  { %14 = sbr.rel (!%p12_p4) target bundleno = 1 (0x1), region = 78 }

// kernel: discriminator_forward.13
= control target key start
LH: loop header
LB: loop body
LE: loop exit
PB: predicated region body
PF: predicated region fallthrough
CT: control target
= control target key end

     0   :  { %s2858_s15 = smov 0   ;;  %s3308_s0 = inlined_call_operand.vmem [shape: bf16[2,4,18,128], index: 0, kind: input, shape index: {}]   ;;  %s3309_s1 = inlined_call_operand.vmem [shape: bf16[16,128,128], index: 1, kind: input, shape index: {}]   ;;  %s3310_s2 = inlined_call_operand.vmem [shape: f32[1,128], index: 2, kind: input, shape index: {}]   ;;  %s3311_s3 = inlined_call_operand.vmem [shape: bf16[2,9,128], index: 3, kind: output, shape index: {0}]   ;;  %s3312_s4 = inlined_call_operand.vmem [shape: f32[2,2,128], index: 4, kind: output, shape index: {1}]  }
   0x1 LB: > { %s1819_s16 = sadd.s32 4294967295, %s2831_s15   ;;  %p1823_p0 = scmp.ge.s32.totalorder %s2831_s15, 1  ;;  %s2831_s15 = sphi %s2858_s15, %s15_s15  }
   0x2   : > { %p165_p1 = scmp.lt.s32.totalorder %s2831_s15, 3 }
   0x4   : > { %p166_p2 = pnand %p1823_p0, %p165_p1 }
   0x5   : > { %p195_p3 = scmp.lt.s32.totalorder (!%p166_p2), %s1819_s16, 1 }
   0x6   : > { %169 = sbr.rel (%p166_p2) target bundleno = 305 (0x131), region = 32 }
   0xb   : > { %v2688_v0 = vld [vmem:[%s3309_s1 + $0x78] sm:$0xff]  ;;  %v2687_v4 = vld [vmem:[%s3309_s1 + $0x70] sm:$0xff]  ;;  %v2686_v8 = vld [vmem:[%s3309_s1 + $0x68] sm:$0xff]  ;;  %s3314_s16 = smov (!%p195_p3, %s1819_s16), 1  ;;  %vm1701_vm0 = vcmask 1040384  }
   0xc   : > { %v2679_v1 = vld [vmem:[%s3309_s1 + $0x38] sm:$0xff]  ;;  %302 = vmatpush.bf16.msra.mxu0 %v2688_v0  ;;  %v2678_v5 = vld [vmem:[%s3309_s1 + $0x30] sm:$0xff]  ;;  %v2677_v9 = vld [vmem:[%s3309_s1 + $0x28] sm:$0xff]  ;;  %s2815_s17 = smul.u32 48, %s3314_s16  ;;  %s2670_s22 = sshll.u32 %s3314_s16, 3 }
   0xd   : > { %v2697_v2 = vld [vmem:[%s3309_s1 + $0xb8] sm:$0xff]  ;;  %370 = vmatpush.bf16.msra.mxu1 %v2679_v1  ;;  %v2696_v6 = vld [vmem:[%s3309_s1 + $0xb0] sm:$0xff]  ;;  %v2695_v10 = vld [vmem:[%s3309_s1 + $0xa8] sm:$0xff]  ;;  %s204_s25 = scalar_lea.vmem %s3311_s3, %s2670_s22  ;;  %vm1726_vm1 = vsmask.f32 256 }
   0xe   : > { %v2706_v3 = vld [vmem:[%s3309_s1 + $0xf8] sm:$0xff]  ;;  %458 = vmatpush.bf16.msra.mxu2 %v2697_v2  ;;  %v2705_v7 = vld [vmem:[%s3309_s1 + $0xf0] sm:$0xff]  ;;  %v2704_v11 = vld [vmem:[%s3309_s1 + $0xe8] sm:$0xff]  ;;  %s2960_s28 = scalar_lea.vmem %s3308_s0, %s2815_s17 }
   0xf   : > { %548 = vmatpush.bf16.msra.mxu3 %v2706_v3  ;;  %v2685_v12 = vld [vmem:[%s3309_s1 + $0x60] sm:$0xff]  ;;  %v2684_v16 = vld [vmem:[%s3309_s1 + $0x58] sm:$0xff]  ;;  %v2683_v20 = vld [vmem:[%s3309_s1 + $0x50] sm:$0xff] }
  0x10   : > { %303 = vmatpush.bf16.msra.mxu0 %v2687_v4  ;;  %v2676_v13 = vld [vmem:[%s3309_s1 + $0x20] sm:$0xff]  ;;  %v2675_v17 = vld [vmem:[%s3309_s1 + $0x18] sm:$0xff]  ;;  %v2674_v21 = vld [vmem:[%s3309_s1 + $0x10] sm:$0xff] }
  0x11   : > { %371 = vmatpush.bf16.msra.mxu1 %v2678_v5  ;;  %v2694_v14 = vld [vmem:[%s3309_s1 + $0xa0] sm:$0xff]  ;;  %v2693_v18 = vld [vmem:[%s3309_s1 + $0x98] sm:$0xff]  ;;  %v2692_v22 = vld [vmem:[%s3309_s1 + $0x90] sm:$0xff] }
  0x12   : > { %459 = vmatpush.bf16.msra.mxu2 %v2696_v6  ;;  %v2703_v15 = vld [vmem:[%s3309_s1 + $0xe0] sm:$0xff]  ;;  %v2702_v19 = vld [vmem:[%s3309_s1 + $0xd8] sm:$0xff]  ;;  %v2701_v23 = vld [vmem:[%s3309_s1 + $0xd0] sm:$0xff] }
  0x13   : > { %549 = vmatpush.bf16.msra.mxu3 %v2705_v7  ;;  %v2682_v24 = vld [vmem:[%s3309_s1 + $0x48] sm:$0xff]  ;;  %v2681_v28 = vld [vmem:[%s3309_s1 + $0x40] sm:$0xff]  ;;  %v2715_v32 = vld [vmem:[%s3309_s1 + $0x138] sm:$0xff] }
  0x14   : > { %304 = vmatpush.bf16.msra.mxu0 %v2686_v8  ;;  %v2673_v25 = vld [vmem:[%s3309_s1 + $0x8] sm:$0xff]  ;;  %v2672_v29 = vld [vmem:[%s3309_s1] sm:$0xff]  ;;  %v2724_v33 = vld [vmem:[%s3309_s1 + $0x178] sm:$0xff] }
  0x15   : > { %372 = vmatpush.bf16.msra.mxu1 %v2677_v9  ;;  %v2691_v26 = vld [vmem:[%s3309_s1 + $0x88] sm:$0xff]  ;;  %v2690_v30 = vld [vmem:[%s3309_s1 + $0x80] sm:$0xff]  ;;  %v2680_v35 = vld [vmem:[%s2960_s28 + $0xc] sm:$0x10] }
  0x16   : > { %460 = vmatpush.bf16.msra.mxu2 %v2695_v10  ;;  %v2700_v27 = vld [vmem:[%s3309_s1 + $0xc8] sm:$0xff]  ;;  %v2699_v31 = vld [vmem:[%s3309_s1 + $0xc0] sm:$0xff]  ;;  %v1938_v36 = vld [vmem:[%s2960_s28 + $0x18] sm:$0xf] }
  0x17   : > { %550 = vmatpush.bf16.msra.mxu3 %v2704_v11  ;;  %v1848_v34 = vld [vmem:[%s2960_s28 + $0xc] sm:$0xf]  ;;  %v2689_v37 = vld [vmem:[%s2960_s28 + $0x18] sm:$0x10]  ;;  %v1884_v38 = vld [vmem:[%s2960_s28] sm:$0xf] }
  0x18   : > { %305 = vmatpush.bf16.msra.mxu0 %v2685_v12  ;;  %v2671_v39 = vld [vmem:[%s2960_s28] sm:$0x10]  ;;  %v2698_v41 = vld [vmem:[%s2960_s28 + $0x24] sm:$0x10]  ;;  %v2733_v42 = vld [vmem:[%s3309_s1 + $0x1b8] sm:$0xff]  ;;  %v1849_v44 = vor.u32 %v2680_v35, %v1848_v34  ;;  %v1939_v45 = vor.u32 %v2689_v37, %v1938_v36 }
  0x19   : > { %373 = vmatpush.bf16.msra.mxu1 %v2676_v13  ;;  %v1992_v40 = vld [vmem:[%s2960_s28 + $0x24] sm:$0xf]  ;;  %v2742_v43 = vld [vmem:[%s3309_s1 + $0x1f8] sm:$0xff]  ;;  %v1885_v46 = vor.u32 %v2671_v39, %v1884_v38  ;;  %v2714_v48 = vld [vmem:[%s3309_s1 + $0x130] sm:$0xff] }
  0x1a   : > { %461 = vmatpush.bf16.msra.mxu2 %v2694_v14  ;;  %v1993_v47 = vor.u32 %v2698_v41, %v1992_v40  ;;  %v2723_v49 = vld [vmem:[%s3309_s1 + $0x170] sm:$0xff]  ;;  %v2713_v52 = vld [vmem:[%s3309_s1 + $0x128] sm:$0xff]  ;;  %v2712_v56 = vld [vmem:[%s3309_s1 + $0x120] sm:$0xff] }
  0x1b   : > { %551 = vmatpush.bf16.msra.mxu3 %v2703_v15  ;;  %v2732_v50 = vld [vmem:[%s3309_s1 + $0x1b0] sm:$0xff]  ;;  %v2722_v53 = vld [vmem:[%s3309_s1 + $0x168] sm:$0xff]  ;;  %v2721_v57 = vld [vmem:[%s3309_s1 + $0x160] sm:$0xff] }
  0x1c   : > { %306 = vmatpush.bf16.msra.mxu0 %v2684_v16  ;;  %v2741_v51 = vld [vmem:[%s3309_s1 + $0x1f0] sm:$0xff]  ;;  %v2731_v54 = vld [vmem:[%s3309_s1 + $0x1a8] sm:$0xff]  ;;  %v2730_v58 = vld [vmem:[%s3309_s1 + $0x1a0] sm:$0xff] }
  0x1d   : > { %374 = vmatpush.bf16.msra.mxu1 %v2675_v17  ;;  %v2740_v55 = vld [vmem:[%s3309_s1 + $0x1e8] sm:$0xff]  ;;  %v2739_v59 = vld [vmem:[%s3309_s1 + $0x1e0] sm:$0xff]  ;;  %v2711_v60 = vld [vmem:[%s3309_s1 + $0x118] sm:$0xff] }
  0x1e   : > { %462 = vmatpush.bf16.msra.mxu2 %v2693_v18  ;;  %v2720_v61 = vld [vmem:[%s3309_s1 + $0x158] sm:$0xff]  ;;  %v2044_v0 = vld [vmem:[%s2960_s28] sm:$0xe]  ;;  %v2707_v1 = vld [vmem:[%s2960_s28] sm:$0x30] }
  0x1f   : > { %552 = vmatpush.bf16.msra.mxu3 %v2702_v19  ;;  %v2729_v62 = vld [vmem:[%s3309_s1 + $0x198] sm:$0xff]  ;;  %v2098_v4 = vld [vmem:[%s2960_s28 + $0xc] sm:$0xe]  ;;  %v2716_v5 = vld [vmem:[%s2960_s28 + $0xc] sm:$0x30]  ;;  %v2045_v10 = vor.u32 %v2707_v1, %v2044_v0 }
  0x20   : > { %307 = vmatpush.bf16.msra.mxu0 %v2683_v20  ;;  %v2738_v63 = vld [vmem:[%s3309_s1 + $0x1d8] sm:$0xff]  ;;  %v2206_v6 = vld [vmem:[%s2960_s28 + $0x24] sm:$0xe]  ;;  %v2734_v7 = vld [vmem:[%s2960_s28 + $0x24] sm:$0x30]  ;;  %v2099_v14 = vor.u32 %v2716_v5, %v2098_v4 }
  0x21   : > { %375 = vmatpush.bf16.msra.mxu1 %v2674_v21  ;;  %v2152_v2 = vld [vmem:[%s2960_s28 + $0x18] sm:$0xe]  ;;  %v2725_v3 = vld [vmem:[%s2960_s28 + $0x18] sm:$0x30]  ;;  %v2710_v8 = vld [vmem:[%s3309_s1 + $0x110] sm:$0xff]  ;;  %v2207_v15 = vor.u32 %v2734_v7, %v2206_v6  ;;  %v589_v18 = vshrl.u32 %v2045_v10, 16 }
  0x22   : > { %463 = vmatpush.bf16.msra.mxu2 %v2692_v22  ;;  %v2719_v9 = vld [vmem:[%s3309_s1 + $0x150] sm:$0xff]  ;;  %v2153_v11 = vor.u32 %v2725_v3, %v2152_v2  ;;  %v2709_v16 = vld [vmem:[%s3309_s1 + $0x108] sm:$0xff]  ;;  %v592_v19 = vshll.u32 %v2045_v10, 16  ;;  %v2726_v34 = vld [vmem:[%s3309_s1 + $0x180] sm:$0xff] }
  0x23   : > { %553 = vmatpush.bf16.msra.mxu3 %v2701_v23  ;;  %v2728_v12 = vld [vmem:[%s3309_s1 + $0x190] sm:$0xff]  ;;  %v2718_v17 = vld [vmem:[%s3309_s1 + $0x148] sm:$0xff]  ;;  %v2735_v35 = vld [vmem:[%s3309_s1 + $0x1c0] sm:$0xff] }
  0x24   : > { %308 = vmatpush.bf16.msra.mxu0 %v2682_v24  ;;  %v2737_v13 = vld [vmem:[%s3309_s1 + $0x1d0] sm:$0xff]  ;;  %v783_v20 = vshrl.u32 %v2153_v11, 16  ;;  %v786_v21 = vshll.u32 %v2153_v11, 16  ;;  %v2727_v22 = vld [vmem:[%s3309_s1 + $0x188] sm:$0xff]  ;;  %v686_v24 = vshrl.u32 %v2099_v14, 16  ;;  %v2751_v40 = vld [vmem:[%s3309_s1 + $0x238] sm:$0xff] }
  0x25   : > { %376 = vmatpush.bf16.msra.mxu1 %v2673_v25  ;;  %v2736_v23 = vld [vmem:[%s3309_s1 + $0x1c8] sm:$0xff]  ;;  %v689_v25 = vshll.u32 %v2099_v14, 16  ;;  %v2760_v41 = vld [vmem:[%s3309_s1 + $0x278] sm:$0xff]  ;;  %v2746_v0 = vld [vmem:[%s3309_s1 + $0x210] sm:$0xff] }
  0x26   : > { %464 = vmatpush.bf16.msra.mxu2 %v2691_v26  ;;  %v880_v26 = vshrl.u32 %v2207_v15, 16  ;;  %v688_v36 = vrot.slane %v686_v24, 1  ;;  %v2755_v1 = vld [vmem:[%s3309_s1 + $0x250] sm:$0xff]  ;;  %v2745_v4 = vld [vmem:[%s3309_s1 + $0x208] sm:$0xff]  ;;  %v2366_v10 = vld [vmem:[%s2960_s28 + $0x18] sm:$0x8] }
  0x27   : > { %554 = vmatpush.bf16.msra.mxu3 %v2700_v27  ;;  %v883_v27 = vshll.u32 %v2207_v15, 16  ;;  %v691_v37 = vrot.slane %v689_v25, 2  ;;  %v2764_v2 = vld [vmem:[%s3309_s1 + $0x290] sm:$0xff]  ;;  %v2754_v5 = vld [vmem:[%s3309_s1 + $0x248] sm:$0xff]  ;;  %v2761_v11 = vld [vmem:[%s2960_s28 + $0x18] sm:$0xf0] }
  0x28   : > { %309 = vmatpush.bf16.msra.mxu0 %v2681_v28  ;;  %v2708_v28 = vld [vmem:[%s3309_s1 + $0x100] sm:$0xff]  ;;  %v882_v38 = vrot.slane %v880_v26, 1  ;;  %v2773_v3 = vld [vmem:[%s3309_s1 + $0x2d0] sm:$0xff]  ;;  %v2763_v6 = vld [vmem:[%s3309_s1 + $0x288] sm:$0xff] }
  0x29   : > { %377 = vmatpush.bf16.msra.mxu1 %v2672_v29  ;;  %v2717_v29 = vld [vmem:[%s3309_s1 + $0x140] sm:$0xff]  ;;  %v885_v39 = vrot.slane %v883_v27, 2  ;;  %v2772_v7 = vld [vmem:[%s3309_s1 + $0x2c8] sm:$0xff]  ;;  %v2787_v24 = vld [vmem:[%s3309_s1 + $0x338] sm:$0xff] }
  0x2a   : > { %465 = vmatpush.bf16.msra.mxu2 %v2690_v30  ;;  %v591_v30 = vrot.slane %v589_v18, 1  ;;  %v2420_v14 = vld [vmem:[%s2960_s28 + $0x24] sm:$0x8]  ;;  %v2770_v15 = vld [vmem:[%s2960_s28 + $0x24] sm:$0xf0]  ;;  %v2796_v25 = vld [vmem:[%s3309_s1 + $0x378] sm:$0xff] }
  0x2b   : > { %555 = vmatpush.bf16.msra.mxu3 %v2699_v31  ;;  %310 = vmatmul.bf16.vlgmr.msra.gmra.mxu0 %v1849_v44  ;;  %v594_v31 = vrot.slane %v592_v19, 2  ;;  %v2367_v19 = vor.u32 %v2761_v11, %v2366_v10  ;;  %v2805_v26 = vld [vmem:[%s3309_s1 + $0x3b8] sm:$0xff]  ;;  %vm1727_vm2 = vmand %vm1701_vm0, %vm1726_vm1 }
  0x2c   : > { %645 = vmatpush.bf16.msrb.mxu0 %v2715_v32  ;;  %378 = vmatmul.bf16.vlgmr.msra.gmra.mxu1 %v1885_v46  ;;  %v785_v32 = vrot.slane %v783_v20, 1  ;;  %v692_v46 = vor.u32 %v691_v37, %v688_v36  ;;  %v2762_v20 = vld [vmem:[%s3309_s1 + $0x280] sm:$0xff]  ;;  %v2814_v27 = vld [vmem:[%s3309_s1 + $0x3f8] sm:$0xff]  ;;  %v2785_v36 = vld [vmem:[%s3309_s1 + $0x328] sm:$0xff] }
  0x2d   : > { %742 = vmatpush.bf16.msrb.mxu1 %v2724_v33  ;;  %466 = vmatmul.bf16.vlgmr.msra.gmra.mxu2 %v1939_v45  ;;  %v788_v33 = vrot.slane %v786_v21, 2  ;;  %v595_v44 = vor.u32 %v594_v31, %v591_v30  ;;  %v2771_v21 = vld [vmem:[%s3309_s1 + $0x2c0] sm:$0xff]  ;;  %v2794_v37 = vld [vmem:[%s3309_s1 + $0x368] sm:$0xff] }
  0x2e   : > { %839 = vmatpush.bf16.msrb.mxu2 %v2733_v42  ;;  %556 = vmatmul.bf16.vlgmr.msra.gmra.mxu3 %v1993_v47  ;;  %v2769_v42 = vld [vmem:[%s3309_s1 + $0x2b8] sm:$0xff]  ;;  %v886_v47 = vor.u32 %v885_v39, %v882_v38  ;;  %v2803_v38 = vld [vmem:[%s3309_s1 + $0x3a8] sm:$0xff] }
  0x2f   : > { %936 = vmatpush.bf16.msrb.mxu3 %v2742_v43  ;;  %v2778_v43 = vld [vmem:[%s3309_s1 + $0x2f8] sm:$0xff]  ;;  %v789_v45 = vor.u32 %v788_v33, %v785_v32  ;;  %v2786_v32 = vld [vmem:[%s3309_s1 + $0x330] sm:$0xff]  ;;  %v2812_v39 = vld [vmem:[%s3309_s1 + $0x3e8] sm:$0xff] }
  0x30   : > { %646 = vmatpush.bf16.msrb.mxu0 %v2714_v48  ;;  %v2750_v48 = vld [vmem:[%s3309_s1 + $0x230] sm:$0xff] }
  0x31   : > { %743 = vmatpush.bf16.msrb.mxu1 %v2723_v49  ;;  %v2759_v49 = vld [vmem:[%s3309_s1 + $0x270] sm:$0xff] }
  0x32   : > { %840 = vmatpush.bf16.msrb.mxu2 %v2732_v50  ;;  %v2768_v50 = vld [vmem:[%s3309_s1 + $0x2b0] sm:$0xff] }
  0x33   : > { %937 = vmatpush.bf16.msrb.mxu3 %v2741_v51  ;;  %v2777_v51 = vld [vmem:[%s3309_s1 + $0x2f0] sm:$0xff] }
  0x34   : > { %647 = vmatpush.bf16.msrb.mxu0 %v2713_v52  ;;  %v2749_v52 = vld [vmem:[%s3309_s1 + $0x228] sm:$0xff]  ;;  %v2795_v33 = vld [vmem:[%s3309_s1 + $0x370] sm:$0xff] }
  0x35   : > { %744 = vmatpush.bf16.msrb.mxu1 %v2722_v53  ;;  %v2758_v53 = vld [vmem:[%s3309_s1 + $0x268] sm:$0xff] }
  0x36   : > { %841 = vmatpush.bf16.msrb.mxu2 %v2731_v54  ;;  %v2767_v54 = vld [vmem:[%s3309_s1 + $0x2a8] sm:$0xff] }
  0x37   : > { %938 = vmatpush.bf16.msrb.mxu3 %v2740_v55  ;;  %v2776_v55 = vld [vmem:[%s3309_s1 + $0x2e8] sm:$0xff] }
  0x38   : > { %648 = vmatpush.bf16.msrb.mxu0 %v2712_v56  ;;  %v2748_v56 = vld [vmem:[%s3309_s1 + $0x220] sm:$0xff] }
  0x39   : > { %745 = vmatpush.bf16.msrb.mxu1 %v2721_v57  ;;  %v2757_v57 = vld [vmem:[%s3309_s1 + $0x260] sm:$0xff] }
  0x3a   : > { %842 = vmatpush.bf16.msrb.mxu2 %v2730_v58  ;;  %v2766_v58 = vld [vmem:[%s3309_s1 + $0x2a0] sm:$0xff] }
  0x3b   : > { %939 = vmatpush.bf16.msrb.mxu3 %v2739_v59  ;;  %v2775_v59 = vld [vmem:[%s3309_s1 + $0x2e0] sm:$0xff] }
  0x3c   : > { %649 = vmatpush.bf16.msrb.mxu0 %v2711_v60  ;;  %v2747_v60 = vld [vmem:[%s3309_s1 + $0x218] sm:$0xff] }
  0x3d   : > { %746 = vmatpush.bf16.msrb.mxu1 %v2720_v61  ;;  %v2756_v61 = vld [vmem:[%s3309_s1 + $0x258] sm:$0xff] }
  0x3e   : > { %843 = vmatpush.bf16.msrb.mxu2 %v2729_v62  ;;  %v2765_v62 = vld [vmem:[%s3309_s1 + $0x298] sm:$0xff] }
  0x3f   : > { %940 = vmatpush.bf16.msrb.mxu3 %v2738_v63  ;;  %v2774_v63 = vld [vmem:[%s3309_s1 + $0x2d8] sm:$0xff] }
  0x40   : > { %650 = vmatpush.bf16.msrb.mxu0 %v2710_v8  ;;  %v2258_v8 = vld [vmem:[%s2960_s28] sm:$0x8] }
  0x41   : > { %747 = vmatpush.bf16.msrb.mxu1 %v2719_v9  ;;  %v2743_v9 = vld [vmem:[%s2960_s28] sm:$0xf0] }
  0x42   : > { %844 = vmatpush.bf16.msrb.mxu2 %v2728_v12  ;;  %v2312_v12 = vld [vmem:[%s2960_s28 + $0xc] sm:$0x8]  ;;  %v2259_v18 = vor.u32 %v2743_v9, %v2258_v8 }
  0x43   : > { %941 = vmatpush.bf16.msrb.mxu3 %v2737_v13  ;;  %v2752_v13 = vld [vmem:[%s2960_s28 + $0xc] sm:$0xf0] }
  0x44   : > { %651 = vmatpush.bf16.msrb.mxu0 %v2709_v16  ;;  %v2744_v16 = vld [vmem:[%s3309_s1 + $0x200] sm:$0xff] }
  0x45   : > { %748 = vmatpush.bf16.msrb.mxu1 %v2718_v17  ;;  %v2753_v17 = vld [vmem:[%s3309_s1 + $0x240] sm:$0xff] }
  0x46   : > { %845 = vmatpush.bf16.msrb.mxu2 %v2727_v22  ;;  %v2313_v22 = vor.u32 %v2752_v13, %v2312_v12  ;;  %v2780_v12 = vld [vmem:[%s3309_s1 + $0x300] sm:$0xff] }
  0x47   : > { %942 = vmatpush.bf16.msrb.mxu3 %v2736_v23  ;;  %v2421_v23 = vor.u32 %v2770_v15, %v2420_v14  ;;  %v2789_v13 = vld [vmem:[%s3309_s1 + $0x340] sm:$0xff] }
  0x48   : > { %652 = vmatpush.bf16.msrb.mxu0 %v2708_v28  ;;  %v976_v28 = vrot.slane %v2259_v18, 3  ;;  %v1066_v30 = vrot.slane %v2313_v22, 3  ;;  %v2798_v18 = vld [vmem:[%s3309_s1 + $0x380] sm:$0xff] }
  0x49   : > { %749 = vmatpush.bf16.msrb.mxu1 %v2717_v29  ;;  %v1156_v29 = vrot.slane %v2367_v19, 3  ;;  %v1246_v31 = vrot.slane %v2421_v23, 3  ;;  %v2807_v19 = vld [vmem:[%s3309_s1 + $0x3c0] sm:$0xff] }
  0x4a   : > { %846 = vmatpush.bf16.msrb.mxu2 %v2726_v34  ;;  %v2804_v34 = vld [vmem:[%s3309_s1 + $0x3b0] sm:$0xff] }
  0x4b   : > { %943 = vmatpush.bf16.msrb.mxu3 %v2735_v35  ;;  %653 = vmatmul.bf16.vlgmr.msrb.gmra.mxu0 %v595_v44  ;;  %v2813_v35 = vld [vmem:[%s3309_s1 + $0x3f0] sm:$0xff]  ;;  %v2783_v44 = vld [vmem:[%s3309_s1 + $0x318] sm:$0xff] }
  0x4c   : > { %1026 = vmatpush.bf16.msra.mxu0 %v2751_v40  ;;  %750 = vmatmul.bf16.vlgmr.msrb.gmra.mxu1 %v692_v46  ;;  %v2784_v40 = vld [vmem:[%s3309_s1 + $0x320] sm:$0xff]  ;;  %v2801_v46 = vld [vmem:[%s3309_s1 + $0x398] sm:$0xff] }
  0x4d   : > { %1116 = vmatpush.bf16.msra.mxu1 %v2760_v41  ;;  %847 = vmatmul.bf16.vlgmr.msrb.gmra.mxu2 %v789_v45  ;;  %v2793_v41 = vld [vmem:[%s3309_s1 + $0x360] sm:$0xff]  ;;  %v2792_v45 = vld [vmem:[%s3309_s1 + $0x358] sm:$0xff] }
  0x4e   : > { %1206 = vmatpush.bf16.msra.mxu2 %v2769_v42  ;;  %944 = vmatmul.bf16.vlgmr.msrb.gmra.mxu3 %v886_v47  ;;  %v2802_v42 = vld [vmem:[%s3309_s1 + $0x3a0] sm:$0xff]  ;;  %v2810_v47 = vld [vmem:[%s3309_s1 + $0x3d8] sm:$0xff] }
  0x4f   : > { %1296 = vmatpush.bf16.msra.mxu3 %v2778_v43  ;;  %v2811_v43 = vld [vmem:[%s3309_s1 + $0x3e0] sm:$0xff] }
  0x50   : > { %1027 = vmatpush.bf16.msra.mxu0 %v2750_v48  ;;  %v2472_v48 = vld [vmem:[%s2960_s28 + $0x4] sm:$0xf] }
  0x51   : > { %1117 = vmatpush.bf16.msra.mxu1 %v2759_v49  ;;  %v2779_v49 = vld [vmem:[%s2960_s28 + $0x4] sm:$0x10] }
  0x52   : > { %1207 = vmatpush.bf16.msra.mxu2 %v2768_v50  ;;  %v2526_v50 = vld [vmem:[%s2960_s28 + $0x10] sm:$0xf] }
  0x53   : > { %1297 = vmatpush.bf16.msra.mxu3 %v2777_v51  ;;  %v2788_v51 = vld [vmem:[%s2960_s28 + $0x10] sm:$0x10] }
  0x54   : > { %1028 = vmatpush.bf16.msra.mxu0 %v2749_v52  ;;  %v2580_v52 = vld [vmem:[%s2960_s28 + $0x1c] sm:$0xf] }
  0x55   : > { %1118 = vmatpush.bf16.msra.mxu1 %v2758_v53  ;;  %v2797_v53 = vld [vmem:[%s2960_s28 + $0x1c] sm:$0x10] }
  0x56   : > { %1208 = vmatpush.bf16.msra.mxu2 %v2767_v54  ;;  %v2634_v54 = vld [vmem:[%s2960_s28 + $0x28] sm:$0xf] }
  0x57   : > { %1298 = vmatpush.bf16.msra.mxu3 %v2776_v55  ;;  %v2806_v55 = vld [vmem:[%s2960_s28 + $0x28] sm:$0x10]  ;;  %s1827_s28 = sshll.u32 %s3314_s16, 1 }
  0x58   : > { %1029 = vmatpush.bf16.msra.mxu0 %v2748_v56  ;;  %v2473_v56 = vor.u32 %v2779_v49, %v2472_v48  ;;  %s208_s29 = scalar_lea.vmem %s3312_s4, %s1827_s28 }
  0x59   : > { %1119 = vmatpush.bf16.msra.mxu1 %v2757_v57  ;;  %v2527_v57 = vor.u32 %v2788_v51, %v2526_v50 }
  0x5a   : > { %1209 = vmatpush.bf16.msra.mxu2 %v2766_v58  ;;  %v2782_v58 = vld [vmem:[%s3309_s1 + $0x310] sm:$0xff]  ;;  %v1337_v8 = vshrl.u32 %v2473_v56, 16 }
  0x5b   : > { %1299 = vmatpush.bf16.msra.mxu3 %v2775_v59  ;;  %v2791_v59 = vld [vmem:[%s3309_s1 + $0x350] sm:$0xff]  ;;  %v1433_v10 = vshrl.u32 %v2527_v57, 16 }
  0x5c   : > { %1030 = vmatpush.bf16.msra.mxu0 %v2747_v60  ;;  %v2581_v60 = vor.u32 %v2797_v53, %v2580_v52 }
  0x5d   : > { %1120 = vmatpush.bf16.msra.mxu1 %v2756_v61  ;;  %v2635_v61 = vor.u32 %v2806_v55, %v2634_v54 }
  0x5e   : > { %1210 = vmatpush.bf16.msra.mxu2 %v2765_v62  ;;  %v2800_v62 = vld [vmem:[%s3309_s1 + $0x390] sm:$0xff]  ;;  %v1529_v14 = vshrl.u32 %v2581_v60, 16 }
  0x5f   : > { %1300 = vmatpush.bf16.msra.mxu3 %v2774_v63  ;;  %v2809_v63 = vld [vmem:[%s3309_s1 + $0x3d0] sm:$0xff] }
  0x60   : > { %1031 = vmatpush.bf16.msra.mxu0 %v2746_v0  ;;  %v1339_v0 = vshll.u32 %v2473_v56, 16 }
  0x61   : > { %1121 = vmatpush.bf16.msra.mxu1 %v2755_v1  ;;  %v1435_v1 = vshll.u32 %v2527_v57, 16 }
  0x62   : > { %1211 = vmatpush.bf16.msra.mxu2 %v2764_v2  ;;  %v2781_v2 = vld [vmem:[%s3309_s1 + $0x308] sm:$0xff]  ;;  %v1341_v9 = vrot.slane %v1339_v0, 1 }
  0x63   : > { %1301 = vmatpush.bf16.msra.mxu3 %v2773_v3  ;;  %v2790_v3 = vld [vmem:[%s3309_s1 + $0x348] sm:$0xff]  ;;  %v1437_v11 = vrot.slane %v1435_v1, 1 }
  0x64   : > { %1032 = vmatpush.bf16.msra.mxu0 %v2745_v4  ;;  %v1531_v4 = vshll.u32 %v2581_v60, 16 }
  0x65   : > { %1122 = vmatpush.bf16.msra.mxu1 %v2754_v5  ;;  %v1627_v5 = vshll.u32 %v2635_v61, 16 }
  0x66   : > { %1212 = vmatpush.bf16.msra.mxu2 %v2763_v6  ;;  %v2799_v6 = vld [vmem:[%s3309_s1 + $0x388] sm:$0xff]  ;;  %v1533_v15 = vrot.slane %v1531_v4, 1 }
  0x67   : > { %1302 = vmatpush.bf16.msra.mxu3 %v2772_v7  ;;  %v2808_v7 = vld [vmem:[%s3309_s1 + $0x3c8] sm:$0xff] }
  0x68   : > { %1033 = vmatpush.bf16.msra.mxu0 %v2744_v16  ;;  %v1625_v16 = vshrl.u32 %v2635_v61, 16  ;;  %v1534_v22 = vor.u32 %v1533_v15, %v1529_v14 }
  0x69   : > { %1123 = vmatpush.bf16.msra.mxu1 %v2753_v17  ;;  %v1629_v17 = vrot.slane %v1627_v5, 1 }
  0x6a   : > { %1213 = vmatpush.bf16.msra.mxu2 %v2762_v20  ;;  %v1342_v20 = vor.u32 %v1341_v9, %v1337_v8 }
  0x6b   : > { %1303 = vmatpush.bf16.msra.mxu3 %v2771_v21  ;;  %1034 = vmatmul.bf16.vlgmr.msra.gmra.mxu0 %v976_v28  ;;  %v1438_v21 = vor.u32 %v1437_v11, %v1433_v10  ;;  %v1630_v23 = vor.u32 %v1629_v17, %v1625_v16 }
  0x6c   : > { %1392 = vmatpush.bf16.msrb.mxu0 %v2787_v24  ;;  %1124 = vmatmul.bf16.vlgmr.msra.gmra.mxu1 %v1066_v30 }
  0x6d   : > { %1488 = vmatpush.bf16.msrb.mxu1 %v2796_v25  ;;  %1214 = vmatmul.bf16.vlgmr.msra.gmra.mxu2 %v1156_v29 }
  0x6e   : > { %1584 = vmatpush.bf16.msrb.mxu2 %v2805_v26  ;;  %1304 = vmatmul.bf16.vlgmr.msra.gmra.mxu3 %v1246_v31 }
  0x6f   : > { %1680 = vmatpush.bf16.msrb.mxu3 %v2814_v27 }
  0x70   : > { %1393 = vmatpush.bf16.msrb.mxu0 %v2786_v32 }
  0x71   : > { %1489 = vmatpush.bf16.msrb.mxu1 %v2795_v33 }
  0x72   : > { %1585 = vmatpush.bf16.msrb.mxu2 %v2804_v34 }
  0x73   : > { %1681 = vmatpush.bf16.msrb.mxu3 %v2813_v35 }
  0x74   : > { %1394 = vmatpush.bf16.msrb.mxu0 %v2785_v36 }
  0x75   : > { %1490 = vmatpush.bf16.msrb.mxu1 %v2794_v37 }
  0x76   : > { %1586 = vmatpush.bf16.msrb.mxu2 %v2803_v38 }
  0x77   : > { %1682 = vmatpush.bf16.msrb.mxu3 %v2812_v39 }
  0x78   : > { %1395 = vmatpush.bf16.msrb.mxu0 %v2784_v40 }
  0x79   : > { %1491 = vmatpush.bf16.msrb.mxu1 %v2793_v41 }
  0x7a   : > { %1587 = vmatpush.bf16.msrb.mxu2 %v2802_v42 }
  0x7b   : > { %1683 = vmatpush.bf16.msrb.mxu3 %v2811_v43 }
  0x7c   : > { %1396 = vmatpush.bf16.msrb.mxu0 %v2783_v44 }
  0x7d   : > { %1492 = vmatpush.bf16.msrb.mxu1 %v2792_v45 }
  0x7e   : > { %1588 = vmatpush.bf16.msrb.mxu2 %v2801_v46 }
  0x7f   : > { %1684 = vmatpush.bf16.msrb.mxu3 %v2810_v47 }
  0x80   : > { %1397 = vmatpush.bf16.msrb.mxu0 %v2782_v58 }
  0x81   : > { %1493 = vmatpush.bf16.msrb.mxu1 %v2791_v59 }
  0x82   : > { %1589 = vmatpush.bf16.msrb.mxu2 %v2800_v62 }
  0x83   : > { %1685 = vmatpush.bf16.msrb.mxu3 %v2809_v63 }
  0x84   : > { %1398 = vmatpush.bf16.msrb.mxu0 %v2781_v2 }
  0x85   : > { %1494 = vmatpush.bf16.msrb.mxu1 %v2790_v3 }
  0x86   : > { %1590 = vmatpush.bf16.msrb.mxu2 %v2799_v6 }
  0x87   : > { %1686 = vmatpush.bf16.msrb.mxu3 %v2808_v7 }
  0x88   : > { %1399 = vmatpush.bf16.msrb.mxu0 %v2780_v12 }
  0x89   : > { %1495 = vmatpush.bf16.msrb.mxu1 %v2789_v13  ;;  %v2824_v13 = vld [vmem:[%s3310_s2] ss:$0 sm:$0xff] }
  0x8a   : > { %1591 = vmatpush.bf16.msrb.mxu2 %v2798_v18 }
  0x8b   : > { %1687 = vmatpush.bf16.msrb.mxu3 %v2807_v19  ;;  %1400 = vmatmul.bf16.vlgmr.msrb.gmra.mxu0 %v1342_v20 }
  0x8c   : > { %1496 = vmatmul.bf16.vlgmr.msrb.gmra.mxu1 %v1438_v21 }
  0x8d   : > { %1592 = vmatmul.bf16.vlgmr.msrb.gmra.mxu2 %v1534_v22 }
  0x8e   : > { %1688 = vmatmul.bf16.vlgmr.msrb.gmra.mxu3 %v1630_v23 }
  0xa8   : > { %v311_v24 = vpop.f32.mrf.mxu0 }
  0xa9   : > { %v379_v25 = vpop.f32.mrf.mxu1 }
  0xaa   : > { %v380_v32 = vadd.f32 %v379_v25, %v311_v24 }
  0xb0   : > { %v467_v26 = vpop.f32.mrf.mxu2  ;;  %v313_v28 = vpop.f32.mrf.mxu0 }
  0xb1   : > { %v557_v27 = vpop.f32.mrf.mxu3  ;;  %v381_v29 = vpop.f32.mrf.mxu1  ;;  %v472_v35 = vadd.f32 %v467_v26, %v380_v32  ;;  %v1728_v26 = vld [vmem:[%s204_s25 + $0x4] sm:$0x1] }
  0xb2   : > { %v382_v40 = vadd.f32 %v381_v29, %v313_v28 }
  0xb3   : > { %v562_v38 = vadd.f32 %v557_v27, %v472_v35 }
  0xb8   : > { %v469_v30 = vpop.f32.mrf.mxu2 }
  0xb9   : > { %v559_v31 = vpop.f32.mrf.mxu3  ;;  %v473_v43 = vadd.f32 %v469_v30, %v382_v40 }
  0xbb   : > { %v563_v48 = vadd.f32 %v559_v31, %v473_v43 }
  0xc8   : > { %v654_v33 = vpop.f32.mrf.mxu0 }
  0xc9   : > { %v751_v34 = vpop.f32.mrf.mxu1  ;;  %v659_v41 = vadd.f32 %v654_v33, %v562_v38 }
  0xcb   : > { %v756_v44 = vadd.f32 %v751_v34, %v659_v41 }
  0xd0   : > { %v848_v36 = vpop.f32.mrf.mxu2  ;;  %v656_v39 = vpop.f32.mrf.mxu0 }
  0xd1   : > { %v945_v37 = vpop.f32.mrf.mxu3  ;;  %v753_v42 = vpop.f32.mrf.mxu1  ;;  %v853_v49 = vadd.f32 %v848_v36, %v756_v44  ;;  %v660_v51 = vadd.f32 %v656_v39, %v563_v48 }
  0xd3   : > { %v950_v52 = vadd.f32 %v945_v37, %v853_v49  ;;  %v757_v55 = vadd.f32 %v753_v42, %v660_v51 }
  0xd8   : > { %v850_v45 = vpop.f32.mrf.mxu2 }
  0xd9   : > { %v947_v46 = vpop.f32.mrf.mxu3  ;;  %v854_v57 = vadd.f32 %v850_v45, %v757_v55 }
  0xdb   : > { %v951_v61 = vadd.f32 %v947_v46, %v854_v57 }
  0xe8   : > { %v1035_v47 = vpop.f32.mrf.mxu0 }
  0xe9   : > { %v1125_v50 = vpop.f32.mrf.mxu1  ;;  %v1040_v56 = vadd.f32 %v1035_v47, %v950_v52 }
  0xeb   : > { %v1130_v59 = vadd.f32 %v1125_v50, %v1040_v56 }
  0xf0   : > { %v1215_v53 = vpop.f32.mrf.mxu2  ;;  %v1037_v58 = vpop.f32.mrf.mxu0 }
  0xf1   : > { %v1305_v54 = vpop.f32.mrf.mxu3  ;;  %v1127_v60 = vpop.f32.mrf.mxu1  ;;  %v1220_v62 = vadd.f32 %v1215_v53, %v1130_v59  ;;  %v1041_v63 = vadd.f32 %v1037_v58, %v951_v61 }
  0xf3   : > { %v1310_v2 = vadd.f32 %v1305_v54, %v1220_v62  ;;  %v1131_v4 = vadd.f32 %v1127_v60, %v1041_v63 }
  0xf8   : > { %v1217_v0 = vpop.f32.mrf.mxu2 }
  0xf9   : > { %v1307_v1 = vpop.f32.mrf.mxu3  ;;  %v1221_v7 = vadd.f32 %v1217_v0, %v1131_v4 }
  0xfb   : > { %v1311_v11 = vadd.f32 %v1307_v1, %v1221_v7 }
 0x108   : > { %v1401_v3 = vpop.f32.mrf.mxu0 }
 0x109   : > { %v1406_v5 = vadd.f32 %v1401_v3, %v1310_v2  ;;  %v1497_v6 = vpop.f32.mrf.mxu1 }
 0x10b   : > { %v1502_v8 = vadd.f32 %v1497_v6, %v1406_v5 }
 0x110   : > { %v1593_v9 = vpop.f32.mrf.mxu2  ;;  %v1403_v14 = vpop.f32.mrf.mxu0 }
 0x111   : > { %v1689_v10 = vpop.f32.mrf.mxu3  ;;  %v1598_v12 = vadd.f32 %v1593_v9, %v1502_v8  ;;  %v1407_v16 = vadd.f32 %v1403_v14, %v1311_v11  ;;  %v1499_v18 = vpop.f32.mrf.mxu1 }
 0x113   : > { %v1694_v15 = vadd.f32 %v1689_v10, %v1598_v12  ;;  %v1503_v20 = vadd.f32 %v1499_v18, %v1407_v16 }
 0x115   : > { %v1699_v17 = vadd.f32 %v2824_v13, %v1694_v15 }
 0x117   : > { %v1722_v19 = vpack.c.bf16 %v1699_v17, %v1699_v17  ;;  %v1711_v30 = vmul.f32 %v1699_v17, %v1699_v17 }
 0x118   : > { %v1595_v21 = vpop.f32.mrf.mxu2 }
 0x119   : > { %1724 = vst [vmem:[%s204_s25] sm:$0xf] %v1722_v19  ;;  %v1599_v22 = vadd.f32 %v1595_v21, %v1503_v20  ;;  %v1691_v23 = vpop.f32.mrf.mxu3 }
 0x11b   : > { %v1695_v24 = vadd.f32 %v1691_v23, %v1599_v22 }
 0x11d   : > { %v1700_v25 = vadd.f32 %v2824_v13, %v1695_v24 }
 0x11f   : > { %v1702_v27 = vsel %vm1701_vm0, %v1700_v25, 0.0  ;;  %v1712_v28 = vmul.f32 %v1700_v25, %v1700_v25  ;;  %v1723_v29 = vpack.c.bf16 %v1700_v25, %v1700_v25 }
 0x120   : > { %v1703_v31 = vadd.f32 %v1702_v27, %v1699_v17 }
 0x121   : > { %v1713_v32 = vsel %vm1701_vm0, %v1712_v28, 0.0  ;;  %v1729_v33 = vsel %vm1727_vm2, %v1723_v29, %v1728_v26 }
 0x122   : > { %v1704_v34 = vrot.slane %v1703_v31, 4  ;;  %v1714_v35 = vadd.f32 %v1713_v32, %v1711_v30  ;;  %1730 = vst [vmem:[%s204_s25 + $0x4] sm:$0x1] %v1729_v33 }
 0x124   : > { %v1705_v36 = vadd.f32 %v1704_v34, %v1703_v31  ;;  %v1715_v37 = vrot.slane %v1714_v35, 4 }
 0x126   : > { %v1706_v38 = vrot.slane %v1705_v36, 2  ;;  %v1716_v39 = vadd.f32 %v1715_v37, %v1714_v35 }
 0x128   : > { %v1707_v40 = vadd.f32 %v1706_v38, %v1705_v36  ;;  %v1717_v41 = vrot.slane %v1716_v39, 2 }
 0x12a   : > { %v1708_v42 = vrot.slane %v1707_v40, 1  ;;  %v1718_v43 = vadd.f32 %v1717_v41, %v1716_v39 }
 0x12c   : > { %v1709_v44 = vadd.f32 %v1708_v42, %v1707_v40  ;;  %v1719_v45 = vrot.slane %v1718_v43, 1 }
 0x12e   : > { %v1720_v46 = vadd.f32 %v1719_v45, %v1718_v43  ;;  %1731 = vst [vmem:[%s208_s29] sm:$0x1] %v1709_v44 }
 0x130   : > { %1732 = vst [vmem:[%s208_s29 + $0x1] sm:$0x1] %v1720_v46 }
 0x131 PF: > { %s15_s15 = sadd.s32 1, %s2831_s15  }
 0x132   : > { %p12_p4 = scmp.ge.s32.totalorder %s15_s15, 4  }
 0x134   :  { %14 = sbr.rel (!%p12_p4) target bundleno = 1 (0x1), region = 92 }

// kernel: discriminator_forward.15
= control target key start
LH: loop header
LB: loop body
LE: loop exit
PB: predicated region body
PF: predicated region fallthrough
CT: control target
= control target key end

     0   :  { %s2543_s12 = smov 0   ;;  %s2977_s0 = inlined_call_operand.vmem [shape: bf16[2,4,10,128], index: 0, kind: input, shape index: {}]   ;;  %s2978_s1 = inlined_call_operand.vmem [shape: bf16[16,128,128], index: 1, kind: input, shape index: {}]   ;;  %s2979_s2 = inlined_call_operand.vmem [shape: f32[1,128], index: 2, kind: input, shape index: {}]   ;;  %s2980_s3 = inlined_call_operand.vmem [shape: f32[2,4,128], index: 3, kind: output, shape index: {}]  }
   0x1 LB: > { %s1580_s13 = sadd.s32 4294967295, %s2521_s12   ;;  %p1584_p0 = scmp.ge.s32.totalorder %s2521_s12, 1  ;;  %s2521_s12 = sphi %s2543_s12, %s13_s12  }
   0x2   : > { %p137_p1 = scmp.lt.s32.totalorder %s2521_s12, 3 }
   0x4   : > { %p138_p2 = pnand %p1584_p0, %p137_p1 }
   0x5   : > { %p160_p3 = scmp.lt.s32.totalorder (!%p138_p2), %s1580_s13, 1 }
   0x6   : > { %141 = sbr.rel (%p138_p2) target bundleno = 282 (0x11a), region = 32 }
   0xb   : > { %v2389_v0 = vld [vmem:[%s2978_s1 + $0x78] sm:$0xff]  ;;  %v2388_v4 = vld [vmem:[%s2978_s1 + $0x70] sm:$0xff]  ;;  %v2387_v8 = vld [vmem:[%s2978_s1 + $0x68] sm:$0xff]  ;;  %s2982_s13 = smov (!%p160_p3, %s1580_s13), 1 }
   0xc   : > { %v2381_v1 = vld [vmem:[%s2978_s1 + $0x38] sm:$0xff]  ;;  %254 = vmatpush.bf16.msra.mxu0 %v2389_v0  ;;  %v2380_v5 = vld [vmem:[%s2978_s1 + $0x30] sm:$0xff]  ;;  %v2379_v9 = vld [vmem:[%s2978_s1 + $0x28] sm:$0xff]  ;;  %s2373_s20 = sshll.u32 %s2982_s13, 5  ;;  %s1587_s30 = sshll.u32 %s2982_s13, 2 }
   0xd   : > { %v2397_v2 = vld [vmem:[%s2978_s1 + $0xb8] sm:$0xff]  ;;  %315 = vmatpush.bf16.msra.mxu1 %v2381_v1  ;;  %v2396_v6 = vld [vmem:[%s2978_s1 + $0xb0] sm:$0xff]  ;;  %v2395_v10 = vld [vmem:[%s2978_s1 + $0xa8] sm:$0xff]  ;;  %s2663_s8 = scalar_lea.vmem %s2977_s0, %s2373_s20  ;;  %s168_s9 = scalar_lea.vmem %s2980_s3, %s1587_s30 }
   0xe   : > { %v2405_v3 = vld [vmem:[%s2978_s1 + $0xf8] sm:$0xff]  ;;  %395 = vmatpush.bf16.msra.mxu2 %v2397_v2  ;;  %v2404_v7 = vld [vmem:[%s2978_s1 + $0xf0] sm:$0xff]  ;;  %v2403_v11 = vld [vmem:[%s2978_s1 + $0xe8] sm:$0xff] }
   0xf   : > { %476 = vmatpush.bf16.msra.mxu3 %v2405_v3  ;;  %v2386_v12 = vld [vmem:[%s2978_s1 + $0x60] sm:$0xff]  ;;  %v2385_v16 = vld [vmem:[%s2978_s1 + $0x58] sm:$0xff]  ;;  %v2384_v20 = vld [vmem:[%s2978_s1 + $0x50] sm:$0xff] }
  0x10   : > { %255 = vmatpush.bf16.msra.mxu0 %v2388_v4  ;;  %v2378_v13 = vld [vmem:[%s2978_s1 + $0x20] sm:$0xff]  ;;  %v2377_v17 = vld [vmem:[%s2978_s1 + $0x18] sm:$0xff]  ;;  %v2376_v21 = vld [vmem:[%s2978_s1 + $0x10] sm:$0xff] }
  0x11   : > { %316 = vmatpush.bf16.msra.mxu1 %v2380_v5  ;;  %v2394_v14 = vld [vmem:[%s2978_s1 + $0xa0] sm:$0xff]  ;;  %v2393_v18 = vld [vmem:[%s2978_s1 + $0x98] sm:$0xff]  ;;  %v2392_v22 = vld [vmem:[%s2978_s1 + $0x90] sm:$0xff] }
  0x12   : > { %396 = vmatpush.bf16.msra.mxu2 %v2396_v6  ;;  %v2402_v15 = vld [vmem:[%s2978_s1 + $0xe0] sm:$0xff]  ;;  %v2401_v19 = vld [vmem:[%s2978_s1 + $0xd8] sm:$0xff]  ;;  %v2400_v23 = vld [vmem:[%s2978_s1 + $0xd0] sm:$0xff] }
  0x13   : > { %477 = vmatpush.bf16.msra.mxu3 %v2404_v7  ;;  %v2383_v24 = vld [vmem:[%s2978_s1 + $0x48] sm:$0xff]  ;;  %v2382_v28 = vld [vmem:[%s2978_s1 + $0x40] sm:$0xff]  ;;  %v2413_v32 = vld [vmem:[%s2978_s1 + $0x138] sm:$0xff] }
  0x14   : > { %256 = vmatpush.bf16.msra.mxu0 %v2387_v8  ;;  %v2375_v25 = vld [vmem:[%s2978_s1 + $0x8] sm:$0xff]  ;;  %v2374_v29 = vld [vmem:[%s2978_s1] sm:$0xff]  ;;  %v2421_v33 = vld [vmem:[%s2978_s1 + $0x178] sm:$0xff] }
  0x15   : > { %317 = vmatpush.bf16.msra.mxu1 %v2379_v9  ;;  %v2391_v26 = vld [vmem:[%s2978_s1 + $0x88] sm:$0xff]  ;;  %v2390_v30 = vld [vmem:[%s2978_s1 + $0x80] sm:$0xff]  ;;  %v2429_v34 = vld [vmem:[%s2978_s1 + $0x1b8] sm:$0xff] }
  0x16   : > { %397 = vmatpush.bf16.msra.mxu2 %v2395_v10  ;;  %v2399_v27 = vld [vmem:[%s2978_s1 + $0xc8] sm:$0xff]  ;;  %v2398_v31 = vld [vmem:[%s2978_s1 + $0xc0] sm:$0xff]  ;;  %v2437_v35 = vld [vmem:[%s2978_s1 + $0x1f8] sm:$0xff] }
  0x17   : > { %478 = vmatpush.bf16.msra.mxu3 %v2403_v11  ;;  %v2412_v36 = vld [vmem:[%s2978_s1 + $0x130] sm:$0xff]  ;;  %v1588_v38 = vld [vmem:[%s2663_s8 + $0x8] sm:$0x3]  ;;  %v1718_v40 = vld [vmem:[%s2663_s8 + $0x18] sm:$0x3] }
  0x18   : > { %257 = vmatpush.bf16.msra.mxu0 %v2386_v12  ;;  %v1669_v37 = vld [vmem:[%s2663_s8 + $0x10] sm:$0x3]  ;;  %v170_v41 = vld [vmem:[%s2663_s8] sm:$0x3]  ;;  %v2411_v44 = vld [vmem:[%s2978_s1 + $0x128] sm:$0xff] }
  0x19   : > { %318 = vmatpush.bf16.msra.mxu1 %v2378_v13  ;;  %v2420_v39 = vld [vmem:[%s2978_s1 + $0x170] sm:$0xff]  ;;  %v2419_v45 = vld [vmem:[%s2978_s1 + $0x168] sm:$0xff]  ;;  %v2410_v48 = vld [vmem:[%s2978_s1 + $0x120] sm:$0xff] }
  0x1a   : > { %398 = vmatpush.bf16.msra.mxu2 %v2394_v14  ;;  %v2428_v42 = vld [vmem:[%s2978_s1 + $0x1b0] sm:$0xff]  ;;  %v2427_v46 = vld [vmem:[%s2978_s1 + $0x1a8] sm:$0xff]  ;;  %v2418_v49 = vld [vmem:[%s2978_s1 + $0x160] sm:$0xff] }
  0x1b   : > { %479 = vmatpush.bf16.msra.mxu3 %v2402_v15  ;;  %v2436_v43 = vld [vmem:[%s2978_s1 + $0x1f0] sm:$0xff]  ;;  %v2435_v47 = vld [vmem:[%s2978_s1 + $0x1e8] sm:$0xff]  ;;  %v2426_v50 = vld [vmem:[%s2978_s1 + $0x1a0] sm:$0xff] }
  0x1c   : > { %258 = vmatpush.bf16.msra.mxu0 %v2385_v16  ;;  %v2434_v51 = vld [vmem:[%s2978_s1 + $0x1e0] sm:$0xff]  ;;  %v2409_v52 = vld [vmem:[%s2978_s1 + $0x118] sm:$0xff]  ;;  %v2408_v56 = vld [vmem:[%s2978_s1 + $0x110] sm:$0xff] }
  0x1d   : > { %319 = vmatpush.bf16.msra.mxu1 %v2377_v17  ;;  %v2417_v53 = vld [vmem:[%s2978_s1 + $0x158] sm:$0xff]  ;;  %v2416_v57 = vld [vmem:[%s2978_s1 + $0x150] sm:$0xff]  ;;  %v490_v61 = vld [vmem:[%s2663_s8] sm:$0x6] }
  0x1e   : > { %399 = vmatpush.bf16.msra.mxu2 %v2393_v18  ;;  %v2425_v54 = vld [vmem:[%s2978_s1 + $0x198] sm:$0xff]  ;;  %v2424_v58 = vld [vmem:[%s2978_s1 + $0x190] sm:$0xff]  ;;  %v1815_v63 = vld [vmem:[%s2663_s8 + $0x8] sm:$0x6]  ;;  %v509_v3 = vunpack.c.l.b16 %v490_v61 }
  0x1f   : > { %480 = vmatpush.bf16.msra.mxu3 %v2401_v19  ;;  %v2433_v55 = vld [vmem:[%s2978_s1 + $0x1d8] sm:$0xff]  ;;  %v2432_v59 = vld [vmem:[%s2978_s1 + $0x1d0] sm:$0xff]  ;;  %v2407_v0 = vld [vmem:[%s2978_s1 + $0x108] sm:$0xff]  ;;  %v594_v7 = vunpack.c.l.b16 %v1815_v63 }
  0x20   : > { %259 = vmatpush.bf16.msra.mxu0 %v2384_v20  ;;  %v1864_v60 = vld [vmem:[%s2663_s8 + $0x10] sm:$0x6]  ;;  %v1913_v62 = vld [vmem:[%s2663_s8 + $0x18] sm:$0x6]  ;;  %v2415_v1 = vld [vmem:[%s2978_s1 + $0x148] sm:$0xff]  ;;  %v510_v11 = vpack.c.b16 %v509_v3, %v509_v3 }
  0x21   : > { %320 = vmatpush.bf16.msra.mxu1 %v2376_v21  ;;  %v679_v2 = vunpack.c.l.b16 %v1864_v60  ;;  %v2423_v4 = vld [vmem:[%s2978_s1 + $0x188] sm:$0xff]  ;;  %v764_v6 = vunpack.c.l.b16 %v1913_v62  ;;  %v2406_v8 = vld [vmem:[%s2978_s1 + $0x100] sm:$0xff]  ;;  %v595_v15 = vpack.c.b16 %v594_v7, %v594_v7  ;;  %v2445_v16 = vld [vmem:[%s2978_s1 + $0x238] sm:$0xff] }
  0x22   : > { %400 = vmatpush.bf16.msra.mxu2 %v2392_v22  ;;  %v2431_v5 = vld [vmem:[%s2978_s1 + $0x1c8] sm:$0xff]  ;;  %v2414_v9 = vld [vmem:[%s2978_s1 + $0x140] sm:$0xff]  ;;  %v2453_v17 = vld [vmem:[%s2978_s1 + $0x278] sm:$0xff]  ;;  %v511_v21 = vrot.slane %v510_v11, 1 }
  0x23   : > { %481 = vmatpush.bf16.msra.mxu3 %v2400_v23  ;;  %v680_v10 = vpack.c.b16 %v679_v2, %v679_v2  ;;  %v2422_v12 = vld [vmem:[%s2978_s1 + $0x180] sm:$0xff]  ;;  %v765_v14 = vpack.c.b16 %v764_v6, %v764_v6  ;;  %v2461_v18 = vld [vmem:[%s2978_s1 + $0x2b8] sm:$0xff]  ;;  %v596_v23 = vrot.slane %v595_v15, 1  ;;  %v2504_v11 = vld [vmem:[%s2978_s1 + $0x3f0] sm:$0xff] }
  0x24   : > { %260 = vmatpush.bf16.msra.mxu0 %v2383_v24  ;;  %v2430_v13 = vld [vmem:[%s2978_s1 + $0x1c0] sm:$0xff]  ;;  %v2469_v19 = vld [vmem:[%s2978_s1 + $0x2f8] sm:$0xff]  ;;  %v2444_v24 = vld [vmem:[%s2978_s1 + $0x230] sm:$0xff] }
  0x25   : > { %321 = vmatpush.bf16.msra.mxu1 %v2375_v25  ;;  %v681_v20 = vrot.slane %v680_v10, 1  ;;  %v766_v22 = vrot.slane %v765_v14, 1  ;;  %v2452_v25 = vld [vmem:[%s2978_s1 + $0x270] sm:$0xff]  ;;  %v2454_v60 = vld [vmem:[%s2978_s1 + $0x280] sm:$0xff]  ;;  %v2496_v2 = vld [vmem:[%s2978_s1 + $0x3b8] sm:$0xff] }
  0x26   : > { %401 = vmatpush.bf16.msra.mxu2 %v2391_v26  ;;  %v2460_v26 = vld [vmem:[%s2978_s1 + $0x2b0] sm:$0xff]  ;;  %v2462_v61 = vld [vmem:[%s2978_s1 + $0x2c0] sm:$0xff]  ;;  %v2505_v3 = vld [vmem:[%s2978_s1 + $0x3f8] sm:$0xff] }
  0x27   : > { %482 = vmatpush.bf16.msra.mxu3 %v2399_v27  ;;  %v2468_v27 = vld [vmem:[%s2978_s1 + $0x2f0] sm:$0xff]  ;;  %v2494_v14 = vld [vmem:[%s2978_s1 + $0x3a8] sm:$0xff] }
  0x28   : > { %261 = vmatpush.bf16.msra.mxu0 %v2382_v28  ;;  %v2443_v28 = vld [vmem:[%s2978_s1 + $0x228] sm:$0xff]  ;;  %v2495_v10 = vld [vmem:[%s2978_s1 + $0x3b0] sm:$0xff] }
  0x29   : > { %322 = vmatpush.bf16.msra.mxu1 %v2374_v29  ;;  %v2451_v29 = vld [vmem:[%s2978_s1 + $0x268] sm:$0xff] }
  0x2a   : > { %402 = vmatpush.bf16.msra.mxu2 %v2390_v30  ;;  %v2459_v30 = vld [vmem:[%s2978_s1 + $0x2a8] sm:$0xff] }
  0x2b   : > { %483 = vmatpush.bf16.msra.mxu3 %v2398_v31  ;;  %262 = vmatmul.bf16.vlgmr.msra.gmra.mxu0 %v1588_v38  ;;  %v2467_v31 = vld [vmem:[%s2978_s1 + $0x2e8] sm:$0xff]  ;;  %v2457_v38 = vld [vmem:[%s2978_s1 + $0x298] sm:$0xff] }
  0x2c   : > { %561 = vmatpush.bf16.msrb.mxu0 %v2413_v32  ;;  %323 = vmatmul.bf16.vlgmr.msra.gmra.mxu1 %v170_v41  ;;  %v2442_v32 = vld [vmem:[%s2978_s1 + $0x220] sm:$0xff]  ;;  %v2448_v41 = vld [vmem:[%s2978_s1 + $0x250] sm:$0xff]  ;;  %v2503_v15 = vld [vmem:[%s2978_s1 + $0x3e8] sm:$0xff] }
  0x2d   : > { %646 = vmatpush.bf16.msrb.mxu1 %v2421_v33  ;;  %403 = vmatmul.bf16.vlgmr.msra.gmra.mxu2 %v1669_v37  ;;  %v2450_v33 = vld [vmem:[%s2978_s1 + $0x260] sm:$0xff]  ;;  %v2449_v37 = vld [vmem:[%s2978_s1 + $0x258] sm:$0xff] }
  0x2e   : > { %731 = vmatpush.bf16.msrb.mxu2 %v2429_v34  ;;  %484 = vmatmul.bf16.vlgmr.msra.gmra.mxu3 %v1718_v40  ;;  %v2458_v34 = vld [vmem:[%s2978_s1 + $0x2a0] sm:$0xff]  ;;  %v2440_v40 = vld [vmem:[%s2978_s1 + $0x210] sm:$0xff] }
  0x2f   : > { %816 = vmatpush.bf16.msrb.mxu3 %v2437_v35  ;;  %v2466_v35 = vld [vmem:[%s2978_s1 + $0x2e0] sm:$0xff] }
  0x30   : > { %562 = vmatpush.bf16.msrb.mxu0 %v2412_v36  ;;  %v2441_v36 = vld [vmem:[%s2978_s1 + $0x218] sm:$0xff] }
  0x31   : > { %647 = vmatpush.bf16.msrb.mxu1 %v2420_v39  ;;  %v2465_v39 = vld [vmem:[%s2978_s1 + $0x2d8] sm:$0xff] }
  0x32   : > { %732 = vmatpush.bf16.msrb.mxu2 %v2428_v42  ;;  %v2456_v42 = vld [vmem:[%s2978_s1 + $0x290] sm:$0xff] }
  0x33   : > { %817 = vmatpush.bf16.msrb.mxu3 %v2436_v43  ;;  %v2464_v43 = vld [vmem:[%s2978_s1 + $0x2d0] sm:$0xff] }
  0x34   : > { %563 = vmatpush.bf16.msrb.mxu0 %v2411_v44  ;;  %v830_v44 = vld [vmem:[%s2663_s8] sm:$0xc] }
  0x35   : > { %648 = vmatpush.bf16.msrb.mxu1 %v2419_v45  ;;  %v2059_v45 = vld [vmem:[%s2663_s8 + $0x10] sm:$0xc] }
  0x36   : > { %733 = vmatpush.bf16.msrb.mxu2 %v2427_v46  ;;  %v2010_v46 = vld [vmem:[%s2663_s8 + $0x8] sm:$0xc] }
  0x37   : > { %818 = vmatpush.bf16.msrb.mxu3 %v2435_v47  ;;  %v2108_v47 = vld [vmem:[%s2663_s8 + $0x18] sm:$0xc] }
  0x38   : > { %564 = vmatpush.bf16.msrb.mxu0 %v2410_v48  ;;  %v2439_v48 = vld [vmem:[%s2978_s1 + $0x208] sm:$0xff] }
  0x39   : > { %649 = vmatpush.bf16.msrb.mxu1 %v2418_v49  ;;  %v2447_v49 = vld [vmem:[%s2978_s1 + $0x248] sm:$0xff] }
  0x3a   : > { %734 = vmatpush.bf16.msrb.mxu2 %v2426_v50  ;;  %v849_v50 = vunpack.c.l.b16 %v830_v44 }
  0x3b   : > { %819 = vmatpush.bf16.msrb.mxu3 %v2434_v51  ;;  %v1019_v51 = vunpack.c.l.b16 %v2059_v45 }
  0x3c   : > { %565 = vmatpush.bf16.msrb.mxu0 %v2409_v52  ;;  %v2455_v52 = vld [vmem:[%s2978_s1 + $0x288] sm:$0xff] }
  0x3d   : > { %650 = vmatpush.bf16.msrb.mxu1 %v2417_v53  ;;  %v2463_v53 = vld [vmem:[%s2978_s1 + $0x2c8] sm:$0xff] }
  0x3e   : > { %735 = vmatpush.bf16.msrb.mxu2 %v2425_v54  ;;  %v934_v54 = vunpack.c.l.b16 %v2010_v46  ;;  %v2489_v46 = vld [vmem:[%s2978_s1 + $0x380] sm:$0xff] }
  0x3f   : > { %820 = vmatpush.bf16.msrb.mxu3 %v2433_v55  ;;  %v1104_v55 = vunpack.c.l.b16 %v2108_v47  ;;  %v2498_v47 = vld [vmem:[%s2978_s1 + $0x3c0] sm:$0xff] }
  0x40   : > { %566 = vmatpush.bf16.msrb.mxu0 %v2408_v56  ;;  %v2438_v56 = vld [vmem:[%s2978_s1 + $0x200] sm:$0xff]  ;;  %v935_v62 = vpack.c.b16 %v934_v54, %v934_v54 }
  0x41   : > { %651 = vmatpush.bf16.msrb.mxu1 %v2416_v57  ;;  %v2446_v57 = vld [vmem:[%s2978_s1 + $0x240] sm:$0xff]  ;;  %v1105_v63 = vpack.c.b16 %v1104_v55, %v1104_v55 }
  0x42   : > { %736 = vmatpush.bf16.msrb.mxu2 %v2424_v58  ;;  %v850_v58 = vpack.c.b16 %v849_v50, %v849_v50  ;;  %v936_v6 = vrot.slane %v935_v62, 2 }
  0x43   : > { %821 = vmatpush.bf16.msrb.mxu3 %v2432_v59  ;;  %v1020_v59 = vpack.c.b16 %v1019_v51, %v1019_v51  ;;  %v1106_v7 = vrot.slane %v1105_v63, 2 }
  0x44   : > { %567 = vmatpush.bf16.msrb.mxu0 %v2407_v0  ;;  %v2478_v0 = vld [vmem:[%s2978_s1 + $0x338] sm:$0xff] }
  0x45   : > { %652 = vmatpush.bf16.msrb.mxu1 %v2415_v1  ;;  %v2487_v1 = vld [vmem:[%s2978_s1 + $0x378] sm:$0xff] }
  0x46   : > { %737 = vmatpush.bf16.msrb.mxu2 %v2423_v4  ;;  %v851_v4 = vrot.slane %v850_v58, 2 }
  0x47   : > { %822 = vmatpush.bf16.msrb.mxu3 %v2431_v5  ;;  %v1021_v5 = vrot.slane %v1020_v59, 2 }
  0x48   : > { %568 = vmatpush.bf16.msrb.mxu0 %v2406_v8  ;;  %v2477_v8 = vld [vmem:[%s2978_s1 + $0x330] sm:$0xff] }
  0x49   : > { %653 = vmatpush.bf16.msrb.mxu1 %v2414_v9  ;;  %v2486_v9 = vld [vmem:[%s2978_s1 + $0x370] sm:$0xff] }
  0x4a   : > { %738 = vmatpush.bf16.msrb.mxu2 %v2422_v12  ;;  %v2476_v12 = vld [vmem:[%s2978_s1 + $0x328] sm:$0xff] }
  0x4b   : > { %823 = vmatpush.bf16.msrb.mxu3 %v2430_v13  ;;  %569 = vmatmul.bf16.vlgmr.msrb.gmra.mxu0 %v511_v21  ;;  %v2485_v13 = vld [vmem:[%s2978_s1 + $0x368] sm:$0xff]  ;;  %v2483_v21 = vld [vmem:[%s2978_s1 + $0x358] sm:$0xff] }
  0x4c   : > { %901 = vmatpush.bf16.msra.mxu0 %v2445_v16  ;;  %654 = vmatmul.bf16.vlgmr.msrb.gmra.mxu1 %v596_v23  ;;  %v2475_v16 = vld [vmem:[%s2978_s1 + $0x320] sm:$0xff]  ;;  %v2501_v23 = vld [vmem:[%s2978_s1 + $0x3d8] sm:$0xff] }
  0x4d   : > { %986 = vmatpush.bf16.msra.mxu1 %v2453_v17  ;;  %739 = vmatmul.bf16.vlgmr.msrb.gmra.mxu2 %v681_v20  ;;  %v2484_v17 = vld [vmem:[%s2978_s1 + $0x360] sm:$0xff]  ;;  %v2474_v20 = vld [vmem:[%s2978_s1 + $0x318] sm:$0xff] }
  0x4e   : > { %1071 = vmatpush.bf16.msra.mxu2 %v2461_v18  ;;  %824 = vmatmul.bf16.vlgmr.msrb.gmra.mxu3 %v766_v22  ;;  %v2493_v18 = vld [vmem:[%s2978_s1 + $0x3a0] sm:$0xff]  ;;  %v2492_v22 = vld [vmem:[%s2978_s1 + $0x398] sm:$0xff] }
  0x4f   : > { %1156 = vmatpush.bf16.msra.mxu3 %v2469_v19  ;;  %v2502_v19 = vld [vmem:[%s2978_s1 + $0x3e0] sm:$0xff] }
  0x50   : > { %902 = vmatpush.bf16.msra.mxu0 %v2444_v24  ;;  %v2473_v24 = vld [vmem:[%s2978_s1 + $0x310] sm:$0xff] }
  0x51   : > { %987 = vmatpush.bf16.msra.mxu1 %v2452_v25  ;;  %v2482_v25 = vld [vmem:[%s2978_s1 + $0x350] sm:$0xff] }
  0x52   : > { %1072 = vmatpush.bf16.msra.mxu2 %v2460_v26  ;;  %v2491_v26 = vld [vmem:[%s2978_s1 + $0x390] sm:$0xff] }
  0x53   : > { %1157 = vmatpush.bf16.msra.mxu3 %v2468_v27  ;;  %v2500_v27 = vld [vmem:[%s2978_s1 + $0x3d0] sm:$0xff] }
  0x54   : > { %903 = vmatpush.bf16.msra.mxu0 %v2443_v28  ;;  %v2472_v28 = vld [vmem:[%s2978_s1 + $0x308] sm:$0xff] }
  0x55   : > { %988 = vmatpush.bf16.msra.mxu1 %v2451_v29  ;;  %v2481_v29 = vld [vmem:[%s2978_s1 + $0x348] sm:$0xff] }
  0x56   : > { %1073 = vmatpush.bf16.msra.mxu2 %v2459_v30  ;;  %v2490_v30 = vld [vmem:[%s2978_s1 + $0x388] sm:$0xff] }
  0x57   : > { %1158 = vmatpush.bf16.msra.mxu3 %v2467_v31  ;;  %v2499_v31 = vld [vmem:[%s2978_s1 + $0x3c8] sm:$0xff] }
  0x58   : > { %904 = vmatpush.bf16.msra.mxu0 %v2442_v32  ;;  %v2175_v32 = vld [vmem:[%s2663_s8] sm:$0x8] }
  0x59   : > { %989 = vmatpush.bf16.msra.mxu1 %v2450_v33  ;;  %v2470_v33 = vld [vmem:[%s2663_s8] sm:$0x10] }
  0x5a   : > { %1074 = vmatpush.bf16.msra.mxu2 %v2458_v34  ;;  %v2229_v34 = vld [vmem:[%s2663_s8 + $0x8] sm:$0x8] }
  0x5b   : > { %1159 = vmatpush.bf16.msra.mxu3 %v2466_v35  ;;  %v2479_v35 = vld [vmem:[%s2663_s8 + $0x8] sm:$0x10] }
  0x5c   : > { %905 = vmatpush.bf16.msra.mxu0 %v2441_v36  ;;  %v2283_v36 = vld [vmem:[%s2663_s8 + $0x10] sm:$0x8] }
  0x5d   : > { %990 = vmatpush.bf16.msra.mxu1 %v2449_v37  ;;  %v2488_v37 = vld [vmem:[%s2663_s8 + $0x10] sm:$0x10] }
  0x5e   : > { %1075 = vmatpush.bf16.msra.mxu2 %v2457_v38  ;;  %v2337_v38 = vld [vmem:[%s2663_s8 + $0x18] sm:$0x8]  ;;  %v2284_v44 = vor.u32 %v2488_v37, %v2283_v36 }
  0x5f   : > { %1160 = vmatpush.bf16.msra.mxu3 %v2465_v39  ;;  %v2497_v39 = vld [vmem:[%s2663_s8 + $0x18] sm:$0x10] }
  0x60   : > { %906 = vmatpush.bf16.msra.mxu0 %v2440_v40  ;;  %v2176_v40 = vor.u32 %v2470_v33, %v2175_v32  ;;  %v2338_v45 = vor.u32 %v2497_v39, %v2337_v38  ;;  %v1370_v50 = vrot.slane %v2284_v44, 3 }
  0x61   : > { %991 = vmatpush.bf16.msra.mxu1 %v2448_v41  ;;  %v2230_v41 = vor.u32 %v2479_v35, %v2229_v34 }
  0x62   : > { %1076 = vmatpush.bf16.msra.mxu2 %v2456_v42  ;;  %v2471_v42 = vld [vmem:[%s2978_s1 + $0x300] sm:$0xff]  ;;  %v1458_v51 = vrot.slane %v2338_v45, 3 }
  0x63   : > { %1161 = vmatpush.bf16.msra.mxu3 %v2464_v43  ;;  %v2480_v43 = vld [vmem:[%s2978_s1 + $0x340] sm:$0xff] }
  0x64   : > { %907 = vmatpush.bf16.msra.mxu0 %v2439_v48  ;;  %v1194_v48 = vrot.slane %v2176_v40, 3 }
  0x65   : > { %992 = vmatpush.bf16.msra.mxu1 %v2447_v49  ;;  %v1282_v49 = vrot.slane %v2230_v41, 3 }
  0x66   : > { %1077 = vmatpush.bf16.msra.mxu2 %v2455_v52 }
  0x67   : > { %1162 = vmatpush.bf16.msra.mxu3 %v2463_v53 }
  0x68   : > { %908 = vmatpush.bf16.msra.mxu0 %v2438_v56 }
  0x69   : > { %993 = vmatpush.bf16.msra.mxu1 %v2446_v57 }
  0x6a   : > { %1078 = vmatpush.bf16.msra.mxu2 %v2454_v60 }
  0x6b   : > { %1163 = vmatpush.bf16.msra.mxu3 %v2462_v61  ;;  %909 = vmatmul.bf16.vlgmr.msra.gmra.mxu0 %v851_v4 }
  0x6c   : > { %1244 = vmatpush.bf16.msrb.mxu0 %v2478_v0  ;;  %994 = vmatmul.bf16.vlgmr.msra.gmra.mxu1 %v936_v6 }
  0x6d   : > { %1332 = vmatpush.bf16.msrb.mxu1 %v2487_v1  ;;  %1079 = vmatmul.bf16.vlgmr.msra.gmra.mxu2 %v1021_v5 }
  0x6e   : > { %1420 = vmatpush.bf16.msrb.mxu2 %v2496_v2  ;;  %1164 = vmatmul.bf16.vlgmr.msra.gmra.mxu3 %v1106_v7 }
  0x6f   : > { %1508 = vmatpush.bf16.msrb.mxu3 %v2505_v3 }
  0x70   : > { %1245 = vmatpush.bf16.msrb.mxu0 %v2477_v8 }
  0x71   : > { %1333 = vmatpush.bf16.msrb.mxu1 %v2486_v9 }
  0x72   : > { %1421 = vmatpush.bf16.msrb.mxu2 %v2495_v10 }
  0x73   : > { %1509 = vmatpush.bf16.msrb.mxu3 %v2504_v11 }
  0x74   : > { %1246 = vmatpush.bf16.msrb.mxu0 %v2476_v12 }
  0x75   : > { %1334 = vmatpush.bf16.msrb.mxu1 %v2485_v13 }
  0x76   : > { %1422 = vmatpush.bf16.msrb.mxu2 %v2494_v14 }
  0x77   : > { %1510 = vmatpush.bf16.msrb.mxu3 %v2503_v15 }
  0x78   : > { %1247 = vmatpush.bf16.msrb.mxu0 %v2475_v16 }
  0x79   : > { %1335 = vmatpush.bf16.msrb.mxu1 %v2484_v17 }
  0x7a   : > { %1423 = vmatpush.bf16.msrb.mxu2 %v2493_v18 }
  0x7b   : > { %1511 = vmatpush.bf16.msrb.mxu3 %v2502_v19 }
  0x7c   : > { %1248 = vmatpush.bf16.msrb.mxu0 %v2474_v20 }
  0x7d   : > { %1336 = vmatpush.bf16.msrb.mxu1 %v2483_v21 }
  0x7e   : > { %1424 = vmatpush.bf16.msrb.mxu2 %v2492_v22 }
  0x7f   : > { %1512 = vmatpush.bf16.msrb.mxu3 %v2501_v23 }
  0x80   : > { %1249 = vmatpush.bf16.msrb.mxu0 %v2473_v24 }
  0x81   : > { %1337 = vmatpush.bf16.msrb.mxu1 %v2482_v25 }
  0x82   : > { %1425 = vmatpush.bf16.msrb.mxu2 %v2491_v26 }
  0x83   : > { %1513 = vmatpush.bf16.msrb.mxu3 %v2500_v27 }
  0x84   : > { %1250 = vmatpush.bf16.msrb.mxu0 %v2472_v28 }
  0x85   : > { %1338 = vmatpush.bf16.msrb.mxu1 %v2481_v29 }
  0x86   : > { %1426 = vmatpush.bf16.msrb.mxu2 %v2490_v30  ;;  %v2514_v30 = vld [vmem:[%s2979_s2] ss:$0 sm:$0xff] }
  0x87   : > { %1514 = vmatpush.bf16.msrb.mxu3 %v2499_v31 }
  0x88   : > { %1251 = vmatpush.bf16.msrb.mxu0 %v2471_v42 }
  0x89   : > { %1339 = vmatpush.bf16.msrb.mxu1 %v2480_v43 }
  0x8a   : > { %1427 = vmatpush.bf16.msrb.mxu2 %v2489_v46 }
  0x8b   : > { %1515 = vmatpush.bf16.msrb.mxu3 %v2498_v47  ;;  %1252 = vmatmul.bf16.vlgmr.msrb.gmra.mxu0 %v1194_v48 }
  0x8c   : > { %1340 = vmatmul.bf16.vlgmr.msrb.gmra.mxu1 %v1282_v49 }
  0x8d   : > { %1428 = vmatmul.bf16.vlgmr.msrb.gmra.mxu2 %v1370_v50 }
  0x8e   : > { %1516 = vmatmul.bf16.vlgmr.msrb.gmra.mxu3 %v1458_v51 }
  0xa8   : > { %v263_v52 = vpop.f32.mrf.mxu0 }
  0xa9   : > { %v324_v53 = vpop.f32.mrf.mxu1 }
  0xaa   : > { %v325_v54 = vadd.f32 %v324_v53, %v263_v52 }
  0xb0   : > { %v404_v55 = vpop.f32.mrf.mxu2  ;;  %v265_v58 = vpop.f32.mrf.mxu0 }
  0xb1   : > { %v408_v56 = vadd.f32 %v404_v55, %v325_v54  ;;  %v485_v57 = vpop.f32.mrf.mxu3  ;;  %v326_v60 = vpop.f32.mrf.mxu1 }
  0xb3   : > { %v489_v59 = vadd.f32 %v485_v57, %v408_v56 }
  0xb8   : > { %v406_v61 = vpop.f32.mrf.mxu2 }
  0xb9   : > { %v487_v62 = vpop.f32.mrf.mxu3 }
  0xc8   : > { %v570_v63 = vpop.f32.mrf.mxu0 }
  0xc9   : > { %v655_v0 = vpop.f32.mrf.mxu1  ;;  %v574_v9 = vadd.f32 %v570_v63, %v489_v59 }
  0xcb   : > { %v659_v13 = vadd.f32 %v655_v0, %v574_v9 }
  0xd0   : > { %v740_v1 = vpop.f32.mrf.mxu2  ;;  %v572_v3 = vpop.f32.mrf.mxu0 }
  0xd1   : > { %v825_v2 = vpop.f32.mrf.mxu3  ;;  %v657_v4 = vpop.f32.mrf.mxu1  ;;  %v744_v15 = vadd.f32 %v740_v1, %v659_v13 }
  0xd3   : > { %v829_v18 = vadd.f32 %v825_v2, %v744_v15 }
  0xd8   : > { %v742_v5 = vpop.f32.mrf.mxu2 }
  0xd9   : > { %v827_v6 = vpop.f32.mrf.mxu3 }
  0xe8   : > { %v910_v7 = vpop.f32.mrf.mxu0 }
  0xe9   : > { %v995_v8 = vpop.f32.mrf.mxu1  ;;  %v914_v19 = vadd.f32 %v910_v7, %v829_v18 }
  0xeb   : > { %v999_v20 = vadd.f32 %v995_v8, %v914_v19 }
  0xf0   : > { %v1080_v10 = vpop.f32.mrf.mxu2  ;;  %v912_v12 = vpop.f32.mrf.mxu0 }
  0xf1   : > { %v1165_v11 = vpop.f32.mrf.mxu3  ;;  %v997_v14 = vpop.f32.mrf.mxu1  ;;  %v1084_v21 = vadd.f32 %v1080_v10, %v999_v20 }
  0xf3   : > { %v1169_v22 = vadd.f32 %v1165_v11, %v1084_v21 }
  0xf8   : > { %v1082_v16 = vpop.f32.mrf.mxu2 }
  0xf9   : > { %v1167_v17 = vpop.f32.mrf.mxu3 }
 0x108   : > { %v1253_v23 = vpop.f32.mrf.mxu0 }
 0x109   : > { %v1341_v24 = vpop.f32.mrf.mxu1  ;;  %v1257_v25 = vadd.f32 %v1253_v23, %v1169_v22 }
 0x10b   : > { %v1345_v26 = vadd.f32 %v1341_v24, %v1257_v25 }
 0x110   : > { %v1429_v27 = vpop.f32.mrf.mxu2  ;;  %v1255_v31 = vpop.f32.mrf.mxu0 }
 0x111   : > { %v1517_v28 = vpop.f32.mrf.mxu3  ;;  %v1433_v29 = vadd.f32 %v1429_v27, %v1345_v26  ;;  %v1343_v32 = vpop.f32.mrf.mxu1 }
 0x113   : > { %v1521_v33 = vadd.f32 %v1517_v28, %v1433_v29 }
 0x115   : > { %v1525_v34 = vadd.f32 %v2514_v30, %v1521_v33 }
 0x117   : > { %1526 = vst [vmem:[%s168_s9] sm:$0xf] %v1525_v34 }
 0x118   : > { %v1431_v35 = vpop.f32.mrf.mxu2 }
 0x119   : > { %v1519_v36 = vpop.f32.mrf.mxu3 }
 0x11a PF: > { %s13_s12 = sadd.s32 1, %s2521_s12  }
 0x11b   : > { %p10_p4 = scmp.ge.s32.totalorder %s13_s12, 4  }
 0x11d   :  { %12 = sbr.rel (!%p10_p4) target bundleno = 1 (0x1), region = 80 }

</bundles_post_ra>
